<compile_context>
chip_gen: v5e
topology: v5e:2x2
jax: 0.10.0
libtpu: 0.0.40
codegen_flags: <defaults>
</compile_context>

<pallas_src>
import functools

import numpy as np
import jax
import jax.numpy as jnp
from jax.experimental import pallas as pl
from jax.experimental.pallas import tpu as pltpu


# ----------------------------------------------------------------------------
# config parsing (pure python, copied semantics from the PyTorch module)
# ----------------------------------------------------------------------------
def parse_enc_string(s):
    blocks = []
    for block in s.split(','):
        if 'x' in block:
            res, num = block.split('x')
            blocks.extend([(int(res), None) for _ in range(int(num))])
        elif 'd' in block:
            res, down_rate = block.split('d')
            blocks.append((int(res), int(down_rate)))
        elif 'u' in block:
            res, up_rate = block.split('u')
            blocks.append((int(res), int(up_rate)))
    return blocks


# ----------------------------------------------------------------------------
# constants / small helpers
# ----------------------------------------------------------------------------
_VMEM = pl.BlockSpec(memory_space=pltpu.MemorySpace.VMEM)
_VMEM_LIMIT = 32 * 1024 * 1024
_SQRT_HALF = 0.7071067811865476   # 1/sqrt(2)
_BN_EPS = 1e-5
_PAD = 8                          # sublane-aligned halo of the row-shift scratch


def _gelu(x):
    # exact (erf) gelu, matching torch.nn.functional.gelu default
    return 0.5 * x * (1.0 + jax.lax.erf(x * _SQRT_HALF))


# ----------------------------------------------------------------------------
# host-side weight packing for the row-packed (N*H, W*C) layout
# ----------------------------------------------------------------------------
def _pack_1x1(w1, width):
    """(Cin, Cout) 1x1 conv -> (W*Cin, W*Cout) block-diagonal matmul weight."""
    return jnp.kron(np.eye(width, dtype=np.float32), w1)


def _pack_3x3(w3, width):
    """(3, 3, Cin, Cout) [ky, kx, ci, co] 3x3 conv -> 3 block-banded matrices.

    Returns [W_dy-1, W_dy0, W_dy+1], each (W*Cin, W*Cout), where the dx taps
    and their zero padding at x = 0 / W-1 are encoded in the band structure:
        big[xp*Cin+ci, x*Cout+co] = w3[ky, xp-x+1, ci, co]   if |xp-x| <= 1.
    """
    sel = np.zeros((3, width, width), np.float32)
    for dxk in range(3):
        for x in range(width):
            xp = x + dxk - 1
            if 0 <= xp < width:
                sel[dxk, xp, x] = 1.0
    cin, cout = w3.shape[2], w3.shape[3]
    return [
        jnp.einsum('dpx,dio->pixo', sel, w3[dyk]).reshape(width * cin, width * cout)
        for dyk in range(3)
    ]


def _upsample_mats(n, h, w, c, u):
    """Static 0/1 matrices for in-kernel nearest-neighbour upsampling.

    R (N*H*u, N*H): row replication;  U (W*C, W*u*C): lane-group replication.
    up(x) = R @ (x @ U) reproduces F.interpolate(mode='nearest', scale=u).
    """
    r_mat = np.kron(np.eye(n, dtype=np.float32),
                    np.kron(np.eye(h, dtype=np.float32),
                            np.ones((u, 1), np.float32)))
    u_mat = np.kron(np.eye(w, dtype=np.float32),
                    np.kron(np.ones((1, u), np.float32),
                            np.eye(c, dtype=np.float32)))
    return r_mat, u_mat


def _bn_group_mat(width, c):
    """(W*C, W*C) matrix: sums over the W lane-groups per channel and
    redistributes the channel sum to every group (group-reduce + expand)."""
    return np.kron(np.ones((width, width), np.float32),
                   np.eye(c, dtype=np.float32))


def _tile_row(v, width):
    """(C,) parameter -> (1, W*C) packed row (lane order x*C + c)."""
    return jnp.tile(v, (width,)).reshape(1, -1)


# ----------------------------------------------------------------------------
# in-kernel helpers
# ----------------------------------------------------------------------------
def _row_masks(nh, h, lanes):
    """Boolean (nh, lanes) masks: valid source rows for the dy=-1 / dy=+1 taps.

    Built from a dim-0 iota (lane-replicated at generation time, so there is
    no cross-lane broadcast), reused by both 3x3 convs of a block.
    """
    row = jax.lax.broadcasted_iota(jnp.int32, (nh, lanes), 0)
    y = row % h
    return y > 0, y < (h - 1)


def _conv3x3_packed(x, shift_ref, wm_ref, w0_ref, wp_ref, top_ok, bot_ok):
    """3x3 'same' conv in the packed (NH, W*Cin) layout -> (NH, W*Cout) f32.

    Three accumulating MXU matmuls (one per dy tap); dx taps live inside the
    block-banded weights.  The halo rows of shift_ref are never initialised --
    they are excluded by the boolean selects (not multiplied), so stale VMEM
    cannot leak into the result.
    """
    nh = x.shape[0]
    shift_ref[pl.ds(_PAD, nh), :] = x
    up = shift_ref[pl.ds(_PAD - 1, nh), :]      # source row y-1  (tap dy=-1)
    down = shift_ref[pl.ds(_PAD + 1, nh), :]    # source row y+1  (tap dy=+1)
    acc = jnp.dot(x, w0_ref[...], preferred_element_type=jnp.float32)
    acc += jnp.dot(jnp.where(top_ok, up, 0.0), wm_ref[...],
                   preferred_element_type=jnp.float32)
    acc += jnp.dot(jnp.where(bot_ok, down, 0.0), wp_ref[...],
                   preferred_element_type=jnp.float32)
    return acc


# ----------------------------------------------------------------------------
# Pallas kernels
# ----------------------------------------------------------------------------
def _decoding_block_kernel(*refs, h, inv_m, upsample):
    """Fused DecodingBlock: [upsample] + conv_a/b/c/d + residual + BN + gelu."""
    if upsample:
        (x_ref, r_ref, u_ref, *rest) = refs
    else:
        (x_ref, *rest) = refs
    (wa_ref, ba_ref,
     wbm_ref, wb0_ref, wbp_ref, bb_ref,
     wcm_ref, wc0_ref, wcp_ref, bc_ref,
     wd_ref, bd_ref, g_ref, beta_ref, p0_ref,
     o_ref, shift_ref) = rest

    x = x_ref[...].astype(jnp.float32)
    if upsample:
        # nearest-neighbour upsample entirely in VMEM (row + lane replication)
        x = jnp.dot(r_ref[...],
                    jnp.dot(x, u_ref[...], preferred_element_type=jnp.float32),
                    preferred_element_type=jnp.float32)

    nh = x.shape[0]
    lanes_mid = wa_ref.shape[1]                       # W * Cmid
    top_ok, bot_ok = _row_masks(nh, h, lanes_mid)

    # conv_a (1x1, block-diagonal matmul) + gelu
    a = _gelu(jnp.dot(x, wa_ref[...], preferred_element_type=jnp.float32)
              + ba_ref[...])
    # conv_b (3x3) + gelu
    b = _gelu(_conv3x3_packed(a, shift_ref, wbm_ref, wb0_ref, wbp_ref,
                              top_ok, bot_ok) + bb_ref[...])
    # conv_c (3x3) + gelu
    c = _gelu(_conv3x3_packed(b, shift_ref, wcm_ref, wc0_ref, wcp_ref,
                              top_ok, bot_ok) + bc_ref[...])
    # conv_d (1x1) + residual
    z = (jnp.dot(c, wd_ref[...], preferred_element_type=jnp.float32)
         + bd_ref[...] + x)

    # BatchNorm2d (training-mode batch stats, biased variance), single pass:
    # z @ P0 sums over the W lane-groups per channel and re-expands, so the
    # per-channel mean / E[z^2] appear already broadcast across packed lanes.
    zsum = jnp.sum(jnp.dot(z, p0_ref[...], preferred_element_type=jnp.float32),
                   axis=0, keepdims=True)
    zsq = jnp.sum(jnp.dot(z * z, p0_ref[...], preferred_element_type=jnp.float32),
                  axis=0, keepdims=True)
    mean = zsum * inv_m
    var = zsq * inv_m - mean * mean
    scale = g_ref[...] * jax.lax.rsqrt(var + _BN_EPS)
    shift = beta_ref[...] - mean * scale
    o_ref[...] = _gelu(z * scale + shift).astype(o_ref.dtype)


def _out_conv_kernel(x_ref, wm_ref, w0_ref, wp_ref, o_ref, shift_ref, *, h):
    """Final out_conv (3x3, no bias) + sigmoid, packed layout."""
    x = x_ref[...].astype(jnp.float32)
    nh, lanes = x.shape
    top_ok, bot_ok = _row_masks(nh, h, lanes)
    y = _conv3x3_packed(x, shift_ref, wm_ref, w0_ref, wp_ref, top_ok, bot_ok)
    o_ref[...] = jax.nn.sigmoid(y).astype(o_ref.dtype)


# ----------------------------------------------------------------------------
# wrappers
# ----------------------------------------------------------------------------
def decoding_block_forward(x_packed, n, h, w, c, p, up_rate):
    """x_packed: (N*H, W*C) row-packed activation. Returns (out_packed, h, w)."""
    cmid = p['wa'].shape[1]
    ops = [x_packed]
    if up_rate is not None:
        r_mat, u_mat = _upsample_mats(n, h, w, c, up_rate)
        ops += [r_mat, u_mat]
        h, w = h * up_rate, w * up_rate
    nh, wc, wcm = n * h, w * c, w * cmid

    wb = _pack_3x3(p['wb'], w)
    wc3 = _pack_3x3(p['wc'], w)
    ops += [_pack_1x1(p['wa'], w), _tile_row(p['ba'], w),
            wb[0], wb[1], wb[2], _tile_row(p['bb'], w),
            wc3[0], wc3[1], wc3[2], _tile_row(p['bc'], w),
            _pack_1x1(p['wd'], w), _tile_row(p['bd'], w),
            _tile_row(p['gamma'], w), _tile_row(p['beta'], w),
            _bn_group_mat(w, c)]

    kernel = functools.partial(_decoding_block_kernel, h=h,
                               inv_m=1.0 / float(n * h * w),
                               upsample=up_rate is not None)
    out = pl.pallas_call(
        kernel,
        out_shape=jax.ShapeDtypeStruct((nh, wc), x_packed.dtype),
        in_specs=[_VMEM] * len(ops),
        out_specs=_VMEM,
        scratch_shapes=[pltpu.VMEM((nh + 2 * _PAD, wcm), jnp.float32)],
        compiler_params=pltpu.CompilerParams(vmem_limit_bytes=_VMEM_LIMIT),
    )(*ops)
    return out, h, w


def out_conv_sigmoid(x_packed, n, h, w, c, w_out):
    cout = w_out.shape[-1]
    wo = _pack_3x3(w_out, w)
    kernel = functools.partial(_out_conv_kernel, h=h)
    out = pl.pallas_call(
        kernel,
        out_shape=jax.ShapeDtypeStruct((n * h, w * cout), x_packed.dtype),
        in_specs=[_VMEM] * 4,
        out_specs=_VMEM,
        scratch_shapes=[pltpu.VMEM((n * h + 2 * _PAD, w * c), jnp.float32)],
        compiler_params=pltpu.CompilerParams(vmem_limit_bytes=_VMEM_LIMIT),
    )(x_packed, wo[0], wo[1], wo[2])
    return out.reshape(n, h, w, cout)


def decoder_forward(x_nhwc, params, blocks):
    n, h, w, c = x_nhwc.shape
    x = x_nhwc.reshape(n * h, w * c)   # free view: NHWC -> row-packed layout
    for p, (_res, up_rate) in zip(params['blocks'], blocks):
        x, h, w = decoding_block_forward(x, n, h, w, c, p, up_rate)
    return out_conv_sigmoid(x, n, h, w, c, params['w_out'])


# ----------------------------------------------------------------------------
# deterministic parameter construction (synthetic; shapes from __init__)
# ----------------------------------------------------------------------------
def init_decoder_params(key, out_channels, num_channels, blocks,
                        bottleneck_ratio):
    mid = int(num_channels * bottleneck_ratio)
    block_params = []
    for _ in blocks:
        key, *ks = jax.random.split(key, 11)
        block_params.append({
            'wa': 0.1 * jax.random.normal(ks[0], (num_channels, mid), jnp.float32),
            'ba': 0.1 * jax.random.normal(ks[1], (mid,), jnp.float32),
            'wb': 0.1 * jax.random.normal(ks[2], (3, 3, mid, mid), jnp.float32),
            'bb': 0.1 * jax.random.normal(ks[3], (mid,), jnp.float32),
            'wc': 0.1 * jax.random.normal(ks[4], (3, 3, mid, mid), jnp.float32),
            'bc': 0.1 * jax.random.normal(ks[5], (mid,), jnp.float32),
            'wd': 0.1 * jax.random.normal(ks[6], (mid, num_channels), jnp.float32),
            'bd': 0.1 * jax.random.normal(ks[7], (num_channels,), jnp.float32),
            'gamma': 1.0 + 0.01 * jax.random.normal(ks[8], (num_channels,), jnp.float32),
            'beta': 0.01 * jax.random.normal(ks[9], (num_channels,), jnp.float32),
        })
    key, kw = jax.random.split(key)
    w_out = 0.1 * jax.random.normal(kw, (3, 3, num_channels, out_channels),
                                    jnp.float32)
    return {'blocks': block_params, 'w_out': w_out}


# ----------------------------------------------------------------------------
# demo
# ----------------------------------------------------------------------------
if __name__ == "__main__":
    out_channels = 3
    num_channels = 16
    bottleneck_ratio = 0.5
    dec_blocks_str = "8x1,16u2"   # one plain block @8, one 2x-upsample block @16
    blocks = parse_enc_string(dec_blocks_str)

    key = jax.random.PRNGKey(0)
    key, kp, kx = jax.random.split(key, 3)
    params = init_decoder_params(kp, out_channels, num_channels, blocks,
                                 bottleneck_ratio)

    # input: NHWC (2, 8, 8, 16)  ==  PyTorch NCHW (2, 16, 8, 8)
    x = jax.random.normal(kx, (2, 8, 8, num_channels), jnp.float32)

    fwd = jax.jit(functools.partial(decoder_forward, blocks=blocks))
    y = fwd(x, params)
    jax.block_until_ready(y)

    assert y.shape == (2, 16, 16, out_channels), y.shape
    assert bool(jnp.all(jnp.isfinite(y))) and bool(jnp.all((y >= 0) & (y <= 1)))
    print("KERNEL_OK")
</pallas_src>

<mosaic_0001>
module attributes {stable_mosaic.version = 11 : i64} {
  func.func @_decoding_block_kernel(%arg0: memref<16x128xf32, #tpu.memory_space<vmem>>, %arg1: memref<128x64xf32, #tpu.memory_space<vmem>>, %arg2: memref<1x64xf32, #tpu.memory_space<vmem>>, %arg3: memref<64x64xf32, #tpu.memory_space<vmem>>, %arg4: memref<64x64xf32, #tpu.memory_space<vmem>>, %arg5: memref<64x64xf32, #tpu.memory_space<vmem>>, %arg6: memref<1x64xf32, #tpu.memory_space<vmem>>, %arg7: memref<64x64xf32, #tpu.memory_space<vmem>>, %arg8: memref<64x64xf32, #tpu.memory_space<vmem>>, %arg9: memref<64x64xf32, #tpu.memory_space<vmem>>, %arg10: memref<1x64xf32, #tpu.memory_space<vmem>>, %arg11: memref<64x128xf32, #tpu.memory_space<vmem>>, %arg12: memref<1x128xf32, #tpu.memory_space<vmem>>, %arg13: memref<1x128xf32, #tpu.memory_space<vmem>>, %arg14: memref<1x128xf32, #tpu.memory_space<vmem>>, %arg15: memref<128x128xf32, #tpu.memory_space<vmem>>, %arg16: memref<16x128xf32, #tpu.memory_space<vmem>>, %arg17: memref<32x64xf32, #tpu.memory_space<vmem>>) attributes {dimension_semantics = [], scalar_prefetch = 0 : i64, scratch_operands = 1 : i64, tpu.core_type = #tpu.core_type<tc>} {
    %c0 = arith.constant 0 : index
    %c0_0 = arith.constant 0 : index
    %0 = vector.load %arg0[%c0, %c0_0] : memref<16x128xf32, #tpu.memory_space<vmem>>, vector<16x128xf32>
    %1 = tpu.iota {dimensions = array<i32: 0>} : vector<16x64xi32>
    %c8_i32 = arith.constant 8 : i32
    %c0_i32 = arith.constant 0 : i32
    %2 = arith.cmpi eq, %c8_i32, %c0_i32 : i32
    %c1_i32 = arith.constant 1 : i32
    %3 = arith.select %2, %c1_i32, %c8_i32 : i32
    %4 = vector.broadcast %3 : i32 to vector<16x64xi32>
    %5 = arith.remsi %1, %4 : vector<16x64xi32>
    %c0_i32_1 = arith.constant 0 : i32
    %6 = vector.broadcast %c0_i32_1 : i32 to vector<16x64xi32>
    %7 = arith.cmpi ne, %5, %6 : vector<16x64xi32>
    %c0_i32_2 = arith.constant 0 : i32
    %8 = vector.broadcast %c0_i32_2 : i32 to vector<16x64xi32>
    %9 = arith.cmpi slt, %5, %8 : vector<16x64xi32>
    %c0_i32_3 = arith.constant 0 : i32
    %10 = arith.cmpi slt, %3, %c0_i32_3 : i32
    %11 = vector.broadcast %10 : i1 to vector<16x64xi1>
    %12 = vector.broadcast %11 : vector<16x64xi1> to vector<16x64xi1>
    %13 = arith.xori %9, %12 : vector<16x64xi1>
    %14 = arith.andi %13, %7 : vector<16x64xi1>
    %15 = vector.broadcast %3 : i32 to vector<16x64xi32>
    %16 = arith.addi %5, %15 : vector<16x64xi32>
    %17 = arith.select %14, %16, %5 : vector<16x64xi1>, vector<16x64xi32>
    %c0_i32_4 = arith.constant 0 : i32
    %18 = vector.broadcast %c0_i32_4 : i32 to vector<16x64xi32>
    %19 = arith.cmpi sgt, %17, %18 : vector<16x64xi32>
    %c7_i32 = arith.constant 7 : i32
    %20 = vector.broadcast %c7_i32 : i32 to vector<16x64xi32>
    %21 = arith.cmpi slt, %17, %20 : vector<16x64xi32>
    %c0_5 = arith.constant 0 : index
    %c0_6 = arith.constant 0 : index
    %22 = vector.load %arg1[%c0_5, %c0_6] : memref<128x64xf32, #tpu.memory_space<vmem>>, vector<128x64xf32>
    %cst = arith.constant dense<0.000000e+00> : vector<16x64xf32>
    %23 = tpu.matmul %0, %22, %cst {dimension_numbers = #tpu.dot_dimension_numbers<[1], [0], [0], [1], [0, 0, 1, 1], [], []>} : vector<16x128xf32>, vector<128x64xf32>, vector<16x64xf32> -> vector<16x64xf32>
    %c0_7 = arith.constant 0 : index
    %c0_8 = arith.constant 0 : index
    %24 = vector.load %arg2[%c0_7, %c0_8] : memref<1x64xf32, #tpu.memory_space<vmem>>, vector<1x64xf32>
    %25 = vector.broadcast %24 : vector<1x64xf32> to vector<16x64xf32>
    %26 = arith.addf %23, %25 : vector<16x64xf32>
    %cst_9 = arith.constant 5.000000e-01 : f32
    %27 = vector.broadcast %cst_9 : f32 to vector<16x64xf32>
    %28 = arith.mulf %27, %26 : vector<16x64xf32>
    %cst_10 = arith.constant 0.707106769 : f32
    %29 = vector.broadcast %cst_10 : f32 to vector<16x64xf32>
    %30 = arith.mulf %26, %29 : vector<16x64xf32>
    %31 = math.erf %30 : vector<16x64xf32>
    %cst_11 = arith.constant 1.000000e+00 : f32
    %32 = vector.broadcast %cst_11 : f32 to vector<16x64xf32>
    %33 = arith.addf %32, %31 : vector<16x64xf32>
    %34 = arith.mulf %28, %33 : vector<16x64xf32>
    %c8 = arith.constant 8 : index
    %c0_12 = arith.constant 0 : index
    %35 = vector.load %arg17[%c8, %c0_12] : memref<32x64xf32, #tpu.memory_space<vmem>>, vector<16x64xf32>
    tpu.vector_store %arg17[%c8, %c0_12], %34 {strides = array<i32>} : memref<32x64xf32, #tpu.memory_space<vmem>>, vector<16x64xf32>,
    %c7 = arith.constant 7 : index
    %c0_13 = arith.constant 0 : index
    %36 = vector.load %arg17[%c7, %c0_13] : memref<32x64xf32, #tpu.memory_space<vmem>>, vector<16x64xf32>
    %c9 = arith.constant 9 : index
    %c0_14 = arith.constant 0 : index
    %37 = vector.load %arg17[%c9, %c0_14] : memref<32x64xf32, #tpu.memory_space<vmem>>, vector<16x64xf32>
    %c0_15 = arith.constant 0 : index
    %c0_16 = arith.constant 0 : index
    %38 = vector.load %arg4[%c0_15, %c0_16] : memref<64x64xf32, #tpu.memory_space<vmem>>, vector<64x64xf32>
    %cst_17 = arith.constant dense<0.000000e+00> : vector<16x64xf32>
    %39 = tpu.matmul %34, %38, %cst_17 {dimension_numbers = #tpu.dot_dimension_numbers<[1], [0], [0], [1], [0, 0, 1, 1], [], []>} : vector<16x64xf32>, vector<64x64xf32>, vector<16x64xf32> -> vector<16x64xf32>
    %cst_18 = arith.constant 0.000000e+00 : f32
    %40 = vector.broadcast %cst_18 : f32 to vector<16x64xf32>
    %41 = arith.select %19, %36, %40 : vector<16x64xi1>, vector<16x64xf32>
    %c0_19 = arith.constant 0 : index
    %c0_20 = arith.constant 0 : index
    %42 = vector.load %arg3[%c0_19, %c0_20] : memref<64x64xf32, #tpu.memory_space<vmem>>, vector<64x64xf32>
    %cst_21 = arith.constant dense<0.000000e+00> : vector<16x64xf32>
    %43 = tpu.matmul %41, %42, %cst_21 {dimension_numbers = #tpu.dot_dimension_numbers<[1], [0], [0], [1], [0, 0, 1, 1], [], []>} : vector<16x64xf32>, vector<64x64xf32>, vector<16x64xf32> -> vector<16x64xf32>
    %44 = arith.addf %39, %43 : vector<16x64xf32>
    %cst_22 = arith.constant 0.000000e+00 : f32
    %45 = vector.broadcast %cst_22 : f32 to vector<16x64xf32>
    %46 = arith.select %21, %37, %45 : vector<16x64xi1>, vector<16x64xf32>
    %c0_23 = arith.constant 0 : index
    %c0_24 = arith.constant 0 : index
    %47 = vector.load %arg5[%c0_23, %c0_24] : memref<64x64xf32, #tpu.memory_space<vmem>>, vector<64x64xf32>
    %cst_25 = arith.constant dense<0.000000e+00> : vector<16x64xf32>
    %48 = tpu.matmul %46, %47, %cst_25 {dimension_numbers = #tpu.dot_dimension_numbers<[1], [0], [0], [1], [0, 0, 1, 1], [], []>} : vector<16x64xf32>, vector<64x64xf32>, vector<16x64xf32> -> vector<16x64xf32>
    %49 = arith.addf %44, %48 : vector<16x64xf32>
    %c0_26 = arith.constant 0 : index
    %c0_27 = arith.constant 0 : index
    %50 = vector.load %arg6[%c0_26, %c0_27] : memref<1x64xf32, #tpu.memory_space<vmem>>, vector<1x64xf32>
    %51 = vector.broadcast %50 : vector<1x64xf32> to vector<16x64xf32>
    %52 = arith.addf %49, %51 : vector<16x64xf32>
    %cst_28 = arith.constant 5.000000e-01 : f32
    %53 = vector.broadcast %cst_28 : f32 to vector<16x64xf32>
    %54 = arith.mulf %53, %52 : vector<16x64xf32>
    %cst_29 = arith.constant 0.707106769 : f32
    %55 = vector.broadcast %cst_29 : f32 to vector<16x64xf32>
    %56 = arith.mulf %52, %55 : vector<16x64xf32>
    %57 = math.erf %56 : vector<16x64xf32>
    %cst_30 = arith.constant 1.000000e+00 : f32
    %58 = vector.broadcast %cst_30 : f32 to vector<16x64xf32>
    %59 = arith.addf %58, %57 : vector<16x64xf32>
    %60 = arith.mulf %54, %59 : vector<16x64xf32>
    %c8_31 = arith.constant 8 : index
    %c0_32 = arith.constant 0 : index
    %61 = vector.load %arg17[%c8_31, %c0_32] : memref<32x64xf32, #tpu.memory_space<vmem>>, vector<16x64xf32>
    tpu.vector_store %arg17[%c8_31, %c0_32], %60 {strides = array<i32>} : memref<32x64xf32, #tpu.memory_space<vmem>>, vector<16x64xf32>,
    %c7_33 = arith.constant 7 : index
    %c0_34 = arith.constant 0 : index
    %62 = vector.load %arg17[%c7_33, %c0_34] : memref<32x64xf32, #tpu.memory_space<vmem>>, vector<16x64xf32>
    %c9_35 = arith.constant 9 : index
    %c0_36 = arith.constant 0 : index
    %63 = vector.load %arg17[%c9_35, %c0_36] : memref<32x64xf32, #tpu.memory_space<vmem>>, vector<16x64xf32>
    %c0_37 = arith.constant 0 : index
    %c0_38 = arith.constant 0 : index
    %64 = vector.load %arg8[%c0_37, %c0_38] : memref<64x64xf32, #tpu.memory_space<vmem>>, vector<64x64xf32>
    %cst_39 = arith.constant dense<0.000000e+00> : vector<16x64xf32>
    %65 = tpu.matmul %60, %64, %cst_39 {dimension_numbers = #tpu.dot_dimension_numbers<[1], [0], [0], [1], [0, 0, 1, 1], [], []>} : vector<16x64xf32>, vector<64x64xf32>, vector<16x64xf32> -> vector<16x64xf32>
    %cst_40 = arith.constant 0.000000e+00 : f32
    %66 = vector.broadcast %cst_40 : f32 to vector<16x64xf32>
    %67 = arith.select %19, %62, %66 : vector<16x64xi1>, vector<16x64xf32>
    %c0_41 = arith.constant 0 : index
    %c0_42 = arith.constant 0 : index
    %68 = vector.load %arg7[%c0_41, %c0_42] : memref<64x64xf32, #tpu.memory_space<vmem>>, vector<64x64xf32>
    %cst_43 = arith.constant dense<0.000000e+00> : vector<16x64xf32>
    %69 = tpu.matmul %67, %68, %cst_43 {dimension_numbers = #tpu.dot_dimension_numbers<[1], [0], [0], [1], [0, 0, 1, 1], [], []>} : vector<16x64xf32>, vector<64x64xf32>, vector<16x64xf32> -> vector<16x64xf32>
    %70 = arith.addf %65, %69 : vector<16x64xf32>
    %cst_44 = arith.constant 0.000000e+00 : f32
    %71 = vector.broadcast %cst_44 : f32 to vector<16x64xf32>
    %72 = arith.select %21, %63, %71 : vector<16x64xi1>, vector<16x64xf32>
    %c0_45 = arith.constant 0 : index
    %c0_46 = arith.constant 0 : index
    %73 = vector.load %arg9[%c0_45, %c0_46] : memref<64x64xf32, #tpu.memory_space<vmem>>, vector<64x64xf32>
    %cst_47 = arith.constant dense<0.000000e+00> : vector<16x64xf32>
    %74 = tpu.matmul %72, %73, %cst_47 {dimension_numbers = #tpu.dot_dimension_numbers<[1], [0], [0], [1], [0, 0, 1, 1], [], []>} : vector<16x64xf32>, vector<64x64xf32>, vector<16x64xf32> -> vector<16x64xf32>
    %75 = arith.addf %70, %74 : vector<16x64xf32>
    %c0_48 = arith.constant 0 : index
    %c0_49 = arith.constant 0 : index
    %76 = vector.load %arg10[%c0_48, %c0_49] : memref<1x64xf32, #tpu.memory_space<vmem>>, vector<1x64xf32>
    %77 = vector.broadcast %76 : vector<1x64xf32> to vector<16x64xf32>
    %78 = arith.addf %75, %77 : vector<16x64xf32>
    %cst_50 = arith.constant 5.000000e-01 : f32
    %79 = vector.broadcast %cst_50 : f32 to vector<16x64xf32>
    %80 = arith.mulf %79, %78 : vector<16x64xf32>
    %cst_51 = arith.constant 0.707106769 : f32
    %81 = vector.broadcast %cst_51 : f32 to vector<16x64xf32>
    %82 = arith.mulf %78, %81 : vector<16x64xf32>
    %83 = math.erf %82 : vector<16x64xf32>
    %cst_52 = arith.constant 1.000000e+00 : f32
    %84 = vector.broadcast %cst_52 : f32 to vector<16x64xf32>
    %85 = arith.addf %84, %83 : vector<16x64xf32>
    %86 = arith.mulf %80, %85 : vector<16x64xf32>
    %c0_53 = arith.constant 0 : index
    %c0_54 = arith.constant 0 : index
    %87 = vector.load %arg11[%c0_53, %c0_54] : memref<64x128xf32, #tpu.memory_space<vmem>>, vector<64x128xf32>
    %cst_55 = arith.constant dense<0.000000e+00> : vector<16x128xf32>
    %88 = tpu.matmul %86, %87, %cst_55 {dimension_numbers = #tpu.dot_dimension_numbers<[1], [0], [0], [1], [0, 0, 1, 1], [], []>} : vector<16x64xf32>, vector<64x128xf32>, vector<16x128xf32> -> vector<16x128xf32>
    %c0_56 = arith.constant 0 : index
    %c0_57 = arith.constant 0 : index
    %89 = vector.load %arg12[%c0_56, %c0_57] : memref<1x128xf32, #tpu.memory_space<vmem>>, vector<1x128xf32>
    %90 = vector.broadcast %89 : vector<1x128xf32> to vector<16x128xf32>
    %91 = arith.addf %88, %90 : vector<16x128xf32>
    %92 = arith.addf %91, %0 : vector<16x128xf32>
    %c0_58 = arith.constant 0 : index
    %c0_59 = arith.constant 0 : index
    %93 = vector.load %arg15[%c0_58, %c0_59] : memref<128x128xf32, #tpu.memory_space<vmem>>, vector<128x128xf32>
    %cst_60 = arith.constant dense<0.000000e+00> : vector<16x128xf32>
    %94 = tpu.matmul %92, %93, %cst_60 {dimension_numbers = #tpu.dot_dimension_numbers<[1], [0], [0], [1], [0, 0, 1, 1], [], []>} : vector<16x128xf32>, vector<128x128xf32>, vector<16x128xf32> -> vector<16x128xf32>
    %cst_61 = arith.constant dense<0.000000e+00> : vector<128xf32>
    %95 = vector.multi_reduction <add>, %94, %cst_61 [0] : vector<16x128xf32> to vector<128xf32>
    %96 = vector.shape_cast %95 : vector<128xf32> to vector<1x128xf32>
    %97 = arith.mulf %92, %92 : vector<16x128xf32>
    %c0_62 = arith.constant 0 : index
    %c0_63 = arith.constant 0 : index
    %98 = vector.load %arg15[%c0_62, %c0_63] : memref<128x128xf32, #tpu.memory_space<vmem>>, vector<128x128xf32>
    %cst_64 = arith.constant dense<0.000000e+00> : vector<16x128xf32>
    %99 = tpu.matmul %97, %98, %cst_64 {dimension_numbers = #tpu.dot_dimension_numbers<[1], [0], [0], [1], [0, 0, 1, 1], [], []>} : vector<16x128xf32>, vector<128x128xf32>, vector<16x128xf32> -> vector<16x128xf32>
    %cst_65 = arith.constant dense<0.000000e+00> : vector<128xf32>
    %100 = vector.multi_reduction <add>, %99, %cst_65 [0] : vector<16x128xf32> to vector<128xf32>
    %101 = vector.shape_cast %100 : vector<128xf32> to vector<1x128xf32>
    %cst_66 = arith.constant 7.812500e-03 : f32
    %102 = vector.broadcast %cst_66 : f32 to vector<1x128xf32>
    %103 = arith.mulf %96, %102 : vector<1x128xf32>
    %cst_67 = arith.constant 7.812500e-03 : f32
    %104 = vector.broadcast %cst_67 : f32 to vector<1x128xf32>
    %105 = arith.mulf %101, %104 : vector<1x128xf32>
    %106 = arith.mulf %103, %103 : vector<1x128xf32>
    %107 = arith.subf %105, %106 : vector<1x128xf32>
    %c0_68 = arith.constant 0 : index
    %c0_69 = arith.constant 0 : index
    %108 = vector.load %arg13[%c0_68, %c0_69] : memref<1x128xf32, #tpu.memory_space<vmem>>, vector<1x128xf32>
    %cst_70 = arith.constant 9.99999974E-6 : f32
    %109 = vector.broadcast %cst_70 : f32 to vector<1x128xf32>
    %110 = arith.addf %107, %109 : vector<1x128xf32>
    %111 = math.rsqrt %110 : vector<1x128xf32>
    %112 = arith.mulf %108, %111 : vector<1x128xf32>
    %c0_71 = arith.constant 0 : index
    %c0_72 = arith.constant 0 : index
    %113 = vector.load %arg14[%c0_71, %c0_72] : memref<1x128xf32, #tpu.memory_space<vmem>>, vector<1x128xf32>
    %114 = arith.mulf %103, %112 : vector<1x128xf32>
    %115 = arith.subf %113, %114 : vector<1x128xf32>
    %116 = vector.broadcast %112 : vector<1x128xf32> to vector<16x128xf32>
    %117 = arith.mulf %92, %116 : vector<16x128xf32>
    %118 = vector.broadcast %115 : vector<1x128xf32> to vector<16x128xf32>
    %119 = arith.addf %117, %118 : vector<16x128xf32>
    %cst_73 = arith.constant 5.000000e-01 : f32
    %120 = vector.broadcast %cst_73 : f32 to vector<16x128xf32>
    %121 = arith.mulf %120, %119 : vector<16x128xf32>
    %cst_74 = arith.constant 0.707106769 : f32
    %122 = vector.broadcast %cst_74 : f32 to vector<16x128xf32>
    %123 = arith.mulf %119, %122 : vector<16x128xf32>
    %124 = math.erf %123 : vector<16x128xf32>
    %cst_75 = arith.constant 1.000000e+00 : f32
    %125 = vector.broadcast %cst_75 : f32 to vector<16x128xf32>
    %126 = arith.addf %125, %124 : vector<16x128xf32>
    %127 = arith.mulf %121, %126 : vector<16x128xf32>
    %c0_76 = arith.constant 0 : index
    %c0_77 = arith.constant 0 : index
    %128 = vector.load %arg16[%c0_76, %c0_77] : memref<16x128xf32, #tpu.memory_space<vmem>>, vector<16x128xf32>
    tpu.vector_store %arg16[%c0_76, %c0_77], %127 {strides = array<i32>} : memref<16x128xf32, #tpu.memory_space<vmem>>, vector<16x128xf32>,
    return
  }
}

module attributes {stable_mosaic.version = 11 : i64} {
  func.func @_decoding_block_kernel(%arg0: memref<16x128xf32, #tpu.memory_space<vmem>>, %arg1: memref<32x16xf32, #tpu.memory_space<vmem>>, %arg2: memref<128x256xf32, #tpu.memory_space<vmem>>, %arg3: memref<256x128xf32, #tpu.memory_space<vmem>>, %arg4: memref<1x128xf32, #tpu.memory_space<vmem>>, %arg5: memref<128x128xf32, #tpu.memory_space<vmem>>, %arg6: memref<128x128xf32, #tpu.memory_space<vmem>>, %arg7: memref<128x128xf32, #tpu.memory_space<vmem>>, %arg8: memref<1x128xf32, #tpu.memory_space<vmem>>, %arg9: memref<128x128xf32, #tpu.memory_space<vmem>>, %arg10: memref<128x128xf32, #tpu.memory_space<vmem>>, %arg11: memref<128x128xf32, #tpu.memory_space<vmem>>, %arg12: memref<1x128xf32, #tpu.memory_space<vmem>>, %arg13: memref<128x256xf32, #tpu.memory_space<vmem>>, %arg14: memref<1x256xf32, #tpu.memory_space<vmem>>, %arg15: memref<1x256xf32, #tpu.memory_space<vmem>>, %arg16: memref<1x256xf32, #tpu.memory_space<vmem>>, %arg17: memref<256x256xf32, #tpu.memory_space<vmem>>, %arg18: memref<32x256xf32, #tpu.memory_space<vmem>>, %arg19: memref<48x128xf32, #tpu.memory_space<vmem>>) attributes {dimension_semantics = [], scalar_prefetch = 0 : i64, scratch_operands = 1 : i64, tpu.core_type = #tpu.core_type<tc>} {
    %c0 = arith.constant 0 : index
    %c0_0 = arith.constant 0 : index
    %0 = vector.load %arg0[%c0, %c0_0] : memref<16x128xf32, #tpu.memory_space<vmem>>, vector<16x128xf32>
    %c0_1 = arith.constant 0 : index
    %c0_2 = arith.constant 0 : index
    %1 = vector.load %arg1[%c0_1, %c0_2] : memref<32x16xf32, #tpu.memory_space<vmem>>, vector<32x16xf32>
    %c0_3 = arith.constant 0 : index
    %c0_4 = arith.constant 0 : index
    %2 = vector.load %arg2[%c0_3, %c0_4] : memref<128x256xf32, #tpu.memory_space<vmem>>, vector<128x256xf32>
    %cst = arith.constant dense<0.000000e+00> : vector<16x256xf32>
    %3 = tpu.matmul %0, %2, %cst {dimension_numbers = #tpu.dot_dimension_numbers<[1], [0], [0], [1], [0, 0, 1, 1], [], []>} : vector<16x128xf32>, vector<128x256xf32>, vector<16x256xf32> -> vector<16x256xf32>
    %cst_5 = arith.constant dense<0.000000e+00> : vector<32x256xf32>
    %4 = tpu.matmul %1, %3, %cst_5 {dimension_numbers = #tpu.dot_dimension_numbers<[1], [0], [0], [1], [0, 0, 1, 1], [], []>} : vector<32x16xf32>, vector<16x256xf32>, vector<32x256xf32> -> vector<32x256xf32>
    %5 = tpu.iota {dimensions = array<i32: 0>} : vector<32x128xi32>
    %c16_i32 = arith.constant 16 : i32
    %c0_i32 = arith.constant 0 : i32
    %6 = arith.cmpi eq, %c16_i32, %c0_i32 : i32
    %c1_i32 = arith.constant 1 : i32
    %7 = arith.select %6, %c1_i32, %c16_i32 : i32
    %8 = vector.broadcast %7 : i32 to vector<32x128xi32>
    %9 = arith.remsi %5, %8 : vector<32x128xi32>
    %c0_i32_6 = arith.constant 0 : i32
    %10 = vector.broadcast %c0_i32_6 : i32 to vector<32x128xi32>
    %11 = arith.cmpi ne, %9, %10 : vector<32x128xi32>
    %c0_i32_7 = arith.constant 0 : i32
    %12 = vector.broadcast %c0_i32_7 : i32 to vector<32x128xi32>
    %13 = arith.cmpi slt, %9, %12 : vector<32x128xi32>
    %c0_i32_8 = arith.constant 0 : i32
    %14 = arith.cmpi slt, %7, %c0_i32_8 : i32
    %15 = vector.broadcast %14 : i1 to vector<32x128xi1>
    %16 = vector.broadcast %15 : vector<32x128xi1> to vector<32x128xi1>
    %17 = arith.xori %13, %16 : vector<32x128xi1>
    %18 = arith.andi %17, %11 : vector<32x128xi1>
    %19 = vector.broadcast %7 : i32 to vector<32x128xi32>
    %20 = arith.addi %9, %19 : vector<32x128xi32>
    %21 = arith.select %18, %20, %9 : vector<32x128xi1>, vector<32x128xi32>
    %c0_i32_9 = arith.constant 0 : i32
    %22 = vector.broadcast %c0_i32_9 : i32 to vector<32x128xi32>
    %23 = arith.cmpi sgt, %21, %22 : vector<32x128xi32>
    %c15_i32 = arith.constant 15 : i32
    %24 = vector.broadcast %c15_i32 : i32 to vector<32x128xi32>
    %25 = arith.cmpi slt, %21, %24 : vector<32x128xi32>
    %c0_10 = arith.constant 0 : index
    %c0_11 = arith.constant 0 : index
    %26 = vector.load %arg3[%c0_10, %c0_11] : memref<256x128xf32, #tpu.memory_space<vmem>>, vector<256x128xf32>
    %cst_12 = arith.constant dense<0.000000e+00> : vector<32x128xf32>
    %27 = tpu.matmul %4, %26, %cst_12 {dimension_numbers = #tpu.dot_dimension_numbers<[1], [0], [0], [1], [0, 0, 1, 1], [], []>} : vector<32x256xf32>, vector<256x128xf32>, vector<32x128xf32> -> vector<32x128xf32>
    %c0_13 = arith.constant 0 : index
    %c0_14 = arith.constant 0 : index
    %28 = vector.load %arg4[%c0_13, %c0_14] : memref<1x128xf32, #tpu.memory_space<vmem>>, vector<1x128xf32>
    %29 = vector.broadcast %28 : vector<1x128xf32> to vector<32x128xf32>
    %30 = arith.addf %27, %29 : vector<32x128xf32>
    %cst_15 = arith.constant 5.000000e-01 : f32
    %31 = vector.broadcast %cst_15 : f32 to vector<32x128xf32>
    %32 = arith.mulf %31, %30 : vector<32x128xf32>
    %cst_16 = arith.constant 0.707106769 : f32
    %33 = vector.broadcast %cst_16 : f32 to vector<32x128xf32>
    %34 = arith.mulf %30, %33 : vector<32x128xf32>
    %35 = math.erf %34 : vector<32x128xf32>
    %cst_17 = arith.constant 1.000000e+00 : f32
    %36 = vector.broadcast %cst_17 : f32 to vector<32x128xf32>
    %37 = arith.addf %36, %35 : vector<32x128xf32>
    %38 = arith.mulf %32, %37 : vector<32x128xf32>
    %c8 = arith.constant 8 : index
    %c0_18 = arith.constant 0 : index
    %39 = vector.load %arg19[%c8, %c0_18] : memref<48x128xf32, #tpu.memory_space<vmem>>, vector<32x128xf32>
    tpu.vector_store %arg19[%c8, %c0_18], %38 {strides = array<i32>} : memref<48x128xf32, #tpu.memory_space<vmem>>, vector<32x128xf32>,
    %c7 = arith.constant 7 : index
    %c0_19 = arith.constant 0 : index
    %40 = vector.load %arg19[%c7, %c0_19] : memref<48x128xf32, #tpu.memory_space<vmem>>, vector<32x128xf32>
    %c9 = arith.constant 9 : index
    %c0_20 = arith.constant 0 : index
    %41 = vector.load %arg19[%c9, %c0_20] : memref<48x128xf32, #tpu.memory_space<vmem>>, vector<32x128xf32>
    %c0_21 = arith.constant 0 : index
    %c0_22 = arith.constant 0 : index
    %42 = vector.load %arg6[%c0_21, %c0_22] : memref<128x128xf32, #tpu.memory_space<vmem>>, vector<128x128xf32>
    %cst_23 = arith.constant dense<0.000000e+00> : vector<32x128xf32>
    %43 = tpu.matmul %38, %42, %cst_23 {dimension_numbers = #tpu.dot_dimension_numbers<[1], [0], [0], [1], [0, 0, 1, 1], [], []>} : vector<32x128xf32>, vector<128x128xf32>, vector<32x128xf32> -> vector<32x128xf32>
    %cst_24 = arith.constant 0.000000e+00 : f32
    %44 = vector.broadcast %cst_24 : f32 to vector<32x128xf32>
    %45 = arith.select %23, %40, %44 : vector<32x128xi1>, vector<32x128xf32>
    %c0_25 = arith.constant 0 : index
    %c0_26 = arith.constant 0 : index
    %46 = vector.load %arg5[%c0_25, %c0_26] : memref<128x128xf32, #tpu.memory_space<vmem>>, vector<128x128xf32>
    %cst_27 = arith.constant dense<0.000000e+00> : vector<32x128xf32>
    %47 = tpu.matmul %45, %46, %cst_27 {dimension_numbers = #tpu.dot_dimension_numbers<[1], [0], [0], [1], [0, 0, 1, 1], [], []>} : vector<32x128xf32>, vector<128x128xf32>, vector<32x128xf32> -> vector<32x128xf32>
    %48 = arith.addf %43, %47 : vector<32x128xf32>
    %cst_28 = arith.constant 0.000000e+00 : f32
    %49 = vector.broadcast %cst_28 : f32 to vector<32x128xf32>
    %50 = arith.select %25, %41, %49 : vector<32x128xi1>, vector<32x128xf32>
    %c0_29 = arith.constant 0 : index
    %c0_30 = arith.constant 0 : index
    %51 = vector.load %arg7[%c0_29, %c0_30] : memref<128x128xf32, #tpu.memory_space<vmem>>, vector<128x128xf32>
    %cst_31 = arith.constant dense<0.000000e+00> : vector<32x128xf32>
    %52 = tpu.matmul %50, %51, %cst_31 {dimension_numbers = #tpu.dot_dimension_numbers<[1], [0], [0], [1], [0, 0, 1, 1], [], []>} : vector<32x128xf32>, vector<128x128xf32>, vector<32x128xf32> -> vector<32x128xf32>
    %53 = arith.addf %48, %52 : vector<32x128xf32>
    %c0_32 = arith.constant 0 : index
    %c0_33 = arith.constant 0 : index
    %54 = vector.load %arg8[%c0_32, %c0_33] : memref<1x128xf32, #tpu.memory_space<vmem>>, vector<1x128xf32>
    %55 = vector.broadcast %54 : vector<1x128xf32> to vector<32x128xf32>
    %56 = arith.addf %53, %55 : vector<32x128xf32>
    %cst_34 = arith.constant 5.000000e-01 : f32
    %57 = vector.broadcast %cst_34 : f32 to vector<32x128xf32>
    %58 = arith.mulf %57, %56 : vector<32x128xf32>
    %cst_35 = arith.constant 0.707106769 : f32
    %59 = vector.broadcast %cst_35 : f32 to vector<32x128xf32>
    %60 = arith.mulf %56, %59 : vector<32x128xf32>
    %61 = math.erf %60 : vector<32x128xf32>
    %cst_36 = arith.constant 1.000000e+00 : f32
    %62 = vector.broadcast %cst_36 : f32 to vector<32x128xf32>
    %63 = arith.addf %62, %61 : vector<32x128xf32>
    %64 = arith.mulf %58, %63 : vector<32x128xf32>
    %c8_37 = arith.constant 8 : index
    %c0_38 = arith.constant 0 : index
    %65 = vector.load %arg19[%c8_37, %c0_38] : memref<48x128xf32, #tpu.memory_space<vmem>>, vector<32x128xf32>
    tpu.vector_store %arg19[%c8_37, %c0_38], %64 {strides = array<i32>} : memref<48x128xf32, #tpu.memory_space<vmem>>, vector<32x128xf32>,
    %c7_39 = arith.constant 7 : index
    %c0_40 = arith.constant 0 : index
    %66 = vector.load %arg19[%c7_39, %c0_40] : memref<48x128xf32, #tpu.memory_space<vmem>>, vector<32x128xf32>
    %c9_41 = arith.constant 9 : index
    %c0_42 = arith.constant 0 : index
    %67 = vector.load %arg19[%c9_41, %c0_42] : memref<48x128xf32, #tpu.memory_space<vmem>>, vector<32x128xf32>
    %c0_43 = arith.constant 0 : index
    %c0_44 = arith.constant 0 : index
    %68 = vector.load %arg10[%c0_43, %c0_44] : memref<128x128xf32, #tpu.memory_space<vmem>>, vector<128x128xf32>
    %cst_45 = arith.constant dense<0.000000e+00> : vector<32x128xf32>
    %69 = tpu.matmul %64, %68, %cst_45 {dimension_numbers = #tpu.dot_dimension_numbers<[1], [0], [0], [1], [0, 0, 1, 1], [], []>} : vector<32x128xf32>, vector<128x128xf32>, vector<32x128xf32> -> vector<32x128xf32>
    %cst_46 = arith.constant 0.000000e+00 : f32
    %70 = vector.broadcast %cst_46 : f32 to vector<32x128xf32>
    %71 = arith.select %23, %66, %70 : vector<32x128xi1>, vector<32x128xf32>
    %c0_47 = arith.constant 0 : index
    %c0_48 = arith.constant 0 : index
    %72 = vector.load %arg9[%c0_47, %c0_48] : memref<128x128xf32, #tpu.memory_space<vmem>>, vector<128x128xf32>
    %cst_49 = arith.constant dense<0.000000e+00> : vector<32x128xf32>
    %73 = tpu.matmul %71, %72, %cst_49 {dimension_numbers = #tpu.dot_dimension_numbers<[1], [0], [0], [1], [0, 0, 1, 1], [], []>} : vector<32x128xf32>, vector<128x128xf32>, vector<32x128xf32> -> vector<32x128xf32>
    %74 = arith.addf %69, %73 : vector<32x128xf32>
    %cst_50 = arith.constant 0.000000e+00 : f32
    %75 = vector.broadcast %cst_50 : f32 to vector<32x128xf32>
    %76 = arith.select %25, %67, %75 : vector<32x128xi1>, vector<32x128xf32>
    %c0_51 = arith.constant 0 : index
    %c0_52 = arith.constant 0 : index
    %77 = vector.load %arg11[%c0_51, %c0_52] : memref<128x128xf32, #tpu.memory_space<vmem>>, vector<128x128xf32>
    %cst_53 = arith.constant dense<0.000000e+00> : vector<32x128xf32>
    %78 = tpu.matmul %76, %77, %cst_53 {dimension_numbers = #tpu.dot_dimension_numbers<[1], [0], [0], [1], [0, 0, 1, 1], [], []>} : vector<32x128xf32>, vector<128x128xf32>, vector<32x128xf32> -> vector<32x128xf32>
    %79 = arith.addf %74, %78 : vector<32x128xf32>
    %c0_54 = arith.constant 0 : index
    %c0_55 = arith.constant 0 : index
    %80 = vector.load %arg12[%c0_54, %c0_55] : memref<1x128xf32, #tpu.memory_space<vmem>>, vector<1x128xf32>
    %81 = vector.broadcast %80 : vector<1x128xf32> to vector<32x128xf32>
    %82 = arith.addf %79, %81 : vector<32x128xf32>
    %cst_56 = arith.constant 5.000000e-01 : f32
    %83 = vector.broadcast %cst_56 : f32 to vector<32x128xf32>
    %84 = arith.mulf %83, %82 : vector<32x128xf32>
    %cst_57 = arith.constant 0.707106769 : f32
    %85 = vector.broadcast %cst_57 : f32 to vector<32x128xf32>
    %86 = arith.mulf %82, %85 : vector<32x128xf32>
    %87 = math.erf %86 : vector<32x128xf32>
    %cst_58 = arith.constant 1.000000e+00 : f32
    %88 = vector.broadcast %cst_58 : f32 to vector<32x128xf32>
    %89 = arith.addf %88, %87 : vector<32x128xf32>
    %90 = arith.mulf %84, %89 : vector<32x128xf32>
    %c0_59 = arith.constant 0 : index
    %c0_60 = arith.constant 0 : index
    %91 = vector.load %arg13[%c0_59, %c0_60] : memref<128x256xf32, #tpu.memory_space<vmem>>, vector<128x256xf32>
    %cst_61 = arith.constant dense<0.000000e+00> : vector<32x256xf32>
    %92 = tpu.matmul %90, %91, %cst_61 {dimension_numbers = #tpu.dot_dimension_numbers<[1], [0], [0], [1], [0, 0, 1, 1], [], []>} : vector<32x128xf32>, vector<128x256xf32>, vector<32x256xf32> -> vector<32x256xf32>
    %c0_62 = arith.constant 0 : index
    %c0_63 = arith.constant 0 : index
    %93 = vector.load %arg14[%c0_62, %c0_63] : memref<1x256xf32, #tpu.memory_space<vmem>>, vector<1x256xf32>
    %94 = vector.broadcast %93 : vector<1x256xf32> to vector<32x256xf32>
    %95 = arith.addf %92, %94 : vector<32x256xf32>
    %96 = arith.addf %95, %4 : vector<32x256xf32>
    %c0_64 = arith.constant 0 : index
    %c0_65 = arith.constant 0 : index
    %97 = vector.load %arg17[%c0_64, %c0_65] : memref<256x256xf32, #tpu.memory_space<vmem>>, vector<256x256xf32>
    %cst_66 = arith.constant dense<0.000000e+00> : vector<32x256xf32>
    %98 = tpu.matmul %96, %97, %cst_66 {dimension_numbers = #tpu.dot_dimension_numbers<[1], [0], [0], [1], [0, 0, 1, 1], [], []>} : vector<32x256xf32>, vector<256x256xf32>, vector<32x256xf32> -> vector<32x256xf32>
    %cst_67 = arith.constant dense<0.000000e+00> : vector<256xf32>
    %99 = vector.multi_reduction <add>, %98, %cst_67 [0] : vector<32x256xf32> to vector<256xf32>
    %100 = vector.shape_cast %99 : vector<256xf32> to vector<1x256xf32>
    %101 = arith.mulf %96, %96 : vector<32x256xf32>
    %c0_68 = arith.constant 0 : index
    %c0_69 = arith.constant 0 : index
    %102 = vector.load %arg17[%c0_68, %c0_69] : memref<256x256xf32, #tpu.memory_space<vmem>>, vector<256x256xf32>
    %cst_70 = arith.constant dense<0.000000e+00> : vector<32x256xf32>
    %103 = tpu.matmul %101, %102, %cst_70 {dimension_numbers = #tpu.dot_dimension_numbers<[1], [0], [0], [1], [0, 0, 1, 1], [], []>} : vector<32x256xf32>, vector<256x256xf32>, vector<32x256xf32> -> vector<32x256xf32>
    %cst_71 = arith.constant dense<0.000000e+00> : vector<256xf32>
    %104 = vector.multi_reduction <add>, %103, %cst_71 [0] : vector<32x256xf32> to vector<256xf32>
    %105 = vector.shape_cast %104 : vector<256xf32> to vector<1x256xf32>
    %cst_72 = arith.constant 0.001953125 : f32
    %106 = vector.broadcast %cst_72 : f32 to vector<1x256xf32>
    %107 = arith.mulf %100, %106 : vector<1x256xf32>
    %cst_73 = arith.constant 0.001953125 : f32
    %108 = vector.broadcast %cst_73 : f32 to vector<1x256xf32>
    %109 = arith.mulf %105, %108 : vector<1x256xf32>
    %110 = arith.mulf %107, %107 : vector<1x256xf32>
    %111 = arith.subf %109, %110 : vector<1x256xf32>
    %c0_74 = arith.constant 0 : index
    %c0_75 = arith.constant 0 : index
    %112 = vector.load %arg15[%c0_74, %c0_75] : memref<1x256xf32, #tpu.memory_space<vmem>>, vector<1x256xf32>
    %cst_76 = arith.constant 9.99999974E-6 : f32
    %113 = vector.broadcast %cst_76 : f32 to vector<1x256xf32>
    %114 = arith.addf %111, %113 : vector<1x256xf32>
    %115 = math.rsqrt %114 : vector<1x256xf32>
    %116 = arith.mulf %112, %115 : vector<1x256xf32>
    %c0_77 = arith.constant 0 : index
    %c0_78 = arith.constant 0 : index
    %117 = vector.load %arg16[%c0_77, %c0_78] : memref<1x256xf32, #tpu.memory_space<vmem>>, vector<1x256xf32>
    %118 = arith.mulf %107, %116 : vector<1x256xf32>
    %119 = arith.subf %117, %118 : vector<1x256xf32>
    %120 = vector.broadcast %116 : vector<1x256xf32> to vector<32x256xf32>
    %121 = arith.mulf %96, %120 : vector<32x256xf32>
    %122 = vector.broadcast %119 : vector<1x256xf32> to vector<32x256xf32>
    %123 = arith.addf %121, %122 : vector<32x256xf32>
    %cst_79 = arith.constant 5.000000e-01 : f32
    %124 = vector.broadcast %cst_79 : f32 to vector<32x256xf32>
    %125 = arith.mulf %124, %123 : vector<32x256xf32>
    %cst_80 = arith.constant 0.707106769 : f32
    %126 = vector.broadcast %cst_80 : f32 to vector<32x256xf32>
    %127 = arith.mulf %123, %126 : vector<32x256xf32>
    %128 = math.erf %127 : vector<32x256xf32>
    %cst_81 = arith.constant 1.000000e+00 : f32
    %129 = vector.broadcast %cst_81 : f32 to vector<32x256xf32>
    %130 = arith.addf %129, %128 : vector<32x256xf32>
    %131 = arith.mulf %125, %130 : vector<32x256xf32>
    %c0_82 = arith.constant 0 : index
    %c0_83 = arith.constant 0 : index
    %132 = vector.load %arg18[%c0_82, %c0_83] : memref<32x256xf32, #tpu.memory_space<vmem>>, vector<32x256xf32>
    tpu.vector_store %arg18[%c0_82, %c0_83], %131 {strides = array<i32>} : memref<32x256xf32, #tpu.memory_space<vmem>>, vector<32x256xf32>,
    return
  }
}

module attributes {stable_mosaic.version = 11 : i64} {
  func.func @_out_conv_kernel(%arg0: memref<32x256xf32, #tpu.memory_space<vmem>>, %arg1: memref<256x48xf32, #tpu.memory_space<vmem>>, %arg2: memref<256x48xf32, #tpu.memory_space<vmem>>, %arg3: memref<256x48xf32, #tpu.memory_space<vmem>>, %arg4: memref<32x48xf32, #tpu.memory_space<vmem>>, %arg5: memref<48x256xf32, #tpu.memory_space<vmem>>) attributes {dimension_semantics = [], scalar_prefetch = 0 : i64, scratch_operands = 1 : i64, tpu.core_type = #tpu.core_type<tc>} {
    %c0 = arith.constant 0 : index
    %c0_0 = arith.constant 0 : index
    %0 = vector.load %arg0[%c0, %c0_0] : memref<32x256xf32, #tpu.memory_space<vmem>>, vector<32x256xf32>
    %1 = tpu.iota {dimensions = array<i32: 0>} : vector<32x256xi32>
    %c16_i32 = arith.constant 16 : i32
    %c0_i32 = arith.constant 0 : i32
    %2 = arith.cmpi eq, %c16_i32, %c0_i32 : i32
    %c1_i32 = arith.constant 1 : i32
    %3 = arith.select %2, %c1_i32, %c16_i32 : i32
    %4 = vector.broadcast %3 : i32 to vector<32x256xi32>
    %5 = arith.remsi %1, %4 : vector<32x256xi32>
    %c0_i32_1 = arith.constant 0 : i32
    %6 = vector.broadcast %c0_i32_1 : i32 to vector<32x256xi32>
    %7 = arith.cmpi ne, %5, %6 : vector<32x256xi32>
    %c0_i32_2 = arith.constant 0 : i32
    %8 = vector.broadcast %c0_i32_2 : i32 to vector<32x256xi32>
    %9 = arith.cmpi slt, %5, %8 : vector<32x256xi32>
    %c0_i32_3 = arith.constant 0 : i32
    %10 = arith.cmpi slt, %3, %c0_i32_3 : i32
    %11 = vector.broadcast %10 : i1 to vector<32x256xi1>
    %12 = vector.broadcast %11 : vector<32x256xi1> to vector<32x256xi1>
    %13 = arith.xori %9, %12 : vector<32x256xi1>
    %14 = arith.andi %13, %7 : vector<32x256xi1>
    %15 = vector.broadcast %3 : i32 to vector<32x256xi32>
    %16 = arith.addi %5, %15 : vector<32x256xi32>
    %17 = arith.select %14, %16, %5 : vector<32x256xi1>, vector<32x256xi32>
    %c0_i32_4 = arith.constant 0 : i32
    %18 = vector.broadcast %c0_i32_4 : i32 to vector<32x256xi32>
    %19 = arith.cmpi sgt, %17, %18 : vector<32x256xi32>
    %c15_i32 = arith.constant 15 : i32
    %20 = vector.broadcast %c15_i32 : i32 to vector<32x256xi32>
    %21 = arith.cmpi slt, %17, %20 : vector<32x256xi32>
    %c8 = arith.constant 8 : index
    %c0_5 = arith.constant 0 : index
    %22 = vector.load %arg5[%c8, %c0_5] : memref<48x256xf32, #tpu.memory_space<vmem>>, vector<32x256xf32>
    tpu.vector_store %arg5[%c8, %c0_5], %0 {strides = array<i32>} : memref<48x256xf32, #tpu.memory_space<vmem>>, vector<32x256xf32>,
    %c7 = arith.constant 7 : index
    %c0_6 = arith.constant 0 : index
    %23 = vector.load %arg5[%c7, %c0_6] : memref<48x256xf32, #tpu.memory_space<vmem>>, vector<32x256xf32>
    %c9 = arith.constant 9 : index
    %c0_7 = arith.constant 0 : index
    %24 = vector.load %arg5[%c9, %c0_7] : memref<48x256xf32, #tpu.memory_space<vmem>>, vector<32x256xf32>
    %c0_8 = arith.constant 0 : index
    %c0_9 = arith.constant 0 : index
    %25 = vector.load %arg2[%c0_8, %c0_9] : memref<256x48xf32, #tpu.memory_space<vmem>>, vector<256x48xf32>
    %cst = arith.constant dense<0.000000e+00> : vector<32x48xf32>
    %26 = tpu.matmul %0, %25, %cst {dimension_numbers = #tpu.dot_dimension_numbers<[1], [0], [0], [1], [0, 0, 1, 1], [], []>} : vector<32x256xf32>, vector<256x48xf32>, vector<32x48xf32> -> vector<32x48xf32>
    %cst_10 = arith.constant 0.000000e+00 : f32
    %27 = vector.broadcast %cst_10 : f32 to vector<32x256xf32>
    %28 = arith.select %19, %23, %27 : vector<32x256xi1>, vector<32x256xf32>
    %c0_11 = arith.constant 0 : index
    %c0_12 = arith.constant 0 : index
    %29 = vector.load %arg1[%c0_11, %c0_12] : memref<256x48xf32, #tpu.memory_space<vmem>>, vector<256x48xf32>
    %cst_13 = arith.constant dense<0.000000e+00> : vector<32x48xf32>
    %30 = tpu.matmul %28, %29, %cst_13 {dimension_numbers = #tpu.dot_dimension_numbers<[1], [0], [0], [1], [0, 0, 1, 1], [], []>} : vector<32x256xf32>, vector<256x48xf32>, vector<32x48xf32> -> vector<32x48xf32>
    %31 = arith.addf %26, %30 : vector<32x48xf32>
    %cst_14 = arith.constant 0.000000e+00 : f32
    %32 = vector.broadcast %cst_14 : f32 to vector<32x256xf32>
    %33 = arith.select %21, %24, %32 : vector<32x256xi1>, vector<32x256xf32>
    %c0_15 = arith.constant 0 : index
    %c0_16 = arith.constant 0 : index
    %34 = vector.load %arg3[%c0_15, %c0_16] : memref<256x48xf32, #tpu.memory_space<vmem>>, vector<256x48xf32>
    %cst_17 = arith.constant dense<0.000000e+00> : vector<32x48xf32>
    %35 = tpu.matmul %33, %34, %cst_17 {dimension_numbers = #tpu.dot_dimension_numbers<[1], [0], [0], [1], [0, 0, 1, 1], [], []>} : vector<32x256xf32>, vector<256x48xf32>, vector<32x48xf32> -> vector<32x48xf32>
    %36 = arith.addf %31, %35 : vector<32x48xf32>
    %37 = arith.negf %36 : vector<32x48xf32>
    %38 = math.exp %37 : vector<32x48xf32>
    %cst_18 = arith.constant 1.000000e+00 : f32
    %39 = vector.broadcast %cst_18 : f32 to vector<32x48xf32>
    %40 = arith.addf %39, %38 : vector<32x48xf32>
    %41 = arith.divf %39, %40 : vector<32x48xf32>
    %c0_19 = arith.constant 0 : index
    %c0_20 = arith.constant 0 : index
    %42 = vector.load %arg4[%c0_19, %c0_20] : memref<32x48xf32, #tpu.memory_space<vmem>>, vector<32x48xf32>
    tpu.vector_store %arg4[%c0_19, %c0_20], %41 {strides = array<i32>} : memref<32x48xf32, #tpu.memory_space<vmem>>, vector<32x48xf32>,
    return
  }
}

</mosaic_0001>

<bundles_post_ra>
// kernel: tile.63
= control target key start
LH: loop header
LB: loop body
LE: loop exit
PB: predicated region body
PF: predicated region fallthrough
CT: control target
= control target key end

     0   :  { %s22_s0 = inlined_call_operand.vmem [shape: f32[8], index: 0, kind: input, shape index: {}]   ;;  %s23_s1 = inlined_call_operand.vmem [shape: f32[8,8], index: 1, kind: output, shape index: {}]  }
   0x1   :  { %v4_v0 = vld [vmem:[%s22_s0] ss:$0 sm:$0xff] }
   0x2   :  { %5 = vst [vmem:[%s23_s1] sm:$0xff] %v4_v0 }

// kernel: tile.64
= control target key start
LH: loop header
LB: loop body
LE: loop exit
PB: predicated region body
PF: predicated region fallthrough
CT: control target
= control target key end

     0   :  { %s67_s10 = smov 56   ;;  %s68_s11 = smov 40   ;;  %vm3_vm0 = vcmask 64512   ;;  %vm9_vm1 = vcmask 523712   ;;  %vm15_vm2 = vcmask 458112   ;;  %vm21_vm3 = vcmask 392512   ;;  %s111_s0 = inlined_call_operand.vmem [shape: f32[8,8], index: 0, kind: input, shape index: {}]   ;;  %s112_s1 = inlined_call_operand.vmem [shape: f32[1,64], index: 1, kind: output, shape index: {}]  }
   0x1   :  { %v53_v0 = vld [vmem:[%s111_s0 + $0x7] sm:$0x1]   ;;  %v55_v1 = vld [vmem:[%s111_s0 + $0x5] sm:$0x1]   ;;  %v57_v2 = vld [vmem:[%s111_s0 + $0x3] sm:$0x1]  }
   0x2   :  { %7 = vrot.lane.b32.xlu0 %v53_v0, %s67_s10  ;;  %19 = vrot.lane.b32.xlu1 %v55_v1, %s68_s11  ;;  %s69_s14 = smov 24   ;;  %v54_v3 = vld [vmem:[%s111_s0 + $0x6] sm:$0x1]   ;;  %v56_v4 = vld [vmem:[%s111_s0 + $0x4] sm:$0x1]   ;;  %s70_s21 = smov 48  }
   0x3   :  { %31 = vrot.lane.b32.xlu2 %v57_v2, %s69_s14  ;;  %v58_v5 = vld [vmem:[%s111_s0 + $0x2] sm:$0x1]   ;;  %s71_s22 = smov 32   ;;  %s72_s23 = smov 16   ;;  %v59_v6 = vld [vmem:[%s111_s0 + $0x1] sm:$0x1]  }
   0x4   :  { %s73_s26 = smov 8   ;;  %v2_v7 = vld [vmem:[%s111_s0] sm:$0x1]   ;;  %vm27_vm4 = vcmask 326912   ;;  %vm33_vm5 = vcmask 261312   ;;  %vm39_vm6 = vcmask 195712  }
   0x5   :  { %4 = vst.msk [vmem:[#allocation0] sm:$0x1] %vm3_vm0, %v2_v7   ;;  %vm45_vm7 = vcmask 130112  }
   0xa   :  { %13 = vrot.lane.b32.xlu0 %v54_v3, %s70_s21  ;;  %25 = vrot.lane.b32.xlu1 %v56_v4, %s71_s22 }
   0xb   :  { %37 = vrot.lane.b32.xlu2 %v58_v5, %s72_s23 }
  0x12   :  { %43 = vrot.lane.b32.xlu0 %v59_v6, %s73_s26 }
  0x5d   :  { %v32_v8 = vpop.permute.xlu2 %31  }
  0x65   :  { %v38_v9 = vpop.permute.xlu2 %37  }
  0x74   :  { %v8_v10 = vpop.permute.xlu0 %7   ;;  %v20_v11 = vpop.permute.xlu1 %19  }
  0x75   :  { %10 = vst.msk [vmem:[#allocation0] sm:$0x1] %vm9_vm1, %v8_v10  }
  0x7c   :  { %v14_v12 = vpop.permute.xlu0 %13   ;;  %v26_v13 = vpop.permute.xlu1 %25  }
  0x7d   :  { %16 = vst.msk [vmem:[#allocation0] sm:$0x1] %vm15_vm2, %v14_v12  }
  0x7e   :  { %22 = vst.msk [vmem:[#allocation0] sm:$0x1] %vm21_vm3, %v20_v11  }
  0x7f   :  { %28 = vst.msk [vmem:[#allocation0] sm:$0x1] %vm27_vm4, %v26_v13  }
  0x80   :  { %34 = vst.msk [vmem:[#allocation0] sm:$0x1] %vm33_vm5, %v32_v8  }
  0x81   :  { %40 = vst.msk [vmem:[#allocation0] sm:$0x1] %vm39_vm6, %v38_v9  }
  0x84   :  { %v44_v14 = vpop.permute.xlu0 %43  }
  0x85   :  { %46 = vst.msk [vmem:[#allocation0] sm:$0x1] %vm45_vm7, %v44_v14  }
  0x8c   :  { %v49_v15 = vld [vmem:[#allocation0] sm:$0x1] }
  0x8d   :  { %52 = vst [vmem:[%s112_s1] sm:$0x1] %v49_v15 }

// kernel: tile.78
= control target key start
LH: loop header
LB: loop body
LE: loop exit
PB: predicated region body
PF: predicated region fallthrough
CT: control target
= control target key end

     0   :  { %s22_s0 = inlined_call_operand.vmem [shape: f32[16], index: 0, kind: input, shape index: {}]   ;;  %s23_s1 = inlined_call_operand.vmem [shape: f32[8,16], index: 1, kind: output, shape index: {}]  }
   0x1   :  { %v4_v0 = vld [vmem:[%s22_s0] ss:$0 sm:$0xff] }
   0x2   :  { %5 = vst [vmem:[%s23_s1] sm:$0xff] %v4_v0 }

// kernel: tile.79
= control target key start
LH: loop header
LB: loop body
LE: loop exit
PB: predicated region body
PF: predicated region fallthrough
CT: control target
= control target key end

     0   :  { %s67_s10 = smov 112   ;;  %s68_s11 = smov 80   ;;  %vm3_vm0 = vcmask 130048   ;;  %vm9_vm1 = vcmask 1048448   ;;  %vm15_vm2 = vcmask 917248   ;;  %vm21_vm3 = vcmask 786048   ;;  %s111_s0 = inlined_call_operand.vmem [shape: f32[8,16], index: 0, kind: input, shape index: {}]   ;;  %s112_s1 = inlined_call_operand.vmem [shape: f32[1,128], index: 1, kind: output, shape index: {}]  }
   0x1   :  { %v53_v0 = vld [vmem:[%s111_s0 + $0x7] sm:$0x1]   ;;  %v55_v1 = vld [vmem:[%s111_s0 + $0x5] sm:$0x1]   ;;  %v57_v2 = vld [vmem:[%s111_s0 + $0x3] sm:$0x1]  }
   0x2   :  { %7 = vrot.lane.b32.xlu0 %v53_v0, %s67_s10  ;;  %19 = vrot.lane.b32.xlu1 %v55_v1, %s68_s11  ;;  %s69_s14 = smov 48   ;;  %v54_v3 = vld [vmem:[%s111_s0 + $0x6] sm:$0x1]   ;;  %v56_v4 = vld [vmem:[%s111_s0 + $0x4] sm:$0x1]   ;;  %s70_s21 = smov 96  }
   0x3   :  { %31 = vrot.lane.b32.xlu2 %v57_v2, %s69_s14  ;;  %v58_v5 = vld [vmem:[%s111_s0 + $0x2] sm:$0x1]   ;;  %s71_s22 = smov 64   ;;  %s72_s23 = smov 32   ;;  %v59_v6 = vld [vmem:[%s111_s0 + $0x1] sm:$0x1]  }
   0x4   :  { %s73_s26 = smov 16   ;;  %v2_v7 = vld [vmem:[%s111_s0] sm:$0x1]   ;;  %vm27_vm4 = vcmask 654848   ;;  %vm33_vm5 = vcmask 523648   ;;  %vm39_vm6 = vcmask 392448  }
   0x5   :  { %4 = vst.msk [vmem:[#allocation0] sm:$0x1] %vm3_vm0, %v2_v7   ;;  %vm45_vm7 = vcmask 261248  }
   0xa   :  { %13 = vrot.lane.b32.xlu0 %v54_v3, %s70_s21  ;;  %25 = vrot.lane.b32.xlu1 %v56_v4, %s71_s22 }
   0xb   :  { %37 = vrot.lane.b32.xlu2 %v58_v5, %s72_s23 }
  0x12   :  { %43 = vrot.lane.b32.xlu0 %v59_v6, %s73_s26 }
  0x5d   :  { %v32_v8 = vpop.permute.xlu2 %31  }
  0x65   :  { %v38_v9 = vpop.permute.xlu2 %37  }
  0x74   :  { %v8_v10 = vpop.permute.xlu0 %7   ;;  %v20_v11 = vpop.permute.xlu1 %19  }
  0x75   :  { %10 = vst.msk [vmem:[#allocation0] sm:$0x1] %vm9_vm1, %v8_v10  }
  0x7c   :  { %v14_v12 = vpop.permute.xlu0 %13   ;;  %v26_v13 = vpop.permute.xlu1 %25  }
  0x7d   :  { %16 = vst.msk [vmem:[#allocation0] sm:$0x1] %vm15_vm2, %v14_v12  }
  0x7e   :  { %22 = vst.msk [vmem:[#allocation0] sm:$0x1] %vm21_vm3, %v20_v11  }
  0x7f   :  { %28 = vst.msk [vmem:[#allocation0] sm:$0x1] %vm27_vm4, %v26_v13  }
  0x80   :  { %34 = vst.msk [vmem:[#allocation0] sm:$0x1] %vm33_vm5, %v32_v8  }
  0x81   :  { %40 = vst.msk [vmem:[#allocation0] sm:$0x1] %vm39_vm6, %v38_v9  }
  0x84   :  { %v44_v14 = vpop.permute.xlu0 %43  }
  0x85   :  { %46 = vst.msk [vmem:[#allocation0] sm:$0x1] %vm45_vm7, %v44_v14  }
  0x8c   :  { %v49_v15 = vld [vmem:[#allocation0] sm:$0x1] }
  0x8d   :  { %52 = vst [vmem:[%s112_s1] sm:$0x1] %v49_v15 }

// kernel: decoder_forward.3
= control target key start
LH: loop header
LB: loop body
LE: loop exit
PB: predicated region body
PF: predicated region fallthrough
CT: control target
= control target key end

     0   :  { %vm217_vm6 = vcmask 523264   ;;  %s1529_s1 = inlined_call_operand.vmem [shape: f32[128,64], index: 1, kind: input, shape index: {}]   ;;  %s1530_s2 = inlined_call_operand.vmem [shape: f32[1,64], index: 2, kind: input, shape index: {}]   ;;  %s1531_s0 = inlined_call_operand.vmem [shape: f32[16,128], index: 0, kind: input, shape index: {}]   ;;  %s1532_s4 = inlined_call_operand.vmem [shape: f32[64,64], index: 4, kind: input, shape index: {}]   ;;  %s1533_s3 = inlined_call_operand.vmem [shape: f32[64,64], index: 3, kind: input, shape index: {}]   ;;  %s1534_s5 = inlined_call_operand.vmem [shape: f32[64,64], index: 5, kind: input, shape index: {}]   ;;  %s1535_s6 = inlined_call_operand.vmem [shape: f32[1,64], index: 6, kind: input, shape index: {}]   ;;  %s1536_s8 = inlined_call_operand.vmem [shape: f32[64,64], index: 8, kind: input, shape index: {}]   ;;  %s1537_s7 = inlined_call_operand.vmem [shape: f32[64,64], index: 7, kind: input, shape index: {}]   ;;  %s1538_s9 = inlined_call_operand.vmem [shape: f32[64,64], index: 9, kind: input, shape index: {}]   ;;  %s1539_s10 = inlined_call_operand.vmem [shape: f32[1,64], index: 10, kind: input, shape index: {}]   ;;  %s1540_s12 = inlined_call_operand.vmem [shape: f32[1,128], index: 12, kind: input, shape index: {}]   ;;  %s1541_s11 = inlined_call_operand.vmem [shape: f32[64,128], index: 11, kind: input, shape index: {}]   ;;  %s1542_s15 = inlined_call_operand.vmem [shape: f32[128,128], index: 15, kind: input, shape index: {}]   ;;  %s1543_s13 = inlined_call_operand.vmem [shape: f32[1,128], index: 13, kind: input, shape index: {}]   ;;  %s1544_s14 = inlined_call_operand.vmem [shape: f32[1,128], index: 14, kind: input, shape index: {}]   ;;  %s1545_s16 = inlined_call_operand.vmem [shape: f32[16,128], index: 16, kind: output, shape index: {}]  }
   0x1   :  { %1547 = sst [smem:[#allocation3_spill]] %s1529_s1  ;;  %v53_v16 = vld [vmem:[%s1531_s0] sm:$0xff]  ;;  %v54_v17 = vld [vmem:[%s1531_s0 + $0x8] sm:$0xff]  ;;  %v231_v25 = vld [vmem:[%s1532_s4 + $0x38] sm:$0xff] }
   0x2   :  { %s1548_s23 = sld [smem:[#allocation3_spill]]  ;;  %v919_v18 = vld [vmem:[%s1530_s2] ss:$0 sm:$0xff]  ;;  %285 = vmatpush.msra.mxu2 %v231_v25  ;;  %v230_v29 = vld [vmem:[%s1532_s4 + $0x30] sm:$0xff]  ;;  %v229_v33 = vld [vmem:[%s1532_s4 + $0x28] sm:$0xff] }
   0x3   :  { %v228_v37 = vld [vmem:[%s1532_s4 + $0x20] sm:$0xff]  ;;  %v227_v41 = vld [vmem:[%s1532_s4 + $0x18] sm:$0xff]  ;;  %v226_v46 = vld [vmem:[%s1532_s4 + $0x10] sm:$0xff] }
   0x4   :  { %286 = vmatpush.msra.mxu2 %v230_v29  ;;  %v241_v43 = vld [vmem:[%s1533_s3 + $0x38] sm:$0xff]  ;;  %v240_v48 = vld [vmem:[%s1533_s3 + $0x30] sm:$0xff]  ;;  %v225_v52 = vld [vmem:[%s1532_s4 + $0x8] sm:$0xff] }
   0x5   :  { %256 = vmatpush.msra.mxu3 %v241_v43  ;;  %v239_v54 = vld [vmem:[%s1533_s3 + $0x28] sm:$0xff]  ;;  %v224_v57 = vld [vmem:[%s1532_s4] sm:$0xff]  ;;  %v237_v62 = vld [vmem:[%s1533_s3 + $0x18] sm:$0xff] }
   0x6   :  { %287 = vmatpush.msra.mxu2 %v229_v33  ;;  %v238_v59 = vld [vmem:[%s1533_s3 + $0x20] sm:$0xff]  ;;  %v304_v33 = vld [vmem:[%s1534_s5 + $0x10] sm:$0xff] }
   0x7   :  { %257 = vmatpush.msra.mxu3 %v240_v48  ;;  %v55_v48 = vlaneseq }
   0x8   :  { %v101_v0 = vld [vmem:[%s1548_s23 + $0x78] sm:$0xff]  ;;  %v100_v1 = vld [vmem:[%s1548_s23 + $0x70] sm:$0xff]  ;;  %v99_v2 = vld [vmem:[%s1548_s23 + $0x68] sm:$0xff]  ;;  %288 = vmatpush.msra.mxu2 %v228_v37 }
   0x9   :  { %106 = vmatpush.msra.mxu0 %v101_v0  ;;  %v98_v3 = vld [vmem:[%s1548_s23 + $0x60] sm:$0xff]  ;;  %v97_v4 = vld [vmem:[%s1548_s23 + $0x58] sm:$0xff]  ;;  %v96_v5 = vld [vmem:[%s1548_s23 + $0x50] sm:$0xff]  ;;  %258 = vmatpush.msra.mxu3 %v239_v54 }
   0xa   :  { %v95_v6 = vld [vmem:[%s1548_s23 + $0x48] sm:$0xff]  ;;  %v94_v7 = vld [vmem:[%s1548_s23 + $0x40] sm:$0xff]  ;;  %v93_v8 = vld [vmem:[%s1548_s23 + $0x38] sm:$0xff]  ;;  %289 = vmatpush.msra.mxu2 %v227_v41 }
   0xb   :  { %107 = vmatpush.msra.mxu0 %v100_v1  ;;  %v92_v9 = vld [vmem:[%s1548_s23 + $0x30] sm:$0xff]  ;;  %v91_v10 = vld [vmem:[%s1548_s23 + $0x28] sm:$0xff]  ;;  %v90_v11 = vld [vmem:[%s1548_s23 + $0x20] sm:$0xff]  ;;  %259 = vmatpush.msra.mxu3 %v238_v59 }
   0xc   :  { %v89_v12 = vld [vmem:[%s1548_s23 + $0x18] sm:$0xff]  ;;  %v88_v13 = vld [vmem:[%s1548_s23 + $0x10] sm:$0xff]  ;;  %v87_v14 = vld [vmem:[%s1548_s23 + $0x8] sm:$0xff]  ;;  %290 = vmatpush.msra.mxu2 %v226_v46 }
   0xd   :  { %108 = vmatpush.msra.mxu0 %v99_v2  ;;  %v86_v15 = vld [vmem:[%s1548_s23] sm:$0xff]  ;;  %v236_v1 = vld [vmem:[%s1533_s3 + $0x10] sm:$0xff]  ;;  %260 = vmatpush.msra.mxu3 %v237_v62 }
   0xe   :  { %291 = vmatpush.msra.mxu2 %v225_v52 }
   0xf   :  { %109 = vmatpush.msra.mxu0 %v98_v3  ;;  %261 = vmatpush.msra.mxu3 %v236_v1 }
  0x10   :  { %292 = vmatpush.msra.mxu2 %v224_v57 }
  0x11   :  { %110 = vmatpush.msra.mxu0 %v97_v4  ;;  %v235_v4 = vld [vmem:[%s1533_s3 + $0x8] sm:$0xff] }
  0x12   :  { %262 = vmatpush.msra.mxu3 %v235_v4 }
  0x13   :  { %111 = vmatpush.msra.mxu0 %v96_v5 }
  0x15   :  { %112 = vmatpush.msra.mxu0 %v95_v6 }
  0x17   :  { %113 = vmatpush.msra.mxu0 %v94_v7 }
  0x19   :  { %114 = vmatpush.msra.mxu0 %v93_v8  ;;  %v234_v8 = vld [vmem:[%s1533_s3] sm:$0xff] }
  0x1a   :  { %263 = vmatpush.msra.mxu3 %v234_v8 }
  0x1b   :  { %115 = vmatpush.msra.mxu0 %v92_v9 }
  0x1d   :  { %116 = vmatpush.msra.mxu0 %v91_v10  ;;  %v309_v10 = vld [vmem:[%s1534_s5 + $0x38] sm:$0xff] }
  0x1e   :  { %324 = vmatpush.msrb.mxu3 %v309_v10 }
  0x1f   :  { %117 = vmatpush.msra.mxu0 %v90_v11 }
  0x21   :  { %118 = vmatpush.msra.mxu0 %v89_v12 }
  0x23   :  { %119 = vmatpush.msra.mxu0 %v88_v13  ;;  %v308_v13 = vld [vmem:[%s1534_s5 + $0x30] sm:$0xff] }
  0x24   :  { %325 = vmatpush.msrb.mxu3 %v308_v13 }
  0x25   :  { %120 = vmatpush.msra.mxu0 %v87_v14 }
  0x27   :  { %121 = vmatpush.msra.mxu0 %v86_v15 }
  0x28   :  { %122 = vmatmul.f32.vlgmr.msra.gmra.mxu0 %v53_v16  ;;  %v307_v16 = vld [vmem:[%s1534_s5 + $0x28] sm:$0xff] }
  0x29   :  { %326 = vmatpush.msrb.mxu3 %v307_v16 }
  0x30   :  { %125 = vmatmul.f32.gmra.mxu0 %v54_v17 }
  0xa5   :  { %v123_v19 = vpop.f32.mrf.mxu0 }
  0xa6   :  { %v1085_v20 = vadd.f32 %v919_v18, %v123_v19 }
  0xa8   :  { %v1088_v21 = vmul.f32 0.70710677, %v1085_v20 }
  0xaa   :  { %v133_v22 = vmul.f32 %v1088_v21, %v1088_v21 }
  0xac   :  { %v1092_v23 = vmin.f32 %v133_v22, 16.0 }
  0xad   :  { %v126_v24 = vpop.f32.mrf.mxu0 }
  0xae   :  { %v135_v26 = vmul.f32 2.1237322e-06, %v1092_v23  ;;  %v146_v27 = vmul.f32 3.8918573e-05, %v1092_v23  ;;  %v1099_v28 = vadd.f32 %v919_v18, %v126_v24  ;;  %v306_v24 = vld [vmem:[%s1534_s5 + $0x20] sm:$0xff] }
  0xaf   :  { %327 = vmatpush.msrb.mxu3 %v306_v24 }
  0xb0   :  { %v136_v30 = vadd.f32 0.00028619796, %v135_v26  ;;  %v147_v31 = vadd.f32 0.001143296, %v146_v27  ;;  %v1105_v32 = vmul.f32 0.70710677, %v1099_v28 }
  0xb2   :  { %v137_v34 = vmul.f32 %v136_v30, %v1092_v23  ;;  %v148_v35 = vmul.f32 %v147_v31, %v1092_v23  ;;  %v173_v36 = vmul.f32 %v1105_v32, %v1105_v32 }
  0xb4   :  { %v149_v38 = vadd.f32 0.014752088, %v148_v35  ;;  %v138_v39 = vadd.f32 0.0036580483, %v137_v34  ;;  %v1117_v40 = vmin.f32 %v173_v36, 16.0  ;;  %v303_v36 = vld [vmem:[%s1534_s5 + $0x8] sm:$0xff] }
  0xb6   :  { %v150_v42 = vmul.f32 %v149_v38, %v1092_v23  ;;  %v175_v44 = vmul.f32 2.1237322e-06, %v1117_v40  ;;  %v186_v45 = vmul.f32 3.8918573e-05, %v1117_v40  ;;  %v139_v49 = vmul.f32 %v138_v39, %v1092_v23 }
  0xb8   :  { %v151_v47 = vadd.f32 0.112945676, %v150_v42  ;;  %v176_v50 = vadd.f32 0.00028619796, %v175_v44  ;;  %v187_v51 = vadd.f32 0.001143296, %v186_v45 }
  0xb9   :  { %v140_v60 = vadd.f32 0.05243302, %v139_v49  ;;  %v302_v42 = vld [vmem:[%s1534_s5] sm:$0xff] }
  0xba   :  { %v152_v53 = vmul.f32 %v151_v47, %v1092_v23  ;;  %v177_v55 = vmul.f32 %v176_v50, %v1117_v40  ;;  %v188_v56 = vmul.f32 %v187_v51, %v1117_v40 }
  0xbb   :  { %v141_v5 = vmul.f32 %v140_v60, %v1092_v23 }
  0xbc   :  { %v153_v58 = vadd.f32 0.4994258, %v152_v53  ;;  %v189_v61 = vadd.f32 0.014752088, %v188_v56  ;;  %v178_v0 = vadd.f32 0.0036580483, %v177_v55 }
  0xbd   :  { %v142_v11 = vadd.f32 0.18741608, %v141_v5  ;;  %v129_v53 = vmul.f32 0.5, %v1085_v20  ;;  %v56_v56 = vshrl.u32 %v55_v48, 7 }
  0xbe   :  { %v154_v63 = vmul.f32 %v153_v58, %v1092_v23  ;;  %v190_v2 = vmul.f32 %v189_v61, %v1117_v40  ;;  %v179_v7 = vmul.f32 %v178_v0, %v1117_v40 }
  0xbf   :  { %v143_v18 = vmul.f32 %v142_v11, %v1092_v23  ;;  %v305_v23 = vld [vmem:[%s1534_s5 + $0x18] sm:$0xff]  ;;  %v62_v62 = vand.u32 7, %v56_v56 }
  0xc0   :  { %v155_v3 = vadd.f32 1.0, %v154_v63  ;;  %v191_v6 = vadd.f32 0.112945676, %v190_v2  ;;  %v180_v14 = vadd.f32 0.05243302, %v179_v7  ;;  %328 = vmatpush.msrb.mxu3 %v305_v23  ;;  %v130_v63 = vmul.f32 0.5, %v1099_v28 }
  0xc1   :  { %v144_v29 = vadd.f32 1.1283791, %v143_v18  ;;  %vm1201_vm9 = vcmp.gt.s32.totalorder %v62_v62, 0  ;;  %v57_v2 = vadd.s32 8, %v56_v56  ;;  %vm1217_vm11 = vcmp.lt.s32.totalorder %v62_v62, 7  ;;  %v441_v62 = vld [vmem:[%s1536_s8] sm:$0xff] }
  0xc2   :  { %923 = vrcp.f32 %v155_v3  ;;  %v192_v9 = vmul.f32 %v191_v6, %v1117_v40  ;;  %v181_v25 = vmul.f32 %v180_v14, %v1117_v40  ;;  %v167_v27 = vand.u32 2147483648, %v155_v3  ;;  %329 = vmatpush.msrb.mxu3 %v304_v33  ;;  %v920_v18 = vld [vmem:[%s1535_s6] ss:$0 sm:$0xff]  ;;  %v448_v33 = vld [vmem:[%s1536_s8 + $0x38] sm:$0xff] }
  0xc3   :  { %v165_v31 = vand.u32 2147483647, %v155_v3  ;;  %vm161_vm1 = vweird.f32 %v155_v3  ;;  %v145_v39 = vmul.f32 %v144_v29, %v1088_v21  ;;  %v69_v5 = vand.u32 7, %v57_v2  ;;  %502 = vmatpush.msrb.mxu2 %v448_v33  ;;  %v921_v28 = vld [vmem:[%s1539_s10] ss:$0 sm:$0xff] }
  0xc4   :  { %v193_v12 = vadd.f32 0.4994258, %v192_v9  ;;  %v182_v34 = vadd.f32 0.18741608, %v181_v25  ;;  %v168_v37 = vor.u32 1.1754944e-38, %v167_v27  ;;  %330 = vmatpush.msrb.mxu3 %v303_v36 }
  0xc5   :  { %vm166_vm3 = vcmp.eq.f32.partialorder %v165_v31, 8.507059e+37  ;;  %vm1210_vm10 = vcmp.gt.s32.totalorder %v69_v5, 0  ;;  %vm1224_vm12 = vcmp.lt.s32.totalorder %v69_v5, 7  ;;  %v525_v5 = vld [vmem:[%s1538_s9 + $0x30] sm:$0xff] }
  0xc6   :  { %v194_v15 = vmul.f32 %v193_v12, %v1117_v40  ;;  %v183_v44 = vmul.f32 %v182_v34, %v1117_v40  ;;  %331 = vmatpush.msrb.mxu3 %v302_v42 }
  0xc8   :  { %v924_v17 = vpop.eup %923  ;;  %v195_v22 = vadd.f32 1.0, %v194_v15  ;;  %v184_v51 = vadd.f32 1.1283791, %v183_v44 }
  0xc9   :  { %v157_v19 = vmul.f32 %v924_v17, %v155_v3  ;;  %vm162_vm0 = vweird.f32 %v924_v17 }
  0xca   :  { %925 = vrcp.f32 %v195_v22  ;;  %vm163_vm2 = vmor %vm161_vm1, %vm162_vm0  ;;  %v207_v49 = vand.u32 2147483648, %v195_v22  ;;  %v205_v21 = vand.u32 2147483647, %v195_v22  ;;  %vm201_vm5 = vweird.f32 %v195_v22 }
  0xcb   :  { %v158_v26 = vsub.f32 1.0, %v157_v19  ;;  %v185_v58 = vmul.f32 %v184_v51, %v1105_v32  ;;  %v458_v51 = vld [vmem:[%s1537_s7 + $0x38] sm:$0xff] }
  0xcc   :  { %v208_v40 = vor.u32 1.1754944e-38, %v207_v49  ;;  %vm206_vm8 = vcmp.eq.f32.partialorder %v205_v21, 8.507059e+37  ;;  %v444_v49 = vld [vmem:[%s1536_s8 + $0x18] sm:$0xff]  ;;  %473 = vmatpush.msra.mxu1 %v458_v51  ;;  %v443_v21 = vld [vmem:[%s1536_s8 + $0x10] sm:$0xff] }
  0xcd   :  { %v159_v30 = vmul.f32 %v924_v17, %v158_v26 }
  0xcf   :  { %v160_v35 = vadd.f32 %v924_v17, %v159_v30 }
  0xd0   :  { %v926_v38 = vpop.eup %925 }
  0xd1   :  { %v164_v41 = vsel %vm163_vm2, %v924_v17, %v160_v35  ;;  %v197_v45 = vmul.f32 %v926_v38, %v195_v22  ;;  %vm202_vm4 = vweird.f32 %v926_v38 }
  0xd2   :  { %v169_v43 = vsel %vm166_vm3, %v168_v37, %v164_v41  ;;  %vm203_vm7 = vmor %vm201_vm5, %vm202_vm4  ;;  %v447_v37 = vld [vmem:[%s1536_s8 + $0x30] sm:$0xff]  ;;  %v446_v41 = vld [vmem:[%s1536_s8 + $0x28] sm:$0xff] }
  0xd3   :  { %v170_v46 = vmul.f32 %v169_v43, %v145_v39  ;;  %v198_v47 = vsub.f32 1.0, %v197_v45  ;;  %503 = vmatpush.msrb.mxu2 %v447_v37  ;;  %v445_v45 = vld [vmem:[%s1536_s8 + $0x20] sm:$0xff]  ;;  %v520_v37 = vld [vmem:[%s1538_s9 + $0x8] sm:$0xff] }
  0xd5   :  { %v897_v50 = vclamps-f32 %v170_v46, 1.0  ;;  %v199_v52 = vmul.f32 %v926_v38, %v198_v47  ;;  %504 = vmatpush.msrb.mxu2 %v446_v41  ;;  %v519_v41 = vld [vmem:[%s1538_s9] sm:$0xff] }
  0xd7   :  { %v213_v54 = vadd.f32 1.0, %v897_v50  ;;  %v200_v55 = vadd.f32 %v926_v38, %v199_v52  ;;  %505 = vmatpush.msrb.mxu2 %v445_v45 }
  0xd9   :  { %v215_v57 = vmul.f32 %v213_v54, %v129_v53  ;;  %v204_v59 = vsel %vm203_vm7, %v926_v38, %v200_v55  ;;  %506 = vmatpush.msrb.mxu2 %v444_v49  ;;  %v457_v54 = vld [vmem:[%s1537_s7 + $0x30] sm:$0xff] }
  0xda   :  { %v209_v60 = vsel %vm206_vm8, %v208_v40, %v204_v59  ;;  %474 = vmatpush.msra.mxu1 %v457_v54  ;;  %v456_v59 = vld [vmem:[%s1537_s7 + $0x28] sm:$0xff] }
  0xdb   :  { %218 = vst.msk [vmem:[#allocation2 + $0x8] sm:$0xff] %vm217_vm6, %v215_v57  ;;  %901 = vmatmul.msk.f32.vlgmr.msra.gmra.mxu2 %vm217_vm6, %v215_v57  ;;  %v210_v61 = vmul.f32 %v209_v60, %v185_v58  ;;  %v442_v57 = vld [vmem:[%s1536_s8 + $0x8] sm:$0xff] }
  0xdc   :  { %507 = vmatpush.msrb.mxu2 %v443_v21  ;;  %475 = vmatpush.msra.mxu1 %v456_v59 }
  0xdd   :  { %v898_v20 = vclamps-f32 %v210_v61, 1.0 }
  0xde   :  { %508 = vmatpush.msrb.mxu2 %v442_v57 }
  0xdf   :  { %v214_v0 = vadd.f32 1.0, %v898_v20  ;;  %v455_v20 = vld [vmem:[%s1537_s7 + $0x20] sm:$0xff] }
  0xe0   :  { %509 = vmatpush.msrb.mxu2 %v441_v62  ;;  %476 = vmatpush.msra.mxu1 %v455_v20 }
  0xe1   :  { %v216_v3 = vmul.f32 %v214_v0, %v130_v63  ;;  %v526_v63 = vld [vmem:[%s1538_s9 + $0x38] sm:$0xff] }
  0xe2   :  { %v220_v32 = vld [vmem:[#allocation2 + $0x7] sm:$0xff]  ;;  %v454_v0 = vld [vmem:[%s1537_s7 + $0x18] sm:$0xff] }
  0xe3   :  { %v232_v4 = vsel %vm1201_vm9, %v220_v32, 0.0  ;;  %219 = vst.msk [vmem:[#allocation2 + $0x10] sm:$0xff] %vm217_vm6, %v216_v3  ;;  %902 = vmatmul.msk.f32.gmra.mxu2 %vm217_vm6, %v216_v3  ;;  %477 = vmatpush.msra.mxu1 %v454_v0 }
  0xe4   :  { %899 = vmatmul.msk.f32.vlgmr.msra.gmra.mxu3 %vm217_vm6, %v232_v4 }
  0xe5   :  { %541 = vmatpush.msra.mxu3 %v526_v63 }
  0xe7   :  { %542 = vmatpush.msra.mxu3 %v525_v5 }
  0xea   :  { %v221_v6 = vld [vmem:[#allocation2 + $0xf] sm:$0xff] }
  0xeb   :  { %v233_v7 = vsel %vm1210_vm10, %v221_v6, 0.0  ;;  %v222_v9 = vld [vmem:[#allocation2 + $0x9] sm:$0xff]  ;;  %v223_v12 = vld [vmem:[#allocation2 + $0x11] sm:$0xff] }
  0xec   :  { %900 = vmatmul.msk.f32.gmra.mxu3 %vm217_vm6, %v233_v7  ;;  %v300_v10 = vsel %vm1217_vm11, %v222_v9, 0.0  ;;  %v301_v13 = vsel %vm1224_vm12, %v223_v12, 0.0  ;;  %v453_v6 = vld [vmem:[%s1537_s7 + $0x10] sm:$0xff]  ;;  %v524_v7 = vld [vmem:[%s1538_s9 + $0x28] sm:$0xff] }
  0xed   :  { %v452_v12 = vld [vmem:[%s1537_s7 + $0x8] sm:$0xff]  ;;  %478 = vmatpush.msra.mxu1 %v453_v6  ;;  %543 = vmatpush.msra.mxu3 %v524_v7 }
  0xef   :  { %479 = vmatpush.msra.mxu1 %v452_v12 }
  0xf4   :  { %903 = vmatmul.msk.f32.vlgmr.msrb.gmra.mxu3 %vm217_vm6, %v300_v10 }
  0xfc   :  { %904 = vmatmul.msk.f32.gmra.mxu3 %vm217_vm6, %v301_v13  ;;  %v523_v13 = vld [vmem:[%s1538_s9 + $0x20] sm:$0xff] }
  0xfd   :  { %544 = vmatpush.msra.mxu3 %v523_v13 }
 0x15e   :  { %v294_v16 = vpop.f32.mrf.mxu2 }
 0x166   :  { %v297_v26 = vpop.f32.mrf.mxu2 }
 0x167   :  { %v265_v14 = vpop.f32.mrf.mxu3 }
 0x168   :  { %v295_v17 = vadd.f32 %v294_v16, %v265_v14 }
 0x16f   :  { %v268_v15 = vpop.f32.mrf.mxu3 }
 0x170   :  { %v298_v27 = vadd.f32 %v297_v26, %v268_v15 }
 0x177   :  { %v333_v19 = vpop.f32.mrf.mxu3 }
 0x178   :  { %v339_v22 = vadd.f32 %v333_v19, %v295_v17 }
 0x17a   :  { %v1234_v24 = vadd.f32 %v920_v18, %v339_v22 }
 0x17c   :  { %v1237_v25 = vmul.f32 0.70710677, %v1234_v24 }
 0x17e   :  { %v351_v29 = vmul.f32 %v1237_v25, %v1237_v25 }
 0x17f   :  { %v336_v30 = vpop.f32.mrf.mxu3 }
 0x180   :  { %v1241_v31 = vmin.f32 %v351_v29, 16.0  ;;  %v340_v23 = vadd.f32 %v336_v30, %v298_v27  ;;  %v522_v29 = vld [vmem:[%s1538_s9 + $0x18] sm:$0xff]  ;;  %v521_v30 = vld [vmem:[%s1538_s9 + $0x10] sm:$0xff] }
 0x181   :  { %545 = vmatpush.msra.mxu3 %v522_v29 }
 0x182   :  { %v353_v34 = vmul.f32 2.1237322e-06, %v1241_v31  ;;  %v364_v35 = vmul.f32 3.8918573e-05, %v1241_v31  ;;  %v1248_v36 = vadd.f32 %v920_v18, %v340_v23  ;;  %v451_v18 = vld [vmem:[%s1537_s7] sm:$0xff] }
 0x183   :  { %480 = vmatpush.msra.mxu1 %v451_v18  ;;  %546 = vmatpush.msra.mxu3 %v521_v30 }
 0x184   :  { %v354_v38 = vadd.f32 0.00028619796, %v353_v34  ;;  %v365_v39 = vadd.f32 0.001143296, %v364_v35  ;;  %v1257_v42 = vmul.f32 0.70710677, %v1248_v36 }
 0x185   :  { %547 = vmatpush.msra.mxu3 %v520_v37  ;;  %v348_v6 = vmul.f32 0.5, %v1248_v36 }
 0x186   :  { %v355_v43 = vmul.f32 %v354_v38, %v1241_v31  ;;  %v366_v44 = vmul.f32 %v365_v39, %v1241_v31  ;;  %v391_v46 = vmul.f32 %v1257_v42, %v1257_v42 }
 0x187   :  { %548 = vmatpush.msra.mxu3 %v519_v41  ;;  %v658_v41 = vld [vmem:[%s1541_s11 + $0x30] sm:$0xff] }
 0x188   :  { %v356_v47 = vadd.f32 0.0036580483, %v355_v43  ;;  %v367_v48 = vadd.f32 0.014752088, %v366_v44  ;;  %v1269_v50 = vmin.f32 %v391_v46, 16.0 }
 0x18a   :  { %v368_v52 = vmul.f32 %v367_v48, %v1241_v31  ;;  %v393_v53 = vmul.f32 2.1237322e-06, %v1269_v50  ;;  %v404_v55 = vmul.f32 3.8918573e-05, %v1269_v50  ;;  %v357_v56 = vmul.f32 %v356_v47, %v1241_v31 }
 0x18c   :  { %v369_v40 = vadd.f32 0.112945676, %v368_v52  ;;  %v394_v58 = vadd.f32 0.00028619796, %v393_v53  ;;  %v405_v60 = vadd.f32 0.001143296, %v404_v55 }
 0x18d   :  { %v358_v3 = vadd.f32 0.05243302, %v357_v56 }
 0x18e   :  { %v370_v61 = vmul.f32 %v369_v40, %v1241_v31  ;;  %v406_v2 = vmul.f32 %v405_v60, %v1269_v50  ;;  %v395_v4 = vmul.f32 %v394_v58, %v1269_v50  ;;  %v347_v60 = vmul.f32 0.5, %v1234_v24 }
 0x18f   :  { %v359_v14 = vmul.f32 %v358_v3, %v1241_v31 }
 0x190   :  { %v371_v32 = vadd.f32 0.4994258, %v370_v61  ;;  %v407_v10 = vadd.f32 0.014752088, %v406_v2  ;;  %v396_v16 = vadd.f32 0.0036580483, %v395_v4 }
 0x191   :  { %v360_v22 = vadd.f32 0.18741608, %v359_v14 }
 0x192   :  { %v372_v9 = vmul.f32 %v371_v32, %v1241_v31  ;;  %v408_v17 = vmul.f32 %v407_v10, %v1269_v50  ;;  %v397_v26 = vmul.f32 %v396_v16, %v1269_v50 }
 0x193   :  { %v361_v34 = vmul.f32 %v360_v22, %v1241_v31 }
 0x194   :  { %v373_v15 = vadd.f32 1.0, %v372_v9  ;;  %v409_v19 = vadd.f32 0.112945676, %v408_v17  ;;  %v398_v35 = vadd.f32 0.05243302, %v397_v26 }
 0x195   :  { %v362_v45 = vadd.f32 1.1283791, %v361_v34 }
 0x196   :  { %927 = vrcp.f32 %v373_v15  ;;  %v410_v27 = vmul.f32 %v409_v19, %v1269_v50  ;;  %v385_v46 = vand.u32 2147483648, %v373_v15  ;;  %v399_v31 = vmul.f32 %v398_v35, %v1269_v50  ;;  %v659_v35 = vld [vmem:[%s1541_s11 + $0x38] sm:$0xff] }
 0x197   :  { %v383_v48 = vand.u32 2147483647, %v373_v15  ;;  %vm379_vm14 = vweird.f32 %v373_v15  ;;  %v363_v21 = vmul.f32 %v362_v45, %v1237_v25  ;;  %678 = vmatpush.msrb.mxu0 %v659_v35  ;;  %v657_v45 = vld [vmem:[%s1541_s11 + $0x28] sm:$0xff] }
 0x198   :  { %v411_v23 = vadd.f32 0.4994258, %v410_v27  ;;  %v386_v51 = vor.u32 1.1754944e-38, %v385_v46  ;;  %v400_v52 = vadd.f32 0.18741608, %v399_v31  ;;  %v704_v35 = vld [vmem:[%s1542_s15 + $0x48] sm:$0xff] }
 0x199   :  { %vm384_vm0 = vcmp.eq.f32.partialorder %v383_v48, 8.507059e+37  ;;  %679 = vmatpush.msrb.mxu0 %v658_v41  ;;  %v656_v48 = vld [vmem:[%s1541_s11 + $0x20] sm:$0xff] }
 0x19a   :  { %v412_v39 = vmul.f32 %v411_v23, %v1269_v50  ;;  %v401_v40 = vmul.f32 %v400_v52, %v1269_v50  ;;  %v655_v52 = vld [vmem:[%s1541_s11 + $0x18] sm:$0xff]  ;;  %v703_v41 = vld [vmem:[%s1542_s15 + $0x40] sm:$0xff] }
 0x19b   :  { %680 = vmatpush.msrb.mxu0 %v657_v45 }
 0x19c   :  { %v928_v33 = vpop.eup %927  ;;  %v413_v44 = vadd.f32 1.0, %v412_v39  ;;  %v402_v20 = vadd.f32 1.1283791, %v401_v40 }
 0x19d   :  { %v375_v38 = vmul.f32 %v928_v33, %v373_v15  ;;  %vm380_vm13 = vweird.f32 %v928_v33  ;;  %681 = vmatpush.msrb.mxu0 %v656_v48 }
 0x19e   :  { %929 = vrcp.f32 %v413_v44  ;;  %vm381_vm15 = vmor %vm379_vm14, %vm380_vm13  ;;  %v425_v62 = vand.u32 2147483648, %v413_v44  ;;  %v423_v0 = vand.u32 2147483647, %v413_v44  ;;  %vm419_vm2 = vweird.f32 %v413_v44 }
 0x19f   :  { %v376_v43 = vsub.f32 1.0, %v375_v38  ;;  %v403_v3 = vmul.f32 %v402_v20, %v1257_v42  ;;  %682 = vmatpush.msrb.mxu0 %v655_v52 }
 0x1a0   :  { %v426_v50 = vor.u32 1.1754944e-38, %v425_v62  ;;  %vm424_vm4 = vcmp.eq.f32.partialorder %v423_v0, 8.507059e+37 }
 0x1a1   :  { %v377_v47 = vmul.f32 %v928_v33, %v376_v43 }
 0x1a3   :  { %v378_v49 = vadd.f32 %v928_v33, %v377_v47 }
 0x1a4   :  { %v930_v55 = vpop.eup %929 }
 0x1a5   :  { %v382_v53 = vsel %vm381_vm15, %v928_v33, %v378_v49  ;;  %v415_v57 = vmul.f32 %v930_v55, %v413_v44  ;;  %vm420_vm1 = vweird.f32 %v930_v55 }
 0x1a6   :  { %v387_v54 = vsel %vm384_vm0, %v386_v51, %v382_v53  ;;  %vm421_vm3 = vmor %vm419_vm2, %vm420_vm1 }
 0x1a7   :  { %v388_v56 = vmul.f32 %v387_v54, %v363_v21  ;;  %v416_v59 = vsub.f32 1.0, %v415_v57 }
 0x1a9   :  { %v905_v58 = vclamps-f32 %v388_v56, 1.0  ;;  %v417_v63 = vmul.f32 %v930_v55, %v416_v59 }
 0x1ab   :  { %v431_v61 = vadd.f32 1.0, %v905_v58  ;;  %v418_v25 = vadd.f32 %v930_v55, %v417_v63  ;;  %v653_v58 = vld [vmem:[%s1541_s11 + $0x8] sm:$0xff] }
 0x1ad   :  { %v433_v2 = vmul.f32 %v431_v61, %v347_v60  ;;  %v422_v32 = vsel %vm421_vm3, %v930_v55, %v418_v25  ;;  %v654_v55 = vld [vmem:[%s1541_s11 + $0x10] sm:$0xff]  ;;  %v652_v61 = vld [vmem:[%s1541_s11] sm:$0xff] }
 0x1ae   :  { %v427_v24 = vsel %vm424_vm4, %v426_v50, %v422_v32  ;;  %683 = vmatpush.msrb.mxu0 %v654_v55 }
 0x1af   :  { %435 = vst.msk [vmem:[#allocation2 + $0x8] sm:$0xff] %vm217_vm6, %v433_v2  ;;  %909 = vmatmul.msk.f32.vlgmr.msrb.gmra.mxu2 %vm217_vm6, %v433_v2  ;;  %v428_v4 = vmul.f32 %v427_v24, %v403_v3 }
 0x1b0   :  { %684 = vmatpush.msrb.mxu0 %v653_v58 }
 0x1b1   :  { %v906_v5 = vclamps-f32 %v428_v4, 1.0 }
 0x1b2   :  { %685 = vmatpush.msrb.mxu0 %v652_v61 }
 0x1b3   :  { %v432_v7 = vadd.f32 1.0, %v906_v5 }
 0x1b5   :  { %v434_v12 = vmul.f32 %v432_v7, %v348_v6 }
 0x1b6   :  { %v437_v9 = vld [vmem:[#allocation2 + $0x7] sm:$0xff] }
 0x1b7   :  { %v449_v10 = vsel %vm1201_vm9, %v437_v9, 0.0  ;;  %436 = vst.msk [vmem:[#allocation2 + $0x10] sm:$0xff] %vm217_vm6, %v434_v12  ;;  %910 = vmatmul.msk.f32.gmra.mxu2 %vm217_vm6, %v434_v12  ;;  %v709_v12 = vld [vmem:[%s1542_s15 + $0x70] sm:$0xff] }
 0x1b8   :  { %907 = vmatmul.msk.f32.vlgmr.msra.gmra.mxu1 %vm217_vm6, %v449_v10  ;;  %v710_v10 = vld [vmem:[%s1542_s15 + $0x78] sm:$0xff] }
 0x1b9   :  { %711 = vmatpush.msrb.mxu1 %v710_v10  ;;  %743 = vmatpush.msra.mxu2 %v710_v10 }
 0x1bb   :  { %712 = vmatpush.msrb.mxu1 %v709_v12  ;;  %744 = vmatpush.msra.mxu2 %v709_v12 }
 0x1be   :  { %v438_v42 = vld [vmem:[#allocation2 + $0xf] sm:$0xff] }
 0x1bf   :  { %v439_v13 = vld [vmem:[#allocation2 + $0x9] sm:$0xff]  ;;  %v450_v14 = vsel %vm1210_vm10, %v438_v42, 0.0  ;;  %v440_v1 = vld [vmem:[#allocation2 + $0x11] sm:$0xff] }
 0x1c0   :  { %v517_v36 = vsel %vm1217_vm11, %v439_v13, 0.0  ;;  %908 = vmatmul.msk.f32.gmra.mxu1 %vm217_vm6, %v450_v14  ;;  %v518_v15 = vsel %vm1224_vm12, %v440_v1, 0.0 }
 0x1c1   :  { %911 = vmatmul.msk.f32.vlgmr.msra.gmra.mxu3 %vm217_vm6, %v517_v36  ;;  %v708_v36 = vld [vmem:[%s1542_s15 + $0x68] sm:$0xff] }
 0x1c2   :  { %713 = vmatpush.msrb.mxu1 %v708_v36  ;;  %745 = vmatpush.msra.mxu2 %v708_v36 }
 0x1c9   :  { %912 = vmatmul.msk.f32.gmra.mxu3 %vm217_vm6, %v518_v15 }
 0x232   :  { %v511_v17 = vpop.f32.mrf.mxu2 }
 0x235   :  { %v482_v16 = vpop.f32.mrf.mxu1 }
 0x236   :  { %v512_v18 = vadd.f32 %v511_v17, %v482_v16  ;;  %v707_v16 = vld [vmem:[%s1542_s15 + $0x60] sm:$0xff] }
 0x237   :  { %714 = vmatpush.msrb.mxu1 %v707_v16  ;;  %746 = vmatpush.msra.mxu2 %v707_v16 }
 0x23a   :  { %v514_v29 = vpop.f32.mrf.mxu2 }
 0x23d   :  { %v485_v26 = vpop.f32.mrf.mxu1 }
 0x23e   :  { %v515_v11 = vadd.f32 %v514_v29, %v485_v26 }
 0x244   :  { %v550_v19 = vpop.f32.mrf.mxu3 }
 0x245   :  { %v556_v8 = vadd.f32 %v550_v19, %v512_v18 }
 0x247   :  { %v1367_v22 = vadd.f32 %v921_v28, %v556_v8  ;;  %v706_v8 = vld [vmem:[%s1542_s15 + $0x58] sm:$0xff] }
 0x248   :  { %715 = vmatpush.msrb.mxu1 %v706_v8  ;;  %747 = vmatpush.msra.mxu2 %v706_v8 }
 0x249   :  { %v1370_v27 = vmul.f32 0.70710677, %v1367_v22 }
 0x24b   :  { %v568_v30 = vmul.f32 %v1370_v27, %v1370_v27 }
 0x24c   :  { %v553_v23 = vpop.f32.mrf.mxu3 }
 0x24d   :  { %v1374_v33 = vmin.f32 %v568_v30, 16.0  ;;  %v557_v34 = vadd.f32 %v553_v23, %v515_v11  ;;  %v705_v11 = vld [vmem:[%s1542_s15 + $0x50] sm:$0xff] }
 0x24e   :  { %716 = vmatpush.msrb.mxu1 %v705_v11  ;;  %748 = vmatpush.msra.mxu2 %v705_v11 }
 0x24f   :  { %v570_v37 = vmul.f32 2.1237322e-06, %v1374_v33  ;;  %v581_v38 = vmul.f32 3.8918573e-05, %v1374_v33  ;;  %v1381_v39 = vadd.f32 %v921_v28, %v557_v34 }
 0x250   :  { %717 = vmatpush.msrb.mxu1 %v704_v35  ;;  %749 = vmatpush.msra.mxu2 %v704_v35 }
 0x251   :  { %v571_v43 = vadd.f32 0.00028619796, %v570_v37  ;;  %v582_v44 = vadd.f32 0.001143296, %v581_v38  ;;  %v1390_v46 = vmul.f32 0.70710677, %v1381_v39 }
 0x252   :  { %718 = vmatpush.msrb.mxu1 %v703_v41  ;;  %750 = vmatpush.msra.mxu2 %v703_v41 }
 0x253   :  { %v572_v31 = vmul.f32 %v571_v43, %v1374_v33  ;;  %v583_v47 = vmul.f32 %v582_v44, %v1374_v33  ;;  %v608_v49 = vmul.f32 %v1390_v46, %v1390_v46 }
 0x255   :  { %v584_v51 = vadd.f32 0.014752088, %v583_v47  ;;  %v573_v21 = vadd.f32 0.0036580483, %v572_v31  ;;  %v1402_v53 = vmin.f32 %v608_v49, 16.0  ;;  %v702_v49 = vld [vmem:[%s1542_s15 + $0x38] sm:$0xff] }
 0x256   :  { %719 = vmatpush.msrb.mxu1 %v702_v49  ;;  %751 = vmatpush.msra.mxu2 %v702_v49 }
 0x257   :  { %v585_v54 = vmul.f32 %v584_v51, %v1374_v33  ;;  %v610_v56 = vmul.f32 2.1237322e-06, %v1402_v53  ;;  %v621_v40 = vmul.f32 3.8918573e-05, %v1402_v53  ;;  %v574_v59 = vmul.f32 %v573_v21, %v1374_v33 }
 0x259   :  { %v586_v57 = vadd.f32 0.112945676, %v585_v54  ;;  %v611_v60 = vadd.f32 0.00028619796, %v610_v56  ;;  %v622_v62 = vadd.f32 0.001143296, %v621_v40 }
 0x25a   :  { %v575_v25 = vadd.f32 0.05243302, %v574_v59  ;;  %v700_v40 = vld [vmem:[%s1542_s15 + $0x28] sm:$0xff] }
 0x25b   :  { %v587_v20 = vmul.f32 %v586_v57, %v1374_v33  ;;  %v612_v63 = vmul.f32 %v611_v60, %v1402_v53  ;;  %v623_v0 = vmul.f32 %v622_v62, %v1402_v53  ;;  %v564_v57 = vmul.f32 0.5, %v1367_v22  ;;  %v699_v60 = vld [vmem:[%s1542_s15 + $0x20] sm:$0xff]  ;;  %v698_v22 = vld [vmem:[%s1542_s15 + $0x18] sm:$0xff] }
 0x25c   :  { %v576_v5 = vmul.f32 %v575_v25, %v1374_v33 }
 0x25d   :  { %v588_v2 = vadd.f32 0.4994258, %v587_v20  ;;  %v624_v50 = vadd.f32 0.014752088, %v623_v0  ;;  %v613_v32 = vadd.f32 0.0036580483, %v612_v63 }
 0x25e   :  { %v577_v42 = vadd.f32 0.18741608, %v576_v5 }
 0x25f   :  { %v589_v3 = vmul.f32 %v588_v2, %v1374_v33  ;;  %v625_v24 = vmul.f32 %v624_v50, %v1402_v53  ;;  %v614_v7 = vmul.f32 %v613_v32, %v1402_v53  ;;  %v565_v50 = vmul.f32 0.5, %v1381_v39  ;;  %v695_v39 = vld [vmem:[%s1542_s15] sm:$0xff] }
 0x260   :  { %v578_v17 = vmul.f32 %v577_v42, %v1374_v33 }
 0x261   :  { %v590_v4 = vadd.f32 1.0, %v589_v3  ;;  %v626_v6 = vadd.f32 0.112945676, %v625_v24  ;;  %v615_v14 = vadd.f32 0.05243302, %v614_v7  ;;  %v696_v24 = vld [vmem:[%s1542_s15 + $0x8] sm:$0xff] }
 0x262   :  { %v579_v30 = vadd.f32 1.1283791, %v578_v17  ;;  %v941_v7 = vld [vmem:[%s1531_s0] sm:$0xff] }
 0x263   :  { %931 = vrcp.f32 %v590_v4  ;;  %v627_v9 = vmul.f32 %v626_v6, %v1402_v53  ;;  %v616_v19 = vmul.f32 %v615_v14, %v1402_v53  ;;  %v602_v29 = vand.u32 2147483648, %v590_v4 }
 0x264   :  { %v600_v33 = vand.u32 2147483647, %v590_v4  ;;  %vm596_vm7 = vweird.f32 %v590_v4  ;;  %v580_v44 = vmul.f32 %v579_v30, %v1370_v27  ;;  %v701_v27 = vld [vmem:[%s1542_s15 + $0x30] sm:$0xff] }
 0x265   :  { %v628_v13 = vadd.f32 0.4994258, %v627_v9  ;;  %v617_v34 = vadd.f32 0.18741608, %v616_v19  ;;  %v603_v38 = vor.u32 1.1754944e-38, %v602_v29  ;;  %720 = vmatpush.msrb.mxu1 %v701_v27  ;;  %752 = vmatpush.msra.mxu2 %v701_v27 }
 0x266   :  { %vm601_vm9 = vcmp.eq.f32.partialorder %v600_v33, 8.507059e+37  ;;  %v777_v27 = vld [vmem:[%s1543_s13] sm:$0x1] }
 0x267   :  { %v629_v1 = vmul.f32 %v628_v13, %v1402_v53  ;;  %v618_v47 = vmul.f32 %v617_v34, %v1402_v53  ;;  %721 = vmatpush.msrb.mxu1 %v700_v40  ;;  %753 = vmatpush.msra.mxu2 %v700_v40  ;;  %v942_v13 = vld [vmem:[%s1531_s0 + $0x8] sm:$0xff] }
 0x269   :  { %v932_v15 = vpop.eup %931  ;;  %v1439_v28 = vadd.f32 1.0, %v629_v1  ;;  %v619_v53 = vadd.f32 1.1283791, %v618_v47  ;;  %722 = vmatpush.msrb.mxu1 %v699_v60  ;;  %754 = vmatpush.msra.mxu2 %v699_v60 }
 0x26a   :  { %v592_v18 = vmul.f32 %v932_v15, %v590_v4  ;;  %vm597_vm5 = vweird.f32 %v932_v15  ;;  %v922_v4 = vld [vmem:[%s1540_s12] ss:$0 sm:$0xff] }
 0x26b   :  { %933 = vrcp.f32 %v1439_v28  ;;  %vm598_vm8 = vmor %vm596_vm7, %vm597_vm5  ;;  %v642_v54 = vand.u32 2147483648, %v1439_v28  ;;  %v640_v56 = vand.u32 2147483647, %v1439_v28  ;;  %vm636_vm11 = vweird.f32 %v1439_v28  ;;  %723 = vmatpush.msrb.mxu1 %v698_v22  ;;  %755 = vmatpush.msra.mxu2 %v698_v22 }
 0x26c   :  { %v593_v26 = vsub.f32 1.0, %v592_v18  ;;  %v620_v20 = vmul.f32 %v619_v53, %v1390_v46  ;;  %v697_v46 = vld [vmem:[%s1542_s15 + $0x10] sm:$0xff] }
 0x26d   :  { %v643_v62 = vor.u32 1.1754944e-38, %v642_v54  ;;  %vm641_vm13 = vcmp.eq.f32.partialorder %v640_v56, 8.507059e+37  ;;  %724 = vmatpush.msrb.mxu1 %v697_v46  ;;  %756 = vmatpush.msra.mxu2 %v697_v46 }
 0x26e   :  { %v594_v23 = vmul.f32 %v932_v15, %v593_v26 }
 0x26f   :  { %725 = vmatpush.msrb.mxu1 %v696_v24  ;;  %757 = vmatpush.msra.mxu2 %v696_v24 }
 0x270   :  { %v595_v37 = vadd.f32 %v932_v15, %v594_v23 }
 0x271   :  { %v934_v43 = vpop.eup %933  ;;  %726 = vmatpush.msrb.mxu1 %v695_v39  ;;  %758 = vmatpush.msra.mxu2 %v695_v39 }
 0x272   :  { %v599_v45 = vsel %vm598_vm8, %v932_v15, %v595_v37  ;;  %v632_v48 = vmul.f32 %v934_v43, %v1439_v28  ;;  %vm637_vm10 = vweird.f32 %v934_v43 }
 0x273   :  { %v604_v31 = vsel %vm601_vm9, %v603_v38, %v599_v45  ;;  %vm638_vm12 = vmor %vm636_vm11, %vm637_vm10 }
 0x274   :  { %v605_v51 = vmul.f32 %v604_v31, %v580_v44  ;;  %v633_v52 = vsub.f32 1.0, %v632_v48 }
 0x276   :  { %v913_v21 = vclamps-f32 %v605_v51, 1.0  ;;  %v634_v55 = vmul.f32 %v934_v43, %v633_v52 }
 0x278   :  { %v648_v58 = vadd.f32 1.0, %v913_v21  ;;  %v635_v59 = vadd.f32 %v934_v43, %v634_v55  ;;  %v790_v55 = vld [vmem:[%s1544_s14] sm:$0x1] }
 0x27a   :  { %v650_v61 = vmul.f32 %v648_v58, %v564_v57  ;;  %v639_v63 = vsel %vm638_vm12, %v934_v43, %v635_v59 }
 0x27b   :  { %v644_v0 = vsel %vm641_vm13, %v643_v62, %v639_v63 }
 0x27c   :  { %915 = vmatmul.msk.f32.vlgmr.msrb.gmra.mxu0 %vm217_vm6, %v650_v61  ;;  %v645_v2 = vmul.f32 %v644_v0, %v620_v20 }
 0x27e   :  { %v914_v25 = vclamps-f32 %v645_v2, 1.0 }
 0x280   :  { %v649_v3 = vadd.f32 1.0, %v914_v25 }
 0x282   :  { %v651_v32 = vmul.f32 %v649_v3, %v565_v50 }
 0x284   :  { %916 = vmatmul.msk.f32.gmra.mxu0 %vm217_vm6, %v651_v32 }
 0x2f9   :  { %v687_v5 = vpop.f32.mrf.mxu0 }
 0x2fa   :  { %v688_v6 = vadd.f32 %v922_v4, %v687_v5 }
 0x2fc   :  { %v693_v9 = vadd.f32 %v941_v7, %v688_v6 }
 0x2fe   :  { %v741_v10 = vmul.f32 %v693_v9, %v693_v9  ;;  %727 = vmatmul.f32.vlgmr.msrb.gmra.mxu1 %v693_v9 }
 0x300   :  { %759 = vmatmul.f32.vlgmr.msra.gmra.mxu2 %v741_v10 }
 0x301   :  { %v690_v12 = vpop.f32.mrf.mxu0 }
 0x302   :  { %v691_v42 = vadd.f32 %v922_v4, %v690_v12 }
 0x304   :  { %v694_v14 = vadd.f32 %v942_v13, %v691_v42 }
 0x306   :  { %730 = vmatmul.f32.gmra.mxu1 %v694_v14  ;;  %v742_v36 = vmul.f32 %v694_v14, %v694_v14 }
 0x308   :  { %762 = vmatmul.f32.gmra.mxu2 %v742_v36 }
 0x37b   :  { %v728_v1 = vpop.f32.mrf.mxu1 }
 0x383   :  { %v760_v15 = vpop.f32.mrf.mxu2  ;;  %v731_v16 = vpop.f32.mrf.mxu1 }
 0x384   :  { %v734_v17 = vadd.f32 %v731_v16, %v728_v1 }
 0x386   :  { %v735_v18 = vrot.slane %v734_v17, 4 }
 0x388   :  { %v736_v28 = vadd.f32 %v735_v18, %v734_v17 }
 0x38a   :  { %v737_v19 = vrot.slane %v736_v28, 2 }
 0x38b   :  { %v763_v8 = vpop.f32.mrf.mxu2 }
 0x38c   :  { %v738_v26 = vadd.f32 %v737_v19, %v736_v28  ;;  %v766_v29 = vadd.f32 %v763_v8, %v760_v15 }
 0x38e   :  { %v739_v11 = vrot.slane %v738_v26, 1  ;;  %v767_v30 = vrot.slane %v766_v29, 4 }
 0x390   :  { %v768_v23 = vadd.f32 %v767_v30, %v766_v29  ;;  %v740_v33 = vadd.f32 %v739_v11, %v738_v26 }
 0x392   :  { %v769_v34 = vrot.slane %v768_v23, 2  ;;  %v773_v37 = vmul.f32 0.0078125, %v740_v33 }
 0x394   :  { %v770_v35 = vadd.f32 %v769_v34, %v768_v23  ;;  %v775_v43 = vmul.f32 %v773_v37, %v773_v37 }
 0x396   :  { %v771_v38 = vrot.slane %v770_v35, 1 }
 0x398   :  { %v772_v41 = vadd.f32 %v771_v38, %v770_v35 }
 0x39a   :  { %v774_v44 = vmul.f32 0.0078125, %v772_v41 }
 0x39c   :  { %v776_v45 = vsub.f32 %v774_v44, %v775_v43 }
 0x39e   :  { %v778_v31 = vadd.f32 1e-05, %v776_v45 }
 0x3a0   :  { %935 = vrsqrt.f32 %v778_v31  ;;  %vm785_vm14 = vweird.f32 %v778_v31 }
 0x3a6   :  { %v936_v47 = vpop.eup %935 }
 0x3a7   :  { %v780_v48 = vmul.f32 %v936_v47, %v778_v31  ;;  %vm786_vm6 = vweird.f32 %v936_v47 }
 0x3a8   :  { %vm787_vm15 = vmor %vm785_vm14, %vm786_vm6 }
 0x3a9   :  { %v781_v49 = vmul.f32 %v936_v47, %v780_v48 }
 0x3ab   :  { %v782_v51 = vmul.f32 0.5, %v781_v49 }
 0x3ad   :  { %v783_v52 = vsub.f32 1.5, %v782_v51 }
 0x3af   :  { %v784_v21 = vmul.f32 %v936_v47, %v783_v52 }
 0x3b1   :  { %v788_v54 = vsel %vm787_vm15, %v936_v47, %v784_v21 }
 0x3b2   :  { %v789_v53 = vmul.f32 %v788_v54, %v777_v27 }
 0x3b4   :  { %v791_v56 = vmul.f32 %v789_v53, %v773_v37  ;;  %v794_v40 = vperm.slane %v789_v53, 0 }
 0x3b6   :  { %v792_v57 = vsub.f32 %v790_v55, %v791_v56  ;;  %v796_v58 = vmul.f32 %v794_v40, %v693_v9  ;;  %v797_v59 = vmul.f32 %v794_v40, %v694_v14 }
 0x3b8   :  { %v799_v60 = vperm.slane %v792_v57, 0 }
 0x3ba   :  { %v1505_v61 = vadd.f32 %v799_v60, %v796_v58  ;;  %v1507_v62 = vadd.f32 %v799_v60, %v797_v59 }
 0x3bc   :  { %v1510_v20 = vmul.f32 0.70710677, %v1505_v61  ;;  %v1513_v63 = vmul.f32 0.70710677, %v1507_v62 }
 0x3be   :  { %v807_v22 = vmul.f32 %v1510_v20, %v1510_v20  ;;  %v847_v0 = vmul.f32 %v1513_v63, %v1513_v63 }
 0x3c0   :  { %v808_v2 = vmin.f32 %v807_v22, 16.0  ;;  %v848_v25 = vmin.f32 %v847_v0, 16.0 }
 0x3c2   :  { %v809_v50 = vmul.f32 2.1237322e-06, %v808_v2  ;;  %v820_v3 = vmul.f32 3.8918573e-05, %v808_v2  ;;  %v849_v32 = vmul.f32 2.1237322e-06, %v848_v25 }
 0x3c3   :  { %v860_v46 = vmul.f32 3.8918573e-05, %v848_v25 }
 0x3c4   :  { %v810_v24 = vadd.f32 0.00028619796, %v809_v50  ;;  %v821_v39 = vadd.f32 0.001143296, %v820_v3  ;;  %v850_v4 = vadd.f32 0.00028619796, %v849_v32 }
 0x3c5   :  { %v861_v5 = vadd.f32 0.001143296, %v860_v46 }
 0x3c6   :  { %v811_v6 = vmul.f32 %v810_v24, %v808_v2  ;;  %v822_v7 = vmul.f32 %v821_v39, %v808_v2  ;;  %v851_v9 = vmul.f32 %v850_v4, %v848_v25  ;;  %v803_v4 = vmul.f32 0.5, %v1505_v61 }
 0x3c7   :  { %v862_v10 = vmul.f32 %v861_v5, %v848_v25 }
 0x3c8   :  { %v812_v12 = vadd.f32 0.0036580483, %v811_v6  ;;  %v823_v42 = vadd.f32 0.014752088, %v822_v7  ;;  %v852_v36 = vadd.f32 0.0036580483, %v851_v9 }
 0x3c9   :  { %v863_v13 = vadd.f32 0.014752088, %v862_v10  ;;  %v804_v6 = vmul.f32 0.5, %v1507_v62 }
 0x3ca   :  { %v824_v14 = vmul.f32 %v823_v42, %v808_v2  ;;  %v813_v15 = vmul.f32 %v812_v12, %v808_v2  ;;  %v853_v28 = vmul.f32 %v852_v36, %v848_v25 }
 0x3cb   :  { %v864_v1 = vmul.f32 %v863_v13, %v848_v25 }
 0x3cc   :  { %v825_v16 = vadd.f32 0.112945676, %v824_v14  ;;  %v814_v8 = vadd.f32 0.05243302, %v813_v15  ;;  %v854_v30 = vadd.f32 0.05243302, %v853_v28 }
 0x3cd   :  { %v865_v17 = vadd.f32 0.112945676, %v864_v1 }
 0x3ce   :  { %v826_v18 = vmul.f32 %v825_v16, %v808_v2  ;;  %v815_v33 = vmul.f32 %v814_v8, %v808_v2  ;;  %v855_v37 = vmul.f32 %v854_v30, %v848_v25 }
 0x3cf   :  { %v866_v19 = vmul.f32 %v865_v17, %v848_v25 }
 0x3d0   :  { %v827_v26 = vadd.f32 0.4994258, %v826_v18  ;;  %v816_v38 = vadd.f32 0.18741608, %v815_v33  ;;  %v856_v41 = vadd.f32 0.18741608, %v855_v37 }
 0x3d1   :  { %v867_v29 = vadd.f32 0.4994258, %v866_v19 }
 0x3d2   :  { %v828_v11 = vmul.f32 %v827_v26, %v808_v2  ;;  %v817_v44 = vmul.f32 %v816_v38, %v808_v2  ;;  %v857_v47 = vmul.f32 %v856_v41, %v848_v25 }
 0x3d3   :  { %v868_v23 = vmul.f32 %v867_v29, %v848_v25 }
 0x3d4   :  { %v829_v34 = vadd.f32 1.0, %v828_v11  ;;  %v818_v51 = vadd.f32 1.1283791, %v817_v44  ;;  %v858_v55 = vadd.f32 1.1283791, %v857_v47 }
 0x3d5   :  { %v869_v35 = vadd.f32 1.0, %v868_v23 }
 0x3d6   :  { %937 = vrcp.f32 %v829_v34  ;;  %v841_v52 = vand.u32 2147483648, %v829_v34  ;;  %v839_v54 = vand.u32 2147483647, %v829_v34  ;;  %vm835_vm2 = vweird.f32 %v829_v34 }
 0x3d7   :  { %939 = vrcp.f32 %v869_v35  ;;  %v881_v53 = vand.u32 2147483648, %v869_v35  ;;  %v879_v40 = vand.u32 2147483647, %v869_v35  ;;  %vm875_vm4 = vweird.f32 %v869_v35 }
 0x3d8   :  { %v842_v58 = vor.u32 1.1754944e-38, %v841_v52  ;;  %v819_v60 = vmul.f32 %v818_v51, %v1510_v20  ;;  %vm840_vm5 = vcmp.eq.f32.partialorder %v839_v54, 8.507059e+37  ;;  %v859_v25 = vmul.f32 %v858_v55, %v1513_v63 }
 0x3d9   :  { %v882_v0 = vor.u32 1.1754944e-38, %v881_v53  ;;  %vm880_vm8 = vcmp.eq.f32.partialorder %v879_v40, 8.507059e+37 }
 0x3dc   :  { %v938_v43 = vpop.eup %937 }
 0x3dd   :  { %v940_v45 = vpop.eup %939  ;;  %v831_v31 = vmul.f32 %v938_v43, %v829_v34  ;;  %vm836_vm0 = vweird.f32 %v938_v43 }
 0x3de   :  { %v871_v48 = vmul.f32 %v940_v45, %v869_v35  ;;  %vm876_vm1 = vweird.f32 %v940_v45  ;;  %vm837_vm3 = vmor %vm835_vm2, %vm836_vm0 }
 0x3df   :  { %v832_v49 = vsub.f32 1.0, %v831_v31  ;;  %vm877_vm7 = vmor %vm875_vm4, %vm876_vm1 }
 0x3e0   :  { %v872_v27 = vsub.f32 1.0, %v871_v48 }
 0x3e1   :  { %v833_v21 = vmul.f32 %v938_v43, %v832_v49 }
 0x3e2   :  { %v873_v56 = vmul.f32 %v940_v45, %v872_v27 }
 0x3e3   :  { %v834_v57 = vadd.f32 %v938_v43, %v833_v21 }
 0x3e4   :  { %v874_v59 = vadd.f32 %v940_v45, %v873_v56 }
 0x3e5   :  { %v838_v22 = vsel %vm837_vm3, %v938_v43, %v834_v57 }
 0x3e6   :  { %v843_v2 = vsel %vm840_vm5, %v842_v58, %v838_v22  ;;  %v878_v50 = vsel %vm877_vm7, %v940_v45, %v874_v59 }
 0x3e7   :  { %v844_v3 = vmul.f32 %v843_v2, %v819_v60  ;;  %v883_v32 = vsel %vm880_vm8, %v882_v0, %v878_v50 }
 0x3e8   :  { %v884_v46 = vmul.f32 %v883_v32, %v859_v25 }
 0x3e9   :  { %v917_v24 = vclamps-f32 %v844_v3, 1.0 }
 0x3ea   :  { %v918_v39 = vclamps-f32 %v884_v46, 1.0 }
 0x3eb   :  { %v887_v5 = vadd.f32 1.0, %v917_v24 }
 0x3ec   :  { %v888_v20 = vadd.f32 1.0, %v918_v39 }
 0x3ed   :  { %v889_v7 = vmul.f32 %v887_v5, %v803_v4 }
 0x3ee   :  { %v890_v9 = vmul.f32 %v888_v20, %v804_v6 }
 0x3ef   :  { %891 = vst [vmem:[%s1545_s16] sm:$0xff] %v889_v7 }
 0x3f0   :  { %892 = vst [vmem:[%s1545_s16 + $0x8] sm:$0xff] %v890_v9 }

// kernel: tile.108
= control target key start
LH: loop header
LB: loop body
LE: loop exit
PB: predicated region body
PF: predicated region fallthrough
CT: control target
= control target key end

     0   :  { %s28_s0 = inlined_call_operand.vmem [shape: f32[16], index: 0, kind: input, shape index: {}]   ;;  %s29_s1 = inlined_call_operand.vmem [shape: f32[16,16], index: 1, kind: output, shape index: {}]  }
   0x1   :  { %v4_v0 = vld [vmem:[%s28_s0] ss:$0 sm:$0xff] }
   0x2   :  { %5 = vst [vmem:[%s29_s1] sm:$0xff] %v4_v0 }
   0x3   :  { %8 = vst [vmem:[%s29_s1 + $0x8] sm:$0xff] %v4_v0 }

// kernel: tile.109
= control target key start
LH: loop header
LB: loop body
LE: loop exit
PB: predicated region body
PF: predicated region fallthrough
CT: control target
= control target key end

     0   :  { %s7_s6 = smov 3  ;;  %s21_s9 = smov 3  ;;  %vm4_vm0 = vcmask 130048   ;;  %vm11_vm1 = vcmask 1048448   ;;  %vm18_vm2 = vcmask 917248   ;;  %vm25_vm3 = vcmask 786048   ;;  %s129_s0 = inlined_call_operand.vmem [shape: f32[16,16], index: 0, kind: input, shape index: {}]   ;;  %s130_s1 = inlined_call_operand.vmem [shape: f32[1,256], index: 1, kind: output, shape index: {}]  }
   0x1   :  { %v67_v0 = vld [vmem:[%s129_s0 + $0x7] ss:$8 sm:%s7_s6]   ;;  %s82_s10 = smov 112   ;;  %v69_v1 = vld [vmem:[%s129_s0 + $0x5] ss:$8 sm:%s21_s9]   ;;  %s83_s13 = smov 80  }
   0x2   :  { %9 = vrot.lane.b32.xlu0 %v67_v0, %s82_s10  ;;  %23 = vrot.lane.b32.xlu1 %v69_v1, %s83_s13  ;;  %s14_s14 = smov 3  ;;  %s28_s15 = smov 3  ;;  %vm32_vm4 = vcmask 654848   ;;  %vm39_vm5 = vcmask 523648   ;;  %vm46_vm6 = vcmask 392448   ;;  %vm53_vm7 = vcmask 261248  }
   0x3   :  { %s35_s16 = smov 3  ;;  %v68_v3 = vld [vmem:[%s129_s0 + $0x6] ss:$8 sm:%s14_s14]   ;;  %s84_s21 = smov 48   ;;  %v70_v4 = vld [vmem:[%s129_s0 + $0x4] ss:$8 sm:%s28_s15]  }
   0x4   :  { %v71_v2 = vld [vmem:[%s129_s0 + $0x3] ss:$8 sm:%s35_s16]   ;;  %s42_s24 = smov 3  ;;  %s85_s25 = smov 96  }
   0x5   :  { %37 = vrot.lane.b32.xlu2 %v71_v2, %s84_s21  ;;  %s86_s26 = smov 64   ;;  %s49_s27 = smov 3  ;;  %v72_v5 = vld [vmem:[%s129_s0 + $0x2] ss:$8 sm:%s42_s24]  }
   0x6   :  { %v73_v6 = vld [vmem:[%s129_s0 + $0x1] ss:$8 sm:%s49_s27]   ;;  %s87_s3 = smov 32   ;;  %s88_s4 = smov 16  }
   0x7   :  { %s2_s5 = smov 3 }
   0x8   :  { %v3_v7 = vld [vmem:[%s129_s0] ss:$8 sm:%s2_s5]  }
   0x9   :  { %5 = vst.msk [vmem:[#allocation0] ss:$8 sm:$0x3] %vm4_vm0, %v3_v7  }
   0xa   :  { %16 = vrot.lane.b32.xlu0 %v68_v3, %s85_s25  ;;  %30 = vrot.lane.b32.xlu1 %v70_v4, %s86_s26 }
   0xd   :  { %44 = vrot.lane.b32.xlu2 %v72_v5, %s87_s3 }
  0x12   :  { %51 = vrot.lane.b32.xlu0 %v73_v6, %s88_s4 }
  0x5f   :  { %v38_v8 = vpop.permute.xlu2 %37  }
  0x67   :  { %v45_v9 = vpop.permute.xlu2 %44  }
  0x74   :  { %v10_v10 = vpop.permute.xlu0 %9   ;;  %v24_v11 = vpop.permute.xlu1 %23  }
  0x75   :  { %12 = vst.msk [vmem:[#allocation0] ss:$8 sm:$0x3] %vm11_vm1, %v10_v10  }
  0x7c   :  { %v17_v12 = vpop.permute.xlu0 %16   ;;  %v31_v13 = vpop.permute.xlu1 %30  }
  0x7d   :  { %19 = vst.msk [vmem:[#allocation0] ss:$8 sm:$0x3] %vm18_vm2, %v17_v12  }
  0x7e   :  { %26 = vst.msk [vmem:[#allocation0] ss:$8 sm:$0x3] %vm25_vm3, %v24_v11  }
  0x7f   :  { %33 = vst.msk [vmem:[#allocation0] ss:$8 sm:$0x3] %vm32_vm4, %v31_v13  }
  0x80   :  { %40 = vst.msk [vmem:[#allocation0] ss:$8 sm:$0x3] %vm39_vm5, %v38_v8  }
  0x81   :  { %47 = vst.msk [vmem:[#allocation0] ss:$8 sm:$0x3] %vm46_vm6, %v45_v9  }
  0x84   :  { %v52_v14 = vpop.permute.xlu0 %51  }
  0x85   :  { %54 = vst.msk [vmem:[#allocation0] ss:$8 sm:$0x3] %vm53_vm7, %v52_v14  }
  0x8c   :  { %v57_v15 = vld [vmem:[#allocation0] sm:$0x1]  ;;  %v62_v16 = vld [vmem:[#allocation0 + $0x8] sm:$0x1] }
  0x8d   :  { %60 = vst [vmem:[%s130_s1] sm:$0x1] %v57_v15 }
  0x8e   :  { %74 = vst [vmem:[%s130_s1 + $0x1] sm:$0x1] %v62_v16 }

// kernel: tile.103
= control target key start
LH: loop header
LB: loop body
LE: loop exit
PB: predicated region body
PF: predicated region fallthrough
CT: control target
= control target key end

     0   :  { %s28_s0 = inlined_call_operand.vmem [shape: f32[8], index: 0, kind: input, shape index: {}]   ;;  %s29_s1 = inlined_call_operand.vmem [shape: f32[16,8], index: 1, kind: output, shape index: {}]  }
   0x1   :  { %v4_v0 = vld [vmem:[%s28_s0] ss:$0 sm:$0xff] }
   0x2   :  { %5 = vst [vmem:[%s29_s1] sm:$0xff] %v4_v0 }
   0x3   :  { %8 = vst [vmem:[%s29_s1 + $0x8] sm:$0xff] %v4_v0 }

// kernel: tile.104
= control target key start
LH: loop header
LB: loop body
LE: loop exit
PB: predicated region body
PF: predicated region fallthrough
CT: control target
= control target key end

     0   :  { %s131_s10 = smov 120   ;;  %s132_s11 = smov 104   ;;  %vm3_vm0 = vcmask 64512   ;;  %vm9_vm1 = vcmask 1048512   ;;  %vm15_vm2 = vcmask 982912   ;;  %vm21_vm3 = vcmask 917312   ;;  %s207_s0 = inlined_call_operand.vmem [shape: f32[16,8], index: 0, kind: input, shape index: {}]   ;;  %s208_s1 = inlined_call_operand.vmem [shape: f32[1,128], index: 1, kind: output, shape index: {}]  }
   0x1   :  { %v101_v0 = vld [vmem:[%s207_s0 + $0xf] sm:$0x1]   ;;  %v103_v1 = vld [vmem:[%s207_s0 + $0xd] sm:$0x1]   ;;  %v105_v2 = vld [vmem:[%s207_s0 + $0xb] sm:$0x1]  }
   0x2   :  { %7 = vrot.lane.b32.xlu0 %v101_v0, %s131_s10  ;;  %19 = vrot.lane.b32.xlu1 %v103_v1, %s132_s11  ;;  %s133_s14 = smov 88   ;;  %v102_v3 = vld [vmem:[%s207_s0 + $0xe] sm:$0x1]   ;;  %v104_v4 = vld [vmem:[%s207_s0 + $0xc] sm:$0x1]   ;;  %s134_s19 = smov 112  }
   0x3   :  { %31 = vrot.lane.b32.xlu2 %v105_v2, %s133_s14  ;;  %s135_s20 = smov 96   ;;  %v106_v5 = vld [vmem:[%s207_s0 + $0xa] sm:$0x1]   ;;  %s136_s23 = smov 80   ;;  %v107_v6 = vld [vmem:[%s207_s0 + $0x9] sm:$0x1]  }
   0x4   :  { %v108_v7 = vld [vmem:[%s207_s0 + $0x8] sm:$0x1]   ;;  %s137_s28 = smov 72   ;;  %s138_s29 = smov 64   ;;  %v109_v8 = vld [vmem:[%s207_s0 + $0x7] sm:$0x1]  }
   0x5   :  { %s139_s3 = smov 56   ;;  %v110_v9 = vld [vmem:[%s207_s0 + $0x6] sm:$0x1]   ;;  %v111_v10 = vld [vmem:[%s207_s0 + $0x5] sm:$0x1]   ;;  %s140_s8 = smov 48  }
   0x6   :  { %s141_s9 = smov 40   ;;  %v112_v11 = vld [vmem:[%s207_s0 + $0x4] sm:$0x1]   ;;  %s142_s12 = smov 32   ;;  %v113_v12 = vld [vmem:[%s207_s0 + $0x3] sm:$0x1]  }
   0x7   :  { %v114_v13 = vld [vmem:[%s207_s0 + $0x2] sm:$0x1]   ;;  %s143_s17 = smov 24   ;;  %s144_s18 = smov 16   ;;  %v115_v14 = vld [vmem:[%s207_s0 + $0x1] sm:$0x1]  }
   0x8   :  { %s145_s21 = smov 8   ;;  %v2_v15 = vld [vmem:[%s207_s0] sm:$0x1]   ;;  %vm27_vm4 = vcmask 851712   ;;  %vm33_vm5 = vcmask 786112   ;;  %vm39_vm6 = vcmask 720512  }
   0x9   :  { %4 = vst.msk [vmem:[#allocation0] sm:$0x1] %vm3_vm0, %v2_v15   ;;  %vm45_vm7 = vcmask 654912   ;;  %vm51_vm8 = vcmask 589312   ;;  %vm57_vm9 = vcmask 523712   ;;  %vm63_vm10 = vcmask 458112  }
   0xa   :  { %13 = vrot.lane.b32.xlu0 %v102_v3, %s134_s19  ;;  %25 = vrot.lane.b32.xlu1 %v104_v4, %s135_s20  ;;  %vm69_vm11 = vcmask 392512   ;;  %vm75_vm12 = vcmask 326912   ;;  %vm81_vm13 = vcmask 261312   ;;  %vm87_vm14 = vcmask 195712  }
   0xb   :  { %37 = vrot.lane.b32.xlu2 %v106_v5, %s136_s23  ;;  %vm93_vm15 = vcmask 130112  }
  0x12   :  { %43 = vrot.lane.b32.xlu0 %v107_v6, %s137_s28  ;;  %49 = vrot.lane.b32.xlu1 %v108_v7, %s138_s29 }
  0x13   :  { %55 = vrot.lane.b32.xlu2 %v109_v8, %s139_s3 }
  0x1a   :  { %61 = vrot.lane.b32.xlu0 %v110_v9, %s140_s8  ;;  %67 = vrot.lane.b32.xlu1 %v111_v10, %s141_s9 }
  0x1b   :  { %73 = vrot.lane.b32.xlu2 %v112_v11, %s142_s12 }
  0x22   :  { %79 = vrot.lane.b32.xlu0 %v113_v12, %s143_s17  ;;  %85 = vrot.lane.b32.xlu1 %v114_v13, %s144_s18 }
  0x23   :  { %91 = vrot.lane.b32.xlu2 %v115_v14, %s145_s21 }
  0x5d   :  { %v32_v16 = vpop.permute.xlu2 %31  }
  0x65   :  { %v38_v17 = vpop.permute.xlu2 %37  }
  0x6d   :  { %v56_v18 = vpop.permute.xlu2 %55  }
  0x74   :  { %v8_v19 = vpop.permute.xlu0 %7   ;;  %v20_v20 = vpop.permute.xlu1 %19  }
  0x75   :  { %10 = vst.msk [vmem:[#allocation0] sm:$0x1] %vm9_vm1, %v8_v19   ;;  %v74_v21 = vpop.permute.xlu2 %73  }
  0x7c   :  { %v14_v22 = vpop.permute.xlu0 %13   ;;  %v26_v23 = vpop.permute.xlu1 %25  }
  0x7d   :  { %16 = vst.msk [vmem:[#allocation0] sm:$0x1] %vm15_vm2, %v14_v22   ;;  %v92_v24 = vpop.permute.xlu2 %91  }
  0x7e   :  { %22 = vst.msk [vmem:[#allocation0] sm:$0x1] %vm21_vm3, %v20_v20  }
  0x7f   :  { %28 = vst.msk [vmem:[#allocation0] sm:$0x1] %vm27_vm4, %v26_v23  }
  0x80   :  { %34 = vst.msk [vmem:[#allocation0] sm:$0x1] %vm33_vm5, %v32_v16  }
  0x81   :  { %40 = vst.msk [vmem:[#allocation0] sm:$0x1] %vm39_vm6, %v38_v17  }
  0x84   :  { %v44_v25 = vpop.permute.xlu0 %43   ;;  %v50_v26 = vpop.permute.xlu1 %49  }
  0x85   :  { %46 = vst.msk [vmem:[#allocation0] sm:$0x1] %vm45_vm7, %v44_v25  }
  0x86   :  { %52 = vst.msk [vmem:[#allocation0] sm:$0x1] %vm51_vm8, %v50_v26  }
  0x87   :  { %58 = vst.msk [vmem:[#allocation0] sm:$0x1] %vm57_vm9, %v56_v18  }
  0x8c   :  { %v62_v27 = vpop.permute.xlu0 %61   ;;  %v68_v28 = vpop.permute.xlu1 %67  }
  0x8d   :  { %64 = vst.msk [vmem:[#allocation0] sm:$0x1] %vm63_vm10, %v62_v27  }
  0x8e   :  { %70 = vst.msk [vmem:[#allocation0] sm:$0x1] %vm69_vm11, %v68_v28  }
  0x8f   :  { %76 = vst.msk [vmem:[#allocation0] sm:$0x1] %vm75_vm12, %v74_v21  }
  0x94   :  { %v80_v29 = vpop.permute.xlu0 %79   ;;  %v86_v30 = vpop.permute.xlu1 %85  }
  0x95   :  { %82 = vst.msk [vmem:[#allocation0] sm:$0x1] %vm81_vm13, %v80_v29  }
  0x96   :  { %88 = vst.msk [vmem:[#allocation0] sm:$0x1] %vm87_vm14, %v86_v30  }
  0x97   :  { %94 = vst.msk [vmem:[#allocation0] sm:$0x1] %vm93_vm15, %v92_v24  }
  0x9e   :  { %v97_v31 = vld [vmem:[#allocation0] sm:$0x1] }
  0x9f   :  { %100 = vst [vmem:[%s208_s1] sm:$0x1] %v97_v31 }

// kernel: decoder_forward.4
= control target key start
LH: loop header
LB: loop body
LE: loop exit
PB: predicated region body
PF: predicated region fallthrough
CT: control target
= control target key end

     0   :  { %vm143_vm0 = vcmask 130048   ;;  %s4177_s2 = inlined_call_operand.vmem [shape: f32[128,256], index: 2, kind: input, shape index: {}]   ;;  %s4178_s0 = inlined_call_operand.vmem [shape: f32[16,128], index: 0, kind: input, shape index: {}]   ;;  %s4179_s1 = inlined_call_operand.vmem [shape: f32[32,16], index: 1, kind: input, shape index: {}]   ;;  %s4180_s3 = inlined_call_operand.vmem [shape: f32[256,128], index: 3, kind: input, shape index: {}]   ;;  %s4181_s4 = inlined_call_operand.vmem [shape: f32[1,128], index: 4, kind: input, shape index: {}]   ;;  %s4182_s6 = inlined_call_operand.vmem [shape: f32[128,128], index: 6, kind: input, shape index: {}]   ;;  %s4183_s5 = inlined_call_operand.vmem [shape: f32[128,128], index: 5, kind: input, shape index: {}]   ;;  %s4184_s7 = inlined_call_operand.vmem [shape: f32[128,128], index: 7, kind: input, shape index: {}]   ;;  %s4185_s8 = inlined_call_operand.vmem [shape: f32[1,128], index: 8, kind: input, shape index: {}]   ;;  %s4186_s10 = inlined_call_operand.vmem [shape: f32[128,128], index: 10, kind: input, shape index: {}]   ;;  %s4187_s9 = inlined_call_operand.vmem [shape: f32[128,128], index: 9, kind: input, shape index: {}]   ;;  %s4188_s11 = inlined_call_operand.vmem [shape: f32[128,128], index: 11, kind: input, shape index: {}]   ;;  %s4189_s12 = inlined_call_operand.vmem [shape: f32[1,128], index: 12, kind: input, shape index: {}]   ;;  %s4190_s13 = inlined_call_operand.vmem [shape: f32[128,256], index: 13, kind: input, shape index: {}]   ;;  %s4191_s17 = inlined_call_operand.vmem [shape: f32[256,256], index: 17, kind: input, shape index: {}]   ;;  %s4192_s14 = inlined_call_operand.vmem [shape: f32[1,256], index: 14, kind: input, shape index: {}]   ;;  %s4193_s15 = inlined_call_operand.vmem [shape: f32[1,256], index: 15, kind: input, shape index: {}]   ;;  %s4194_s16 = inlined_call_operand.vmem [shape: f32[1,256], index: 16, kind: input, shape index: {}]   ;;  %s4195_s18 = inlined_call_operand.vmem [shape: f32[32,256], index: 18, kind: output, shape index: {}]  }
   0x1   :  { %4207 = sst [smem:[#allocation11_spill]] %s4177_s2  ;;  %v290_v39 = vld [vmem:[%s4180_s3 + $0x78] sm:$0xff]  ;;  %v289_v41 = vld [vmem:[%s4180_s3 + $0x70] sm:$0xff]  ;;  %v288_v43 = vld [vmem:[%s4180_s3 + $0x68] sm:$0xff] }
   0x2   :  { %4208 = sst [smem:[#allocation12_spill]] %s4178_s0  ;;  %v306_v40 = vld [vmem:[%s4180_s3 + $0xf8] sm:$0xff]  ;;  %v305_v42 = vld [vmem:[%s4180_s3 + $0xf0] sm:$0xff]  ;;  %v304_v44 = vld [vmem:[%s4180_s3 + $0xe8] sm:$0xff] }
   0x3   :  { %4209 = sst [smem:[#allocation13_spill]] %s4179_s1  ;;  %v287_v45 = vld [vmem:[%s4180_s3 + $0x60] sm:$0xff]  ;;  %v286_v48 = vld [vmem:[%s4180_s3 + $0x58] sm:$0xff]  ;;  %v285_v50 = vld [vmem:[%s4180_s3 + $0x50] sm:$0xff] }
   0x4   :  { %s4210_s29 = sld [smem:[#allocation11_spill]]  ;;  %v303_v46 = vld [vmem:[%s4180_s3 + $0xe0] sm:$0xff]  ;;  %v302_v49 = vld [vmem:[%s4180_s3 + $0xd8] sm:$0xff]  ;;  %v301_v51 = vld [vmem:[%s4180_s3 + $0xd0] sm:$0xff] }
   0x5   :  { %s4211_s23 = sld [smem:[#allocation12_spill]]  ;;  %v284_v52 = vld [vmem:[%s4180_s3 + $0x48] sm:$0xff]  ;;  %v283_v54 = vld [vmem:[%s4180_s3 + $0x40] sm:$0xff]  ;;  %v282_v57 = vld [vmem:[%s4180_s3 + $0x38] sm:$0xff] }
   0x6   :  { %s4212_s27 = sld [smem:[#allocation13_spill]]  ;;  %v300_v53 = vld [vmem:[%s4180_s3 + $0xc8] sm:$0xff]  ;;  %v299_v55 = vld [vmem:[%s4180_s3 + $0xc0] sm:$0xff]  ;;  %v298_v58 = vld [vmem:[%s4180_s3 + $0xb8] sm:$0xff] }
   0x7   :  { %v281_v59 = vld [vmem:[%s4180_s3 + $0x30] sm:$0xff]  ;;  %v280_v61 = vld [vmem:[%s4180_s3 + $0x28] sm:$0xff]  ;;  %v279_v63 = vld [vmem:[%s4180_s3 + $0x20] sm:$0xff] }
   0x8   :  { %v297_v60 = vld [vmem:[%s4180_s3 + $0xb0] sm:$0xff]  ;;  %v296_v62 = vld [vmem:[%s4180_s3 + $0xa8] sm:$0xff] }
   0xa   :  { %v95_v0 = vld [vmem:[%s4210_s29 + $0xf0] sm:$0xff]  ;;  %v96_v1 = vld [vmem:[%s4210_s29 + $0xf8] sm:$0xff]  ;;  %v93_v2 = vld [vmem:[%s4210_s29 + $0xe0] sm:$0xff] }
   0xb   :  { %97 = vmatpush.msra.mxu0 %v95_v0  ;;  %120 = vmatpush.msra.mxu1 %v96_v1  ;;  %v94_v3 = vld [vmem:[%s4210_s29 + $0xe8] sm:$0xff]  ;;  %v91_v4 = vld [vmem:[%s4210_s29 + $0xd0] sm:$0xff]  ;;  %v92_v5 = vld [vmem:[%s4210_s29 + $0xd8] sm:$0xff] }
   0xc   :  { %v89_v6 = vld [vmem:[%s4210_s29 + $0xc0] sm:$0xff]  ;;  %v90_v7 = vld [vmem:[%s4210_s29 + $0xc8] sm:$0xff]  ;;  %v87_v8 = vld [vmem:[%s4210_s29 + $0xb0] sm:$0xff] }
   0xd   :  { %98 = vmatpush.msra.mxu0 %v93_v2  ;;  %121 = vmatpush.msra.mxu1 %v94_v3  ;;  %v88_v9 = vld [vmem:[%s4210_s29 + $0xb8] sm:$0xff]  ;;  %v85_v10 = vld [vmem:[%s4210_s29 + $0xa0] sm:$0xff]  ;;  %v86_v11 = vld [vmem:[%s4210_s29 + $0xa8] sm:$0xff] }
   0xe   :  { %v83_v12 = vld [vmem:[%s4210_s29 + $0x90] sm:$0xff]  ;;  %v84_v13 = vld [vmem:[%s4210_s29 + $0x98] sm:$0xff]  ;;  %v81_v14 = vld [vmem:[%s4210_s29 + $0x80] sm:$0xff] }
   0xf   :  { %99 = vmatpush.msra.mxu0 %v91_v4  ;;  %122 = vmatpush.msra.mxu1 %v92_v5  ;;  %v82_v15 = vld [vmem:[%s4210_s29 + $0x88] sm:$0xff]  ;;  %v79_v16 = vld [vmem:[%s4210_s29 + $0x70] sm:$0xff]  ;;  %v80_v17 = vld [vmem:[%s4210_s29 + $0x78] sm:$0xff] }
  0x10   :  { %v77_v18 = vld [vmem:[%s4210_s29 + $0x60] sm:$0xff]  ;;  %v78_v19 = vld [vmem:[%s4210_s29 + $0x68] sm:$0xff]  ;;  %v75_v20 = vld [vmem:[%s4210_s29 + $0x50] sm:$0xff] }
  0x11   :  { %100 = vmatpush.msra.mxu0 %v89_v6  ;;  %123 = vmatpush.msra.mxu1 %v90_v7  ;;  %v76_v21 = vld [vmem:[%s4210_s29 + $0x58] sm:$0xff]  ;;  %v73_v22 = vld [vmem:[%s4210_s29 + $0x40] sm:$0xff]  ;;  %v74_v23 = vld [vmem:[%s4210_s29 + $0x48] sm:$0xff] }
  0x12   :  { %v71_v24 = vld [vmem:[%s4210_s29 + $0x30] sm:$0xff]  ;;  %v72_v25 = vld [vmem:[%s4210_s29 + $0x38] sm:$0xff]  ;;  %v69_v26 = vld [vmem:[%s4210_s29 + $0x20] sm:$0xff] }
  0x13   :  { %101 = vmatpush.msra.mxu0 %v87_v8  ;;  %124 = vmatpush.msra.mxu1 %v88_v9  ;;  %v70_v27 = vld [vmem:[%s4210_s29 + $0x28] sm:$0xff]  ;;  %v67_v28 = vld [vmem:[%s4210_s29 + $0x10] sm:$0xff]  ;;  %v68_v29 = vld [vmem:[%s4210_s29 + $0x18] sm:$0xff] }
  0x14   :  { %v65_v30 = vld [vmem:[%s4210_s29] sm:$0xff]  ;;  %v66_v31 = vld [vmem:[%s4210_s29 + $0x8] sm:$0xff]  ;;  %v63_v56 = vld [vmem:[%s4212_s27 + $0x10] sm:$0xff] }
  0x15   :  { %102 = vmatpush.msra.mxu0 %v85_v10  ;;  %125 = vmatpush.msra.mxu1 %v86_v11  ;;  %v59_v32 = vld [vmem:[%s4211_s23] sm:$0xff]  ;;  %v60_v33 = vld [vmem:[%s4211_s23 + $0x8] sm:$0xff]  ;;  %v64_v1 = vld [vmem:[%s4212_s27 + $0x18] sm:$0xff] }
  0x16   :  { %v61_v38 = vld [vmem:[%s4212_s27] sm:$0xff]  ;;  %v62_v47 = vld [vmem:[%s4212_s27 + $0x8] sm:$0xff]  ;;  %v278_v2 = vld [vmem:[%s4180_s3 + $0x18] sm:$0xff] }
  0x17   :  { %103 = vmatpush.msra.mxu0 %v83_v12  ;;  %126 = vmatpush.msra.mxu1 %v84_v13  ;;  %v295_v0 = vld [vmem:[%s4180_s3 + $0xa0] sm:$0xff]  ;;  %v294_v3 = vld [vmem:[%s4180_s3 + $0x98] sm:$0xff]  ;;  %v277_v4 = vld [vmem:[%s4180_s3 + $0x10] sm:$0xff] }
  0x18   :  { %v293_v5 = vld [vmem:[%s4180_s3 + $0x90] sm:$0xff]  ;;  %v276_v6 = vld [vmem:[%s4180_s3 + $0x8] sm:$0xff]  ;;  %v275_v8 = vld [vmem:[%s4180_s3] sm:$0xff] }
  0x19   :  { %104 = vmatpush.msra.mxu0 %v81_v14  ;;  %127 = vmatpush.msra.mxu1 %v82_v15  ;;  %v292_v7 = vld [vmem:[%s4180_s3 + $0x88] sm:$0xff]  ;;  %v291_v9 = vld [vmem:[%s4180_s3 + $0x80] sm:$0xff] }
  0x1b   :  { %105 = vmatpush.msra.mxu0 %v79_v16  ;;  %128 = vmatpush.msra.mxu1 %v80_v17 }
  0x1d   :  { %106 = vmatpush.msra.mxu0 %v77_v18  ;;  %129 = vmatpush.msra.mxu1 %v78_v19  ;;  %v572_v18 = vld [vmem:[%s4182_s6 + $0x78] sm:$0xff]  ;;  %v571_v19 = vld [vmem:[%s4182_s6 + $0x70] sm:$0xff] }
  0x1f   :  { %107 = vmatpush.msra.mxu0 %v75_v20  ;;  %130 = vmatpush.msra.mxu1 %v76_v21  ;;  %v2541_v20 = vld [vmem:[%s4181_s4] ss:$0 sm:$0xff]  ;;  %v570_v21 = vld [vmem:[%s4182_s6 + $0x68] sm:$0xff] }
  0x21   :  { %108 = vmatpush.msra.mxu0 %v73_v22  ;;  %131 = vmatpush.msra.mxu1 %v74_v23 }
  0x23   :  { %109 = vmatpush.msra.mxu0 %v71_v24  ;;  %132 = vmatpush.msra.mxu1 %v72_v25  ;;  %v569_v24 = vld [vmem:[%s4182_s6 + $0x60] sm:$0xff] }
  0x25   :  { %110 = vmatpush.msra.mxu0 %v69_v26  ;;  %133 = vmatpush.msra.mxu1 %v70_v27  ;;  %v592_v26 = vld [vmem:[%s4183_s5 + $0x78] sm:$0xff] }
  0x26   :  { %v568_v27 = vld [vmem:[%s4182_s6 + $0x58] sm:$0xff] }
  0x27   :  { %111 = vmatpush.msra.mxu0 %v67_v28  ;;  %134 = vmatpush.msra.mxu1 %v68_v29  ;;  %v591_v29 = vld [vmem:[%s4183_s5 + $0x70] sm:$0xff] }
  0x29   :  { %112 = vmatpush.msra.mxu0 %v65_v30  ;;  %135 = vmatpush.msra.mxu1 %v66_v31  ;;  %v567_v30 = vld [vmem:[%s4182_s6 + $0x50] sm:$0xff] }
  0x2a   :  { %113 = vmatmul.f32.vlgmr.msra.gmra.mxu0 %v59_v32  ;;  %136 = vmatmul.f32.vlgmr.msra.gmra.mxu1 %v59_v32  ;;  %v590_v32 = vld [vmem:[%s4183_s5 + $0x68] sm:$0xff] }
  0x2b   :  { %622 = vmatpush.msrb.mxu1 %v572_v18  ;;  %593 = vmatpush.msrb.mxu0 %v592_v26  ;;  %v664_v26 = vld [vmem:[%s4184_s7 + $0x48] sm:$0xff] }
  0x2d   :  { %623 = vmatpush.msrb.mxu1 %v571_v19  ;;  %594 = vmatpush.msrb.mxu0 %v591_v29  ;;  %v665_v19 = vld [vmem:[%s4184_s7 + $0x50] sm:$0xff] }
  0x2f   :  { %624 = vmatpush.msrb.mxu1 %v570_v21  ;;  %595 = vmatpush.msrb.mxu0 %v590_v32  ;;  %v583_v21 = vld [vmem:[%s4183_s5 + $0x30] sm:$0xff]  ;;  %v558_v32 = vld [vmem:[%s4182_s6 + $0x8] sm:$0xff] }
  0x31   :  { %625 = vmatpush.msrb.mxu1 %v569_v24 }
  0x32   :  { %116 = vmatmul.f32.gmra.mxu0 %v60_v33  ;;  %139 = vmatmul.f32.gmra.mxu1 %v60_v33  ;;  %v566_v33 = vld [vmem:[%s4182_s6 + $0x48] sm:$0xff] }
  0x33   :  { %626 = vmatpush.msrb.mxu1 %v568_v27  ;;  %v582_v27 = vld [vmem:[%s4183_s5 + $0x28] sm:$0xff] }
  0x35   :  { %627 = vmatpush.msrb.mxu1 %v567_v30 }
  0x37   :  { %628 = vmatpush.msrb.mxu1 %v566_v33 }
  0xa7   :  { %v114_v34 = vpop.f32.mrf.mxu0  ;;  %v137_v35 = vpop.f32.mrf.mxu1 }
  0xaf   :  { %v117_v36 = vpop.f32.mrf.mxu0  ;;  %v140_v37 = vpop.f32.mrf.mxu1 }
  0xb0   :  { %170 = vmatpush.msra.mxu2 %v117_v36  ;;  %199 = vmatpush.msra.mxu3 %v140_v37  ;;  %v589_v37 = vld [vmem:[%s4183_s5 + $0x60] sm:$0xff] }
  0xb1   :  { %596 = vmatpush.msrb.mxu0 %v589_v37  ;;  %v581_v37 = vld [vmem:[%s4183_s5 + $0x20] sm:$0xff] }
  0xb2   :  { %171 = vmatpush.msra.mxu2 %v114_v34  ;;  %200 = vmatpush.msra.mxu3 %v137_v35 }
  0xb3   :  { %2112 = vmatmul.msk.f32.vlgmr.msra.gmra.mxu2 %vm143_vm0, %v61_v38  ;;  %2116 = vmatmul.msk.f32.vlgmr.msra.gmra.mxu3 %vm143_vm0, %v61_v38  ;;  %v565_v38 = vld [vmem:[%s4182_s6 + $0x40] sm:$0xff] }
  0xb4   :  { %311 = vmatpush.msrb.mxu2 %v290_v39  ;;  %340 = vmatpush.msrb.mxu3 %v306_v40 }
  0xb5   :  { %629 = vmatpush.msrb.mxu1 %v565_v38  ;;  %v557_v38 = vld [vmem:[%s4182_s6] sm:$0xff] }
  0xb6   :  { %312 = vmatpush.msrb.mxu2 %v289_v41  ;;  %341 = vmatpush.msrb.mxu3 %v305_v42  ;;  %v670_v41 = vld [vmem:[%s4184_s7 + $0x78] sm:$0xff] }
  0xb7   :  { %v588_v42 = vld [vmem:[%s4183_s5 + $0x58] sm:$0xff] }
  0xb8   :  { %313 = vmatpush.msrb.mxu2 %v288_v43  ;;  %342 = vmatpush.msrb.mxu3 %v304_v44  ;;  %v564_v43 = vld [vmem:[%s4182_s6 + $0x38] sm:$0xff] }
  0xb9   :  { %597 = vmatpush.msrb.mxu0 %v588_v42  ;;  %630 = vmatpush.msrb.mxu1 %v564_v43  ;;  %v662_v43 = vld [vmem:[%s4184_s7 + $0x38] sm:$0xff] }
  0xba   :  { %314 = vmatpush.msrb.mxu2 %v287_v45  ;;  %343 = vmatpush.msrb.mxu3 %v303_v46 }
  0xbb   :  { %2113 = vmatmul.msk.f32.gmra.mxu2 %vm143_vm0, %v62_v47  ;;  %2117 = vmatmul.msk.f32.gmra.mxu3 %vm143_vm0, %v62_v47  ;;  %v669_v47 = vld [vmem:[%s4184_s7 + $0x70] sm:$0xff] }
  0xbc   :  { %315 = vmatpush.msrb.mxu2 %v286_v48  ;;  %344 = vmatpush.msrb.mxu3 %v302_v49  ;;  %v587_v48 = vld [vmem:[%s4183_s5 + $0x50] sm:$0xff] }
  0xbd   :  { %v563_v49 = vld [vmem:[%s4182_s6 + $0x30] sm:$0xff]  ;;  %598 = vmatpush.msrb.mxu0 %v587_v48 }
  0xbe   :  { %316 = vmatpush.msrb.mxu2 %v285_v50  ;;  %345 = vmatpush.msrb.mxu3 %v301_v51  ;;  %v661_v48 = vld [vmem:[%s4184_s7 + $0x30] sm:$0xff] }
  0xbf   :  { %631 = vmatpush.msrb.mxu1 %v563_v49 }
  0xc0   :  { %317 = vmatpush.msrb.mxu2 %v284_v52  ;;  %346 = vmatpush.msrb.mxu3 %v300_v53  ;;  %v668_v53 = vld [vmem:[%s4184_s7 + $0x68] sm:$0xff] }
  0xc2   :  { %318 = vmatpush.msrb.mxu2 %v283_v54  ;;  %347 = vmatpush.msrb.mxu3 %v299_v55  ;;  %v586_v54 = vld [vmem:[%s4183_s5 + $0x48] sm:$0xff] }
  0xc3   :  { %2114 = vmatmul.msk.f32.gmra.mxu2 %vm143_vm0, %v63_v56  ;;  %2118 = vmatmul.msk.f32.gmra.mxu3 %vm143_vm0, %v63_v56  ;;  %v562_v55 = vld [vmem:[%s4182_s6 + $0x28] sm:$0xff] }
  0xc4   :  { %319 = vmatpush.msrb.mxu2 %v282_v57  ;;  %348 = vmatpush.msrb.mxu3 %v298_v58 }
  0xc5   :  { %599 = vmatpush.msrb.mxu0 %v586_v54  ;;  %632 = vmatpush.msrb.mxu1 %v562_v55  ;;  %v660_v54 = vld [vmem:[%s4184_s7 + $0x28] sm:$0xff] }
  0xc6   :  { %320 = vmatpush.msrb.mxu2 %v281_v59  ;;  %349 = vmatpush.msrb.mxu3 %v297_v60  ;;  %v578_v55 = vld [vmem:[%s4183_s5 + $0x8] sm:$0xff] }
  0xc8   :  { %321 = vmatpush.msrb.mxu2 %v280_v61  ;;  %350 = vmatpush.msrb.mxu3 %v296_v62  ;;  %v667_v61 = vld [vmem:[%s4184_s7 + $0x60] sm:$0xff] }
  0xc9   :  { %v585_v62 = vld [vmem:[%s4183_s5 + $0x40] sm:$0xff] }
  0xca   :  { %322 = vmatpush.msrb.mxu2 %v279_v63  ;;  %351 = vmatpush.msrb.mxu3 %v295_v0  ;;  %v561_v63 = vld [vmem:[%s4182_s6 + $0x20] sm:$0xff] }
  0xcb   :  { %2115 = vmatmul.msk.f32.gmra.mxu2 %vm143_vm0, %v64_v1  ;;  %2119 = vmatmul.msk.f32.gmra.mxu3 %vm143_vm0, %v64_v1 }
  0xcc   :  { %323 = vmatpush.msrb.mxu2 %v278_v2  ;;  %352 = vmatpush.msrb.mxu3 %v294_v3 }
  0xcd   :  { %600 = vmatpush.msrb.mxu0 %v585_v62  ;;  %633 = vmatpush.msrb.mxu1 %v561_v63  ;;  %v659_v62 = vld [vmem:[%s4184_s7 + $0x20] sm:$0xff] }
  0xce   :  { %324 = vmatpush.msrb.mxu2 %v277_v4  ;;  %353 = vmatpush.msrb.mxu3 %v293_v5  ;;  %v666_v4 = vld [vmem:[%s4184_s7 + $0x58] sm:$0xff]  ;;  %v577_v63 = vld [vmem:[%s4183_s5] sm:$0xff] }
  0xcf   :  { %v584_v5 = vld [vmem:[%s4183_s5 + $0x38] sm:$0xff] }
  0xd0   :  { %325 = vmatpush.msrb.mxu2 %v276_v6  ;;  %354 = vmatpush.msrb.mxu3 %v292_v7  ;;  %v560_v6 = vld [vmem:[%s4182_s6 + $0x18] sm:$0xff] }
  0xd1   :  { %601 = vmatpush.msrb.mxu0 %v584_v5  ;;  %634 = vmatpush.msrb.mxu1 %v560_v6 }
  0xd2   :  { %326 = vmatpush.msrb.mxu2 %v275_v8  ;;  %355 = vmatpush.msrb.mxu3 %v291_v9 }
  0xd3   :  { %602 = vmatpush.msrb.mxu0 %v583_v21 }
  0xd4   :  { %671 = vmatpush.msra.mxu2 %v670_v41 }
  0xd5   :  { %603 = vmatpush.msrb.mxu0 %v582_v27 }
  0xd6   :  { %672 = vmatpush.msra.mxu2 %v669_v47 }
  0xd7   :  { %604 = vmatpush.msrb.mxu0 %v581_v37 }
  0xd8   :  { %673 = vmatpush.msra.mxu2 %v668_v53 }
  0xda   :  { %674 = vmatpush.msra.mxu2 %v667_v61 }
  0xdc   :  { %675 = vmatpush.msra.mxu2 %v666_v4 }
  0xde   :  { %676 = vmatpush.msra.mxu2 %v665_v19 }
  0xe0   :  { %677 = vmatpush.msra.mxu2 %v664_v26 }
 0x136   :  { %v2508_v10 = vpop.f32.mrf.mxu2  ;;  %v2510_v11 = vpop.f32.mrf.mxu3 }
 0x137   :  { %327 = vmatmul.f32.vlgmr.msrb.gmra.mxu2 %v2508_v10  ;;  %356 = vmatmul.f32.vlgmr.msrb.gmra.mxu3 %v2510_v11 }
 0x13e   :  { %v2514_v12 = vpop.f32.mrf.mxu2  ;;  %v2516_v13 = vpop.f32.mrf.mxu3 }
 0x13f   :  { %4213 = vst [vmem:[#allocation3_spill] sm:$0xff] %v2514_v12  ;;  %330 = vmatmul.f32.gmra.mxu2 %v2514_v12  ;;  %359 = vmatmul.f32.gmra.mxu3 %v2516_v13  ;;  %v3650_v12 = vld [vmem:[%s4191_s17 + $0x108] sm:$0xff] }
 0x140   :  { %4214 = vst [vmem:[#allocation4_spill] sm:$0xff] %v2516_v13  ;;  %v3645_v13 = vld [vmem:[%s4191_s17 + $0x8] sm:$0xff] }
 0x146   :  { %v2520_v14 = vpop.f32.mrf.mxu2  ;;  %v2522_v15 = vpop.f32.mrf.mxu3 }
 0x147   :  { %4215 = vst [vmem:[#allocation5_spill] sm:$0xff] %v2520_v14  ;;  %333 = vmatmul.f32.gmra.mxu2 %v2520_v14  ;;  %362 = vmatmul.f32.gmra.mxu3 %v2522_v15  ;;  %v3611_v14 = vld [vmem:[%s4191_s17 + $0x20] sm:$0xff] }
 0x148   :  { %4216 = vst [vmem:[#allocation6_spill] sm:$0xff] %v2522_v15 }
 0x14e   :  { %v2526_v16 = vpop.f32.mrf.mxu2  ;;  %v2528_v17 = vpop.f32.mrf.mxu3 }
 0x14f   :  { %4217 = vst [vmem:[#allocation7_spill] sm:$0xff] %v2526_v16  ;;  %336 = vmatmul.f32.gmra.mxu2 %v2526_v16  ;;  %365 = vmatmul.f32.gmra.mxu3 %v2528_v17 }
 0x150   :  { %4218 = vst [vmem:[#allocation8_spill] sm:$0xff] %v2528_v17  ;;  %v3599_v17 = vld [vmem:[%s4191_s17 + $0x128] sm:$0xff] }
 0x1ba   :  { %v328_v22 = vpop.f32.mrf.mxu2  ;;  %v357_v23 = vpop.f32.mrf.mxu3 }
 0x1bb   :  { %v329_v25 = vadd.f32 %v2541_v20, %v328_v22  ;;  %v559_v22 = vld [vmem:[%s4182_s6 + $0x10] sm:$0xff] }
 0x1bc   :  { %635 = vmatpush.msrb.mxu1 %v559_v22 }
 0x1bd   :  { %v2556_v28 = vadd.f32 %v357_v23, %v329_v25 }
 0x1be   :  { %636 = vmatpush.msrb.mxu1 %v558_v32 }
 0x1bf   :  { %v2565_v31 = vmul.f32 0.70710677, %v2556_v28 }
 0x1c0   :  { %637 = vmatpush.msrb.mxu1 %v557_v38  ;;  %v658_v38 = vld [vmem:[%s4184_s7 + $0x18] sm:$0xff] }
 0x1c1   :  { %v377_v34 = vmul.f32 %v2565_v31, %v2565_v31 }
 0x1c2   :  { %v331_v35 = vpop.f32.mrf.mxu2  ;;  %v360_v36 = vpop.f32.mrf.mxu3 }
 0x1c3   :  { %v2581_v39 = vmin.f32 %v377_v34, 16.0  ;;  %v332_v40 = vadd.f32 %v2541_v20, %v331_v35 }
 0x1c5   :  { %v379_v44 = vmul.f32 2.1237322e-06, %v2581_v39  ;;  %v390_v45 = vmul.f32 3.8918573e-05, %v2581_v39  ;;  %v2595_v46 = vadd.f32 %v360_v36, %v332_v40  ;;  %v663_v36 = vld [vmem:[%s4184_s7 + $0x40] sm:$0xff] }
 0x1c6   :  { %678 = vmatpush.msra.mxu2 %v663_v36 }
 0x1c7   :  { %v380_v50 = vadd.f32 0.00028619796, %v379_v44  ;;  %v391_v51 = vadd.f32 0.001143296, %v390_v45  ;;  %v2607_v52 = vmul.f32 0.70710677, %v2595_v46 }
 0x1c8   :  { %v580_v44 = vld [vmem:[%s4183_s5 + $0x18] sm:$0xff]  ;;  %679 = vmatpush.msra.mxu2 %v662_v43 }
 0x1c9   :  { %v381_v56 = vmul.f32 %v380_v50, %v2581_v39  ;;  %v392_v57 = vmul.f32 %v391_v51, %v2581_v39  ;;  %v417_v58 = vmul.f32 %v2607_v52, %v2607_v52  ;;  %605 = vmatpush.msrb.mxu0 %v580_v44 }
 0x1ca   :  { %v334_v59 = vpop.f32.mrf.mxu2  ;;  %v363_v60 = vpop.f32.mrf.mxu3  ;;  %680 = vmatpush.msra.mxu2 %v661_v48 }
 0x1cb   :  { %v382_v0 = vadd.f32 0.0036580483, %v381_v56  ;;  %v393_v1 = vadd.f32 0.014752088, %v392_v57  ;;  %v335_v2 = vadd.f32 %v2541_v20, %v334_v59  ;;  %v2632_v3 = vmin.f32 %v417_v58, 16.0 }
 0x1cc   :  { %681 = vmatpush.msra.mxu2 %v660_v54 }
 0x1cd   :  { %v383_v7 = vmul.f32 %v382_v0, %v2581_v39  ;;  %v394_v8 = vmul.f32 %v393_v1, %v2581_v39  ;;  %v2645_v9 = vadd.f32 %v363_v60, %v335_v2  ;;  %v419_v18 = vmul.f32 2.1237322e-06, %v2632_v3 }
 0x1ce   :  { %v430_v40 = vmul.f32 3.8918573e-05, %v2632_v3  ;;  %682 = vmatpush.msra.mxu2 %v659_v62 }
 0x1cf   :  { %v395_v23 = vadd.f32 0.112945676, %v394_v8  ;;  %v384_v24 = vadd.f32 0.05243302, %v383_v7  ;;  %v2658_v25 = vmul.f32 0.70710677, %v2645_v9 }
 0x1d0   :  { %v420_v30 = vadd.f32 0.00028619796, %v419_v18  ;;  %v431_v56 = vadd.f32 0.001143296, %v430_v40  ;;  %v657_v40 = vld [vmem:[%s4184_s7 + $0x10] sm:$0xff]  ;;  %683 = vmatpush.msra.mxu2 %v658_v38 }
 0x1d1   :  { %v396_v29 = vmul.f32 %v395_v23, %v2581_v39  ;;  %v457_v33 = vmul.f32 %v2658_v25, %v2658_v25  ;;  %v385_v45 = vmul.f32 %v384_v24, %v2581_v39 }
 0x1d2   :  { %v337_v34 = vpop.f32.mrf.mxu2  ;;  %v366_v35 = vpop.f32.mrf.mxu3  ;;  %v421_v51 = vmul.f32 %v420_v30, %v2632_v3  ;;  %v432_v0 = vmul.f32 %v431_v56, %v2632_v3  ;;  %684 = vmatpush.msra.mxu2 %v657_v40 }
 0x1d3   :  { %v397_v41 = vadd.f32 0.4994258, %v396_v29  ;;  %v338_v42 = vadd.f32 %v2541_v20, %v337_v34  ;;  %v2690_v47 = vmin.f32 %v457_v33, 16.0  ;;  %v579_v20 = vld [vmem:[%s4183_s5 + $0x10] sm:$0xff]  ;;  %v386_v60 = vadd.f32 0.18741608, %v385_v45 }
 0x1d4   :  { %606 = vmatpush.msrb.mxu0 %v579_v20  ;;  %v422_v1 = vadd.f32 0.0036580483, %v421_v51  ;;  %v433_v4 = vadd.f32 0.014752088, %v432_v0 }
 0x1d5   :  { %v398_v49 = vmul.f32 %v397_v41, %v2581_v39  ;;  %v2699_v50 = vadd.f32 %v366_v35, %v338_v42  ;;  %v459_v53 = vmul.f32 2.1237322e-06, %v2690_v47  ;;  %v470_v59 = vmul.f32 3.8918573e-05, %v2690_v47 }
 0x1d6   :  { %607 = vmatpush.msrb.mxu0 %v578_v55  ;;  %v387_v6 = vmul.f32 %v386_v60, %v2581_v39  ;;  %v434_v18 = vmul.f32 %v433_v4, %v2632_v3  ;;  %v423_v21 = vmul.f32 %v422_v1, %v2632_v3 }
 0x1d7   :  { %v2709_v57 = vadd.f32 1.0, %v398_v49  ;;  %v2712_v58 = vmul.f32 0.70710677, %v2699_v50  ;;  %v460_v61 = vadd.f32 0.00028619796, %v459_v53  ;;  %v656_v49 = vld [vmem:[%s4184_s7 + $0x8] sm:$0xff] }
 0x1d8   :  { %608 = vmatpush.msrb.mxu0 %v577_v63  ;;  %v471_v5 = vadd.f32 0.001143296, %v470_v59  ;;  %v435_v26 = vadd.f32 0.112945676, %v434_v18  ;;  %v388_v29 = vadd.f32 1.1283791, %v387_v6  ;;  %685 = vmatpush.msra.mxu2 %v656_v49 }
 0x1d9   :  { %2151 = vrcp.f32 %v2709_v57  ;;  %v497_v2 = vmul.f32 %v2712_v58, %v2712_v58  ;;  %v461_v7 = vmul.f32 %v460_v61, %v2690_v47  ;;  %v424_v37 = vadd.f32 0.05243302, %v423_v21  ;;  %v655_v59 = vld [vmem:[%s4184_s7] sm:$0xff] }
 0x1da   :  { %v472_v19 = vmul.f32 %v471_v5, %v2690_v47  ;;  %v436_v33 = vmul.f32 %v435_v26, %v2632_v3  ;;  %v411_v41 = vand.u32 2147483648, %v2709_v57  ;;  %v409_v48 = vand.u32 2147483647, %v2709_v57  ;;  %686 = vmatpush.msra.mxu2 %v655_v59 }
 0x1db   :  { %v2727_v8 = vmin.f32 %v497_v2, 16.0  ;;  %v462_v30 = vadd.f32 0.0036580483, %v461_v7  ;;  %vm405_vm2 = vweird.f32 %v2709_v57  ;;  %v389_v0 = vmul.f32 %v388_v29, %v2565_v31 }
 0x1dc   :  { %v473_v27 = vadd.f32 0.014752088, %v472_v19  ;;  %v437_v42 = vadd.f32 0.4994258, %v436_v33  ;;  %v412_v60 = vor.u32 1.1754944e-38, %v411_v41  ;;  %vm410_vm4 = vcmp.eq.f32.partialorder %v409_v48, 8.507059e+37 }
 0x1dd   :  { %v499_v22 = vmul.f32 2.1237322e-06, %v2727_v8  ;;  %v510_v23 = vmul.f32 3.8918573e-05, %v2727_v8  ;;  %v463_v20 = vmul.f32 %v462_v30, %v2690_v47  ;;  %v425_v2 = vmul.f32 %v424_v37, %v2632_v3 }
 0x1de   :  { %v474_v34 = vmul.f32 %v473_v27, %v2690_v47  ;;  %v438_v53 = vmul.f32 %v437_v42, %v2632_v3  ;;  %v214_v7 = vlaneseq  ;;  %v369_v27 = vmul.f32 0.5, %v2556_v28 }
 0x1df   :  { %v2152_v24 = vpop.eup %2151  ;;  %v500_v32 = vadd.f32 0.00028619796, %v499_v22  ;;  %v511_v35 = vadd.f32 0.001143296, %v510_v23  ;;  %v464_v5 = vadd.f32 0.05243302, %v463_v20 }
 0x1e0   :  { %v401_v39 = vmul.f32 %v2152_v24, %v2709_v57  ;;  %v475_v43 = vadd.f32 0.112945676, %v474_v34  ;;  %vm406_vm1 = vweird.f32 %v2152_v24  ;;  %v439_v61 = vadd.f32 1.0, %v438_v53 }
 0x1e1   :  { %v512_v44 = vmul.f32 %v511_v35, %v2727_v8  ;;  %v501_v51 = vmul.f32 %v500_v32, %v2727_v8  ;;  %vm407_vm3 = vmor %vm405_vm2, %vm406_vm1  ;;  %v426_v21 = vadd.f32 0.18741608, %v425_v2  ;;  %v465_v23 = vmul.f32 %v464_v5, %v2690_v47 }
 0x1e2   :  { %v402_v36 = vsub.f32 1.0, %v401_v39  ;;  %v476_v54 = vmul.f32 %v475_v43, %v2690_v47  ;;  %2153 = vrcp.f32 %v439_v61  ;;  %v2765_v30 = vshrl.u32 %v214_v7, 7 }
 0x1e3   :  { %v513_v55 = vadd.f32 0.014752088, %v512_v44  ;;  %v502_v57 = vadd.f32 0.0036580483, %v501_v51  ;;  %v427_v32 = vmul.f32 %v426_v21, %v2632_v3  ;;  %v466_v35 = vadd.f32 0.18741608, %v465_v23 }
 0x1e4   :  { %v403_v45 = vmul.f32 %v2152_v24, %v402_v36  ;;  %v477_v62 = vadd.f32 0.4994258, %v476_v54  ;;  %v223_v40 = vand.u32 15, %v2765_v30  ;;  %v451_v41 = vand.u32 2147483648, %v439_v61 }
 0x1e5   :  { %v514_v63 = vmul.f32 %v513_v55, %v2727_v8  ;;  %v503_v31 = vmul.f32 %v502_v57, %v2727_v8  ;;  %v428_v42 = vadd.f32 1.1283791, %v427_v32  ;;  %v449_v44 = vand.u32 2147483647, %v439_v61 }
 0x1e6   :  { %v404_v56 = vadd.f32 %v2152_v24, %v403_v45  ;;  %v478_v18 = vmul.f32 %v477_v62, %v2690_v47  ;;  %v467_v3 = vmul.f32 %v466_v35, %v2690_v47  ;;  %vm445_vm6 = vweird.f32 %v439_v61 }
 0x1e7   :  { %v515_v19 = vadd.f32 0.112945676, %v514_v63  ;;  %v504_v36 = vadd.f32 0.05243302, %v503_v31  ;;  %vm2772_vm7 = vcmp.gt.s32.totalorder %v223_v40, 0  ;;  %v452_v54 = vor.u32 1.1754944e-38, %v451_v41 }
 0x1e8   :  { %v408_v1 = vsel %vm407_vm3, %v2152_v24, %v404_v56  ;;  %v479_v24 = vadd.f32 1.0, %v478_v18  ;;  %v2154_v39 = vpop.eup %2153  ;;  %v429_v55 = vmul.f32 %v428_v42, %v2607_v52  ;;  %vm450_vm9 = vcmp.eq.f32.partialorder %v449_v44, 8.507059e+37 }
 0x1e9   :  { %v413_v4 = vsel %vm410_vm4, %v412_v60, %v408_v1  ;;  %v516_v26 = vmul.f32 %v515_v19, %v2727_v8  ;;  %v441_v34 = vmul.f32 %v2154_v39, %v439_v61  ;;  %vm446_vm5 = vweird.f32 %v2154_v39 }
 0x1ea   :  { %v414_v6 = vmul.f32 %v413_v4, %v389_v0  ;;  %2155 = vrcp.f32 %v479_v24  ;;  %v505_v48 = vmul.f32 %v504_v36, %v2727_v8  ;;  %vm447_vm8 = vmor %vm445_vm6, %vm446_vm5  ;;  %v468_v60 = vadd.f32 1.1283791, %v467_v3 }
 0x1eb   :  { %v517_v37 = vadd.f32 0.4994258, %v516_v26  ;;  %v442_v38 = vsub.f32 1.0, %v441_v34  ;;  %v491_v0 = vand.u32 2147483648, %v479_v24  ;;  %v489_v2 = vand.u32 2147483647, %v479_v24 }
 0x1ec   :  { %v2120_v22 = vclamps-f32 %v414_v6, 1.0  ;;  %v506_v47 = vadd.f32 0.18741608, %v505_v48  ;;  %vm485_vm11 = vweird.f32 %v479_v24  ;;  %v370_v52 = vmul.f32 0.5, %v2595_v46 }
 0x1ed   :  { %v518_v28 = vmul.f32 %v517_v37, %v2727_v8  ;;  %v443_v43 = vmul.f32 %v2154_v39, %v442_v38  ;;  %v469_v6 = vmul.f32 %v468_v60, %v2658_v25  ;;  %v492_v18 = vor.u32 1.1754944e-38, %v491_v0  ;;  %v915_v0 = vld [vmem:[%s4186_s10 + $0x78] sm:$0xff]  ;;  %v1260_v60 = vld [vmem:[%s4190_s13 + $0xe8] sm:$0xff] }
 0x1ee   :  { %v537_v29 = vadd.f32 1.0, %v2120_v22  ;;  %v507_v7 = vmul.f32 %v506_v47, %v2727_v8  ;;  %vm490_vm13 = vcmp.eq.f32.partialorder %v489_v2, 8.507059e+37  ;;  %v371_v8 = vmul.f32 0.5, %v2645_v9  ;;  %965 = vmatpush.msra.mxu0 %v915_v0  ;;  %v2818_v2 = vld [vmem:[%s4185_s8] ss:$0 sm:$0xff] }
 0x1ef   :  { %v519_v20 = vadd.f32 1.0, %v518_v28  ;;  %v444_v49 = vadd.f32 %v2154_v39, %v443_v43  ;;  %v217_v38 = vadd.s32 16, %v2765_v30  ;;  %v216_v28 = vadd.s32 8, %v2765_v30 }
 0x1f0   :  { %v541_v33 = vmul.f32 %v537_v29, %v369_v27  ;;  %v2156_v45 = vpop.eup %2155  ;;  %v508_v29 = vadd.f32 1.1283791, %v507_v7  ;;  %v911_v7 = vld [vmem:[%s4186_s10 + $0x58] sm:$0xff] }
 0x1f1   :  { %v481_v51 = vmul.f32 %v2156_v45, %v479_v24  ;;  %2157 = vrcp.f32 %v519_v20  ;;  %v448_v56 = vsel %vm447_vm8, %v2154_v39, %v444_v49  ;;  %vm486_vm10 = vweird.f32 %v2156_v45 }
 0x1f2   :  { %545 = vst [vmem:[#allocation2 + $0x8] sm:$0xff] %v541_v33  ;;  %638 = vmatmul.f32.vlgmr.msrb.gmra.mxu1 %v541_v33  ;;  %v453_v63 = vsel %vm450_vm9, %v452_v54, %v448_v56  ;;  %vm487_vm12 = vmor %vm485_vm11, %vm486_vm10  ;;  %v531_v39 = vand.u32 2147483648, %v519_v20  ;;  %v529_v25 = vand.u32 2147483647, %v519_v20  ;;  %vm525_vm15 = vweird.f32 %v519_v20 }
 0x1f3   :  { %v482_v59 = vsub.f32 1.0, %v481_v51  ;;  %v454_v61 = vmul.f32 %v453_v63, %v429_v55  ;;  %v509_v35 = vmul.f32 %v508_v29, %v2712_v58  ;;  %v237_v44 = vand.u32 15, %v217_v38 }
 0x1f4   :  { %v532_v34 = vor.u32 1.1754944e-38, %v531_v39  ;;  %vm530_vm1 = vcmp.eq.f32.partialorder %v529_v25, 8.507059e+37  ;;  %v230_v3 = vand.u32 15, %v216_v28  ;;  %v218_v56 = vadd.s32 24, %v2765_v30  ;;  %v914_v30 = vld [vmem:[%s4186_s10 + $0x70] sm:$0xff]  ;;  %v932_v39 = vld [vmem:[%s4187_s9 + $0x60] sm:$0xff] }
 0x1f5   :  { %v483_v1 = vmul.f32 %v2156_v45, %v482_v59  ;;  %v2121_v4 = vclamps-f32 %v454_v61, 1.0  ;;  %vm2787_vm2 = vcmp.gt.s32.totalorder %v237_v44, 0  ;;  %966 = vmatpush.msra.mxu0 %v914_v30  ;;  %v913_v61 = vld [vmem:[%s4186_s10 + $0x68] sm:$0xff] }
 0x1f6   :  { %vm2791_vm3 = vcmp.lt.s32.totalorder %v230_v3, 15  ;;  %v244_v59 = vand.u32 15, %v218_v56  ;;  %v1011_v3 = vld [vmem:[%s4188_s11 + $0x68] sm:$0xff]  ;;  %v1010_v56 = vld [vmem:[%s4188_s11 + $0x60] sm:$0xff] }
 0x1f7   :  { %v484_v5 = vadd.f32 %v2156_v45, %v483_v1  ;;  %v2158_v57 = vpop.eup %2157  ;;  %v538_v19 = vadd.f32 1.0, %v2121_v4  ;;  %967 = vmatpush.msra.mxu0 %v913_v61  ;;  %v912_v4 = vld [vmem:[%s4186_s10 + $0x60] sm:$0xff]  ;;  %v927_v61 = vld [vmem:[%s4187_s9 + $0x38] sm:$0xff] }
 0x1f8   :  { %v521_v22 = vmul.f32 %v2158_v57, %v519_v20  ;;  %vm526_vm14 = vweird.f32 %v2158_v57  ;;  %vm2800_vm4 = vcmp.lt.s32.totalorder %v244_v59, 15  ;;  %v904_v59 = vld [vmem:[%s4186_s10 + $0x20] sm:$0xff]  ;;  %v1261_v20 = vld [vmem:[%s4190_s13 + $0xf0] sm:$0xff] }
 0x1f9   :  { %v549_v62 = vld [vmem:[#allocation2 + $0x7] sm:$0xff]  ;;  %v488_v21 = vsel %vm487_vm12, %v2156_v45, %v484_v5  ;;  %v542_v31 = vmul.f32 %v538_v19, %v370_v52  ;;  %vm527_vm0 = vmor %vm525_vm15, %vm526_vm14  ;;  %v372_v45 = vmul.f32 0.5, %v2699_v50  ;;  %968 = vmatpush.msra.mxu0 %v912_v4  ;;  %v903_v4 = vld [vmem:[%s4186_s10 + $0x18] sm:$0xff]  ;;  %1269 = vmatpush.msrb.mxu2 %v1261_v20 }
 0x1fa   :  { %2124 = vmatmul.msk.f32.vlgmr.msrb.gmra.mxu0 %vm2772_vm7, %v549_v62  ;;  %v493_v23 = vsel %vm490_vm13, %v492_v18, %v488_v21  ;;  %v522_v27 = vsub.f32 1.0, %v521_v22  ;;  %v934_v21 = vld [vmem:[%s4187_s9 + $0x70] sm:$0xff]  ;;  %v1238_v20 = vld [vmem:[%s4190_s13 + $0x38] sm:$0xff] }
 0x1fb   :  { %v494_v26 = vmul.f32 %v493_v23, %v469_v6  ;;  %546 = vst [vmem:[#allocation2 + $0x10] sm:$0xff] %v542_v31  ;;  %641 = vmatmul.f32.gmra.mxu1 %v542_v31  ;;  %v935_v6 = vld [vmem:[%s4187_s9 + $0x78] sm:$0xff]  ;;  %969 = vmatpush.msra.mxu0 %v911_v7  ;;  %v910_v22 = vld [vmem:[%s4186_s10 + $0x50] sm:$0xff]  ;;  %v933_v31 = vld [vmem:[%s4187_s9 + $0x68] sm:$0xff] }
 0x1fc   :  { %v523_v46 = vmul.f32 %v2158_v57, %v522_v27  ;;  %936 = vmatpush.msra.mxu3 %v935_v6  ;;  %v926_v6 = vld [vmem:[%s4187_s9 + $0x30] sm:$0xff] }
 0x1fd   :  { %v2122_v24 = vclamps-f32 %v494_v26, 1.0  ;;  %970 = vmatpush.msra.mxu0 %v910_v22  ;;  %v909_v26 = vld [vmem:[%s4186_s10 + $0x48] sm:$0xff]  ;;  %v1008_v7 = vld [vmem:[%s4188_s11 + $0x50] sm:$0xff] }
 0x1fe   :  { %v524_v33 = vadd.f32 %v2158_v57, %v523_v46  ;;  %937 = vmatpush.msra.mxu3 %v934_v21 }
 0x1ff   :  { %v539_v32 = vadd.f32 1.0, %v2122_v24  ;;  %971 = vmatpush.msra.mxu0 %v909_v26  ;;  %v908_v24 = vld [vmem:[%s4186_s10 + $0x40] sm:$0xff] }
 0x200   :  { %v528_v37 = vsel %vm527_vm0, %v2158_v57, %v524_v33  ;;  %938 = vmatpush.msra.mxu3 %v933_v31  ;;  %v1013_v33 = vld [vmem:[%s4188_s11 + $0x78] sm:$0xff] }
 0x201   :  { %v543_v36 = vmul.f32 %v539_v32, %v371_v8  ;;  %v533_v40 = vsel %vm530_vm1, %v532_v34, %v528_v37  ;;  %972 = vmatpush.msra.mxu0 %v908_v24  ;;  %v931_v32 = vld [vmem:[%s4187_s9 + $0x58] sm:$0xff]  ;;  %1014 = vmatpush.msra.mxu1 %v1013_v33  ;;  %v925_v24 = vld [vmem:[%s4187_s9 + $0x28] sm:$0xff] }
 0x202   :  { %v534_v41 = vmul.f32 %v533_v40, %v509_v35  ;;  %v550_v42 = vld [vmem:[#allocation2 + $0xf] sm:$0xff]  ;;  %939 = vmatpush.msra.mxu3 %v932_v39  ;;  %v907_v34 = vld [vmem:[%s4186_s10 + $0x38] sm:$0xff] }
 0x203   :  { %547 = vst [vmem:[#allocation2 + $0x18] sm:$0xff] %v543_v36  ;;  %v553_v43 = vld [vmem:[#allocation2 + $0x9] sm:$0xff]  ;;  %612 = vmatmul.f32.gmra.mxu0 %v550_v42  ;;  %644 = vmatmul.f32.gmra.mxu1 %v543_v36 }
 0x204   :  { %v2123_v9 = vclamps-f32 %v534_v41, 1.0  ;;  %687 = vmatmul.f32.vlgmr.msra.gmra.mxu2 %v553_v43  ;;  %940 = vmatpush.msra.mxu3 %v931_v32  ;;  %v930_v40 = vld [vmem:[%s4187_s9 + $0x50] sm:$0xff] }
 0x205   :  { %973 = vmatpush.msra.mxu0 %v907_v34  ;;  %v1012_v41 = vld [vmem:[%s4188_s11 + $0x70] sm:$0xff] }
 0x206   :  { %v540_v58 = vadd.f32 1.0, %v2123_v9  ;;  %941 = vmatpush.msra.mxu3 %v930_v40  ;;  %1015 = vmatpush.msra.mxu1 %v1012_v41  ;;  %v906_v42 = vld [vmem:[%s4186_s10 + $0x30] sm:$0xff]  ;;  %v900_v40 = vld [vmem:[%s4186_s10] sm:$0xff] }
 0x207   :  { %974 = vmatpush.msra.mxu0 %v906_v42  ;;  %v923_v42 = vld [vmem:[%s4187_s9 + $0x18] sm:$0xff] }
 0x208   :  { %v544_v48 = vmul.f32 %v540_v58, %v372_v45  ;;  %v929_v58 = vld [vmem:[%s4187_s9 + $0x48] sm:$0xff]  ;;  %1016 = vmatpush.msra.mxu1 %v1011_v3 }
 0x209   :  { %942 = vmatpush.msra.mxu3 %v929_v58 }
 0x20a   :  { %v551_v49 = vld [vmem:[#allocation2 + $0x17] sm:$0xff]  ;;  %548 = vst [vmem:[#allocation2 + $0x20] sm:$0xff] %v544_v48  ;;  %1017 = vmatpush.msra.mxu1 %v1010_v56 }
 0x20b   :  { %v554_v54 = vld [vmem:[#allocation2 + $0x11] sm:$0xff]  ;;  %2125 = vmatmul.msk.f32.gmra.mxu0 %vm2787_vm2, %v551_v49  ;;  %647 = vmatmul.f32.gmra.mxu1 %v544_v48  ;;  %v905_v48 = vld [vmem:[%s4186_s10 + $0x28] sm:$0xff] }
 0x20c   :  { %2126 = vmatmul.msk.f32.gmra.mxu2 %vm2791_vm3, %v554_v54  ;;  %975 = vmatpush.msra.mxu0 %v905_v48 }
 0x20e   :  { %976 = vmatpush.msra.mxu0 %v904_v59  ;;  %v921_v59 = vld [vmem:[%s4187_s9 + $0x8] sm:$0xff] }
 0x210   :  { %977 = vmatpush.msra.mxu0 %v903_v4 }
 0x211   :  { %v552_v50 = vld [vmem:[#allocation2 + $0x1f] sm:$0xff] }
 0x212   :  { %v555_v55 = vld [vmem:[#allocation2 + $0x19] sm:$0xff]  ;;  %v556_v47 = vld [vmem:[#allocation2 + $0x21] sm:$0xff] }
 0x213   :  { %618 = vmatmul.f32.gmra.mxu0 %v552_v50 }
 0x214   :  { %693 = vmatmul.f32.gmra.mxu2 %v555_v55  ;;  %v928_v55 = vld [vmem:[%s4187_s9 + $0x40] sm:$0xff] }
 0x215   :  { %943 = vmatpush.msra.mxu3 %v928_v55 }
 0x217   :  { %944 = vmatpush.msra.mxu3 %v927_v61 }
 0x219   :  { %945 = vmatpush.msra.mxu3 %v926_v6 }
 0x21b   :  { %946 = vmatpush.msra.mxu3 %v925_v24 }
 0x21c   :  { %2127 = vmatmul.msk.f32.gmra.mxu2 %vm2800_vm4, %v556_v47 }
 0x26f   :  { %v639_v63 = vpop.f32.mrf.mxu1 }
 0x277   :  { %v610_v62 = vpop.f32.mrf.mxu0 }
 0x278   :  { %v640_v1 = vadd.f32 %v639_v63, %v610_v62  ;;  %v642_v18 = vpop.f32.mrf.mxu1 }
 0x280   :  { %v613_v5 = vpop.f32.mrf.mxu0  ;;  %v645_v28 = vpop.f32.mrf.mxu1 }
 0x281   :  { %v643_v27 = vadd.f32 %v642_v18, %v613_v5  ;;  %v902_v18 = vld [vmem:[%s4186_s10 + $0x10] sm:$0xff] }
 0x282   :  { %978 = vmatpush.msra.mxu0 %v902_v18 }
 0x287   :  { %v688_v57 = vpop.f32.mrf.mxu2 }
 0x288   :  { %v700_v52 = vadd.f32 %v688_v57, %v640_v1  ;;  %v616_v35 = vpop.f32.mrf.mxu0  ;;  %v1009_v1 = vld [vmem:[%s4188_s11 + $0x58] sm:$0xff]  ;;  %v648_v39 = vpop.f32.mrf.mxu1 }
 0x289   :  { %v646_v45 = vadd.f32 %v645_v28, %v616_v35  ;;  %1018 = vmatpush.msra.mxu1 %v1009_v1 }
 0x28a   :  { %v2830_v19 = vadd.f32 %v2818_v2, %v700_v52 }
 0x28b   :  { %1019 = vmatpush.msra.mxu1 %v1008_v7 }
 0x28c   :  { %v2839_v23 = vmul.f32 0.70710677, %v2830_v19 }
 0x28e   :  { %v720_v29 = vmul.f32 %v2839_v23, %v2839_v23 }
 0x28f   :  { %v691_v46 = vpop.f32.mrf.mxu2 }
 0x290   :  { %v2855_v25 = vmin.f32 %v720_v29, 16.0  ;;  %v701_v8 = vadd.f32 %v691_v46, %v643_v27  ;;  %v619_v22 = vpop.f32.mrf.mxu0  ;;  %v1007_v46 = vld [vmem:[%s4188_s11 + $0x48] sm:$0xff] }
 0x291   :  { %v649_v34 = vadd.f32 %v648_v39, %v619_v22  ;;  %1020 = vmatpush.msra.mxu1 %v1007_v46 }
 0x292   :  { %v722_v36 = vmul.f32 2.1237322e-06, %v2855_v25  ;;  %v733_v37 = vmul.f32 3.8918573e-05, %v2855_v25  ;;  %v2869_v38 = vadd.f32 %v2818_v2, %v701_v8  ;;  %v901_v8 = vld [vmem:[%s4186_s10 + $0x8] sm:$0xff] }
 0x293   :  { %979 = vmatpush.msra.mxu0 %v901_v8  ;;  %v1001_v8 = vld [vmem:[%s4188_s11 + $0x18] sm:$0xff] }
 0x294   :  { %v723_v43 = vadd.f32 0.00028619796, %v722_v36  ;;  %v734_v9 = vadd.f32 0.001143296, %v733_v37  ;;  %v2881_v44 = vmul.f32 0.70710677, %v2869_v38 }
 0x295   :  { %v924_v36 = vld [vmem:[%s4187_s9 + $0x20] sm:$0xff]  ;;  %980 = vmatpush.msra.mxu0 %v900_v40 }
 0x296   :  { %v724_v49 = vmul.f32 %v723_v43, %v2855_v25  ;;  %v735_v54 = vmul.f32 %v734_v9, %v2855_v25  ;;  %v760_v50 = vmul.f32 %v2881_v44, %v2881_v44  ;;  %v1006_v37 = vld [vmem:[%s4188_s11 + $0x40] sm:$0xff]  ;;  %v1005_v43 = vld [vmem:[%s4188_s11 + $0x38] sm:$0xff]  ;;  %947 = vmatpush.msra.mxu3 %v924_v36 }
 0x297   :  { %v694_v47 = vpop.f32.mrf.mxu2  ;;  %1021 = vmatpush.msra.mxu1 %v1006_v37 }
 0x298   :  { %v725_v62 = vadd.f32 0.0036580483, %v724_v49  ;;  %v736_v63 = vadd.f32 0.014752088, %v735_v54  ;;  %v2905_v0 = vmin.f32 %v760_v50, 16.0  ;;  %v702_v30 = vadd.f32 %v694_v47, %v646_v45  ;;  %v922_v49 = vld [vmem:[%s4187_s9 + $0x10] sm:$0xff]  ;;  %948 = vmatpush.msra.mxu3 %v923_v42 }
 0x299   :  { %v1004_v54 = vld [vmem:[%s4188_s11 + $0x30] sm:$0xff]  ;;  %1022 = vmatpush.msra.mxu1 %v1005_v43  ;;  %v1003_v47 = vld [vmem:[%s4188_s11 + $0x28] sm:$0xff] }
 0x29a   :  { %v726_v5 = vmul.f32 %v725_v62, %v2855_v25  ;;  %v737_v57 = vmul.f32 %v736_v63, %v2855_v25  ;;  %v2919_v52 = vadd.f32 %v2818_v2, %v702_v30  ;;  %v762_v21 = vmul.f32 2.1237322e-06, %v2905_v0  ;;  %949 = vmatpush.msra.mxu3 %v922_v49 }
 0x29b   :  { %v773_v31 = vmul.f32 3.8918573e-05, %v2905_v0  ;;  %1023 = vmatpush.msra.mxu1 %v1004_v54 }
 0x29c   :  { %v727_v26 = vadd.f32 0.05243302, %v726_v5  ;;  %v738_v27 = vadd.f32 0.112945676, %v737_v57  ;;  %v2933_v29 = vmul.f32 0.70710677, %v2919_v52  ;;  %950 = vmatpush.msra.mxu3 %v921_v59 }
 0x29d   :  { %v763_v32 = vadd.f32 0.00028619796, %v762_v21  ;;  %v774_v41 = vadd.f32 0.001143296, %v773_v31  ;;  %v920_v5 = vld [vmem:[%s4187_s9] sm:$0xff]  ;;  %1024 = vmatpush.msra.mxu1 %v1003_v47 }
 0x29e   :  { %v739_v33 = vmul.f32 %v738_v27, %v2855_v25  ;;  %v800_v35 = vmul.f32 %v2933_v29, %v2933_v29  ;;  %v728_v45 = vmul.f32 %v727_v26, %v2855_v25  ;;  %v1002_v57 = vld [vmem:[%s4188_s11 + $0x20] sm:$0xff]  ;;  %951 = vmatpush.msra.mxu3 %v920_v5 }
 0x29f   :  { %v697_v28 = vpop.f32.mrf.mxu2  ;;  %v764_v9 = vmul.f32 %v763_v32, %v2905_v0  ;;  %v775_v50 = vmul.f32 %v774_v41, %v2905_v0  ;;  %1025 = vmatpush.msra.mxu1 %v1002_v57  ;;  %v1000_v32 = vld [vmem:[%s4188_s11 + $0x10] sm:$0xff] }
 0x2a0   :  { %v740_v58 = vadd.f32 0.4994258, %v739_v33  ;;  %v2964_v3 = vmin.f32 %v800_v35, 16.0  ;;  %v703_v48 = vadd.f32 %v697_v28, %v649_v34  ;;  %v729_v1 = vadd.f32 0.18741608, %v728_v45 }
 0x2a1   :  { %v765_v63 = vadd.f32 0.0036580483, %v764_v9  ;;  %v776_v30 = vadd.f32 0.014752088, %v775_v50  ;;  %1026 = vmatpush.msra.mxu1 %v1001_v8  ;;  %v998_v9 = vld [vmem:[%s4188_s11] sm:$0xff] }
 0x2a2   :  { %v741_v55 = vmul.f32 %v740_v58, %v2855_v25  ;;  %v2975_v56 = vadd.f32 %v2818_v2, %v703_v48  ;;  %v802_v62 = vmul.f32 2.1237322e-06, %v2964_v3  ;;  %v813_v61 = vmul.f32 3.8918573e-05, %v2964_v3 }
 0x2a3   :  { %v777_v6 = vmul.f32 %v776_v30, %v2905_v0  ;;  %v766_v22 = vmul.f32 %v765_v63, %v2905_v0  ;;  %v730_v27 = vmul.f32 %v729_v1, %v2855_v25  ;;  %v999_v25 = vld [vmem:[%s4188_s11 + $0x8] sm:$0xff]  ;;  %1027 = vmatpush.msra.mxu1 %v1000_v32 }
 0x2a4   :  { %v2985_v4 = vadd.f32 1.0, %v741_v55  ;;  %v2988_v2 = vmul.f32 0.70710677, %v2975_v56  ;;  %v803_v7 = vadd.f32 0.00028619796, %v802_v62 }
 0x2a5   :  { %v814_v18 = vadd.f32 0.001143296, %v813_v61  ;;  %v778_v31 = vadd.f32 0.112945676, %v777_v6  ;;  %v767_v33 = vadd.f32 0.05243302, %v766_v22  ;;  %1028 = vmatpush.msra.mxu1 %v999_v25 }
 0x2a6   :  { %2159 = vrcp.f32 %v2985_v4  ;;  %v840_v21 = vmul.f32 %v2988_v2, %v2988_v2  ;;  %v804_v46 = vmul.f32 %v803_v7, %v2964_v3  ;;  %v731_v41 = vadd.f32 1.1283791, %v730_v27 }
 0x2a7   :  { %v815_v26 = vmul.f32 %v814_v18, %v2964_v3  ;;  %v779_v24 = vmul.f32 %v778_v31, %v2905_v0  ;;  %v752_v54 = vand.u32 2147483647, %v2985_v4  ;;  %v768_v50 = vmul.f32 %v767_v33, %v2905_v0  ;;  %1029 = vmatpush.msra.mxu1 %v998_v9 }
 0x2a8   :  { %v3003_v39 = vmin.f32 %v840_v21, 16.0  ;;  %v805_v43 = vadd.f32 0.0036580483, %v804_v46  ;;  %v754_v59 = vand.u32 2147483648, %v2985_v4  ;;  %vm748_vm6 = vweird.f32 %v2985_v4 }
 0x2a9   :  { %v780_v34 = vadd.f32 0.4994258, %v779_v24  ;;  %v816_v35 = vadd.f32 0.014752088, %v815_v26  ;;  %v769_v57 = vadd.f32 0.18741608, %v768_v50  ;;  %v732_v7 = vmul.f32 %v731_v41, %v2839_v23 }
 0x2aa   :  { %v842_v37 = vmul.f32 2.1237322e-06, %v3003_v39  ;;  %v853_v40 = vmul.f32 3.8918573e-05, %v3003_v39  ;;  %v806_v61 = vmul.f32 %v805_v43, %v2964_v3  ;;  %v755_v18 = vor.u32 1.1754944e-38, %v754_v59 }
 0x2ab   :  { %v781_v42 = vmul.f32 %v780_v34, %v2905_v0  ;;  %v817_v45 = vmul.f32 %v816_v35, %v2964_v3  ;;  %vm753_vm9 = vcmp.eq.f32.partialorder %v752_v54, 8.507059e+37 }
 0x2ac   :  { %v2160_v36 = vpop.eup %2159  ;;  %v843_v58 = vadd.f32 0.00028619796, %v842_v37  ;;  %v854_v48 = vadd.f32 0.001143296, %v853_v40  ;;  %v807_v26 = vadd.f32 0.05243302, %v806_v61 }
 0x2ad   :  { %v744_v28 = vmul.f32 %v2160_v36, %v2985_v4  ;;  %v782_v55 = vadd.f32 1.0, %v781_v42  ;;  %v818_v47 = vadd.f32 0.112945676, %v817_v45  ;;  %vm749_vm5 = vweird.f32 %v2160_v36 }
 0x2ae   :  { %v844_v62 = vmul.f32 %v843_v58, %v3003_v39  ;;  %v855_v63 = vmul.f32 %v854_v48, %v3003_v39  ;;  %vm750_vm8 = vmor %vm748_vm6, %vm749_vm5  ;;  %v770_v4 = vmul.f32 %v769_v57, %v2905_v0  ;;  %v808_v37 = vmul.f32 %v807_v26, %v2964_v3 }
 0x2af   :  { %v745_v49 = vsub.f32 1.0, %v744_v28  ;;  %2161 = vrcp.f32 %v782_v55  ;;  %v819_v1 = vmul.f32 %v818_v47, %v2964_v3  ;;  %v712_v40 = vmul.f32 0.5, %v2830_v19 }
 0x2b0   :  { %v856_v6 = vadd.f32 0.014752088, %v855_v63  ;;  %v845_v22 = vadd.f32 0.0036580483, %v844_v62  ;;  %v771_v42 = vadd.f32 1.1283791, %v770_v4  ;;  %vm788_vm11 = vweird.f32 %v782_v55 }
 0x2b1   :  { %v746_v30 = vmul.f32 %v2160_v36, %v745_v49  ;;  %v820_v21 = vadd.f32 0.4994258, %v819_v1  ;;  %v794_v43 = vand.u32 2147483648, %v782_v55  ;;  %v792_v0 = vand.u32 2147483647, %v782_v55 }
 0x2b2   :  { %v857_v27 = vmul.f32 %v856_v6, %v3003_v39  ;;  %v846_v23 = vmul.f32 %v845_v22, %v3003_v39  ;;  %v809_v49 = vadd.f32 0.18741608, %v808_v37  ;;  %v772_v62 = vmul.f32 %v771_v42, %v2881_v44 }
 0x2b3   :  { %v747_v5 = vadd.f32 %v2160_v36, %v746_v30  ;;  %v821_v46 = vmul.f32 %v820_v21, %v2964_v3  ;;  %v795_v19 = vor.u32 1.1754944e-38, %v794_v43  ;;  %vm793_vm13 = vcmp.eq.f32.partialorder %v792_v0, 8.507059e+37 }
 0x2b4   :  { %v858_v33 = vadd.f32 0.112945676, %v857_v27  ;;  %v847_v58 = vadd.f32 0.05243302, %v846_v23  ;;  %v810_v1 = vmul.f32 %v809_v49, %v2964_v3  ;;  %v713_v44 = vmul.f32 0.5, %v2869_v38 }
 0x2b5   :  { %v751_v31 = vsel %vm750_vm8, %v2160_v36, %v747_v5  ;;  %v2162_v8 = vpop.eup %2161  ;;  %v822_v35 = vadd.f32 1.0, %v821_v46 }
 0x2b6   :  { %v756_v24 = vsel %vm753_vm9, %v755_v18, %v751_v31  ;;  %v784_v34 = vmul.f32 %v2162_v8, %v782_v55  ;;  %v859_v36 = vmul.f32 %v858_v33, %v3003_v39  ;;  %vm789_vm10 = vweird.f32 %v2162_v8 }
 0x2b7   :  { %v757_v32 = vmul.f32 %v756_v24, %v732_v7  ;;  %2163 = vrcp.f32 %v822_v35  ;;  %vm790_vm12 = vmor %vm788_vm11, %vm789_vm10  ;;  %v848_v30 = vmul.f32 %v847_v58, %v3003_v39  ;;  %v834_v7 = vand.u32 2147483648, %v822_v35 }
 0x2b8   :  { %v785_v41 = vsub.f32 1.0, %v784_v34  ;;  %v860_v9 = vadd.f32 0.4994258, %v859_v36  ;;  %v811_v21 = vadd.f32 1.1283791, %v810_v1  ;;  %vm828_vm15 = vweird.f32 %v822_v35 }
 0x2b9   :  { %v2128_v25 = vclamps-f32 %v757_v32, 1.0  ;;  %v849_v18 = vadd.f32 0.18741608, %v848_v30  ;;  %v832_v31 = vand.u32 2147483647, %v822_v35  ;;  %v1262_v30 = vld [vmem:[%s4190_s13 + $0xf8] sm:$0xff] }
 0x2ba   :  { %v786_v45 = vmul.f32 %v2162_v8, %v785_v41  ;;  %v861_v54 = vmul.f32 %v860_v9, %v3003_v39  ;;  %v812_v4 = vmul.f32 %v811_v21, %v2933_v29  ;;  %v714_v41 = vmul.f32 0.5, %v2919_v52  ;;  %1298 = vmatpush.msrb.mxu3 %v1262_v30  ;;  %v3073_v1 = vld [vmem:[%s4189_s12] ss:$0 sm:$0xff] }
 0x2bb   :  { %v880_v28 = vadd.f32 1.0, %v2128_v25  ;;  %v850_v32 = vmul.f32 %v849_v18, %v3003_v39  ;;  %vm833_vm1 = vcmp.eq.f32.partialorder %v832_v31, 8.507059e+37  ;;  %v715_v52 = vmul.f32 0.5, %v2975_v56  ;;  %v1256_v18 = vld [vmem:[%s4190_s13 + $0xc8] sm:$0xff]  ;;  %v1253_v31 = vld [vmem:[%s4190_s13 + $0xb0] sm:$0xff] }
 0x2bc   :  { %v787_v50 = vadd.f32 %v2162_v8, %v786_v45  ;;  %v862_v59 = vadd.f32 1.0, %v861_v54  ;;  %1299 = vmatpush.msrb.mxu3 %v1260_v60  ;;  %v1235_v60 = vld [vmem:[%s4190_s13 + $0x20] sm:$0xff] }
 0x2bd   :  { %v884_v48 = vmul.f32 %v880_v28, %v712_v40  ;;  %v2164_v47 = vpop.eup %2163  ;;  %v851_v53 = vadd.f32 1.1283791, %v850_v32  ;;  %v1249_v32 = vld [vmem:[%s4190_s13 + $0x90] sm:$0xff] }
 0x2be   :  { %v791_v63 = vsel %vm790_vm12, %v2162_v8, %v787_v50  ;;  %v824_v5 = vmul.f32 %v2164_v47, %v822_v35  ;;  %2165 = vrcp.f32 %v862_v59  ;;  %vm829_vm14 = vweird.f32 %v2164_v47 }
 0x2bf   :  { %888 = vst [vmem:[#allocation2 + $0x8] sm:$0xff] %v884_v48  ;;  %981 = vmatmul.f32.vlgmr.msra.gmra.mxu0 %v884_v48  ;;  %v796_v61 = vsel %vm793_vm13, %v795_v19, %v791_v63  ;;  %vm830_vm0 = vmor %vm828_vm15, %vm829_vm14  ;;  %v835_v8 = vor.u32 1.1754944e-38, %v834_v7  ;;  %v874_v37 = vand.u32 2147483648, %v862_v59  ;;  %v872_v40 = vand.u32 2147483647, %v862_v59  ;;  %v1255_v7 = vld [vmem:[%s4190_s13 + $0xc0] sm:$0xff] }
 0x2c0   :  { %v797_v57 = vmul.f32 %v796_v61, %v772_v62  ;;  %v825_v6 = vsub.f32 1.0, %v824_v5  ;;  %vm868_vm5 = vweird.f32 %v862_v59  ;;  %v852_v45 = vmul.f32 %v851_v53, %v2988_v2  ;;  %v1259_v61 = vld [vmem:[%s4190_s13 + $0xe0] sm:$0xff]  ;;  %v1257_v5 = vld [vmem:[%s4190_s13 + $0xd0] sm:$0xff] }
 0x2c1   :  { %v875_v29 = vor.u32 1.1754944e-38, %v874_v37  ;;  %vm873_vm8 = vcmp.eq.f32.partialorder %v872_v40, 8.507059e+37  ;;  %1270 = vmatpush.msrb.mxu2 %v1259_v61 }
 0x2c2   :  { %v2129_v55 = vclamps-f32 %v797_v57, 1.0  ;;  %v826_v22 = vmul.f32 %v2164_v47, %v825_v6  ;;  %v1258_v57 = vld [vmem:[%s4190_s13 + $0xd8] sm:$0xff] }
 0x2c3   :  { %1271 = vmatpush.msrb.mxu2 %v1257_v5  ;;  %1300 = vmatpush.msrb.mxu3 %v1258_v57  ;;  %v1236_v5 = vld [vmem:[%s4190_s13 + $0x28] sm:$0xff]  ;;  %v1233_v57 = vld [vmem:[%s4190_s13 + $0x10] sm:$0xff] }
 0x2c4   :  { %v881_v27 = vadd.f32 1.0, %v2129_v55  ;;  %v827_v24 = vadd.f32 %v2164_v47, %v826_v22  ;;  %v2166_v3 = vpop.eup %2165 }
 0x2c5   :  { %v864_v34 = vmul.f32 %v2166_v3, %v862_v59  ;;  %1272 = vmatpush.msrb.mxu2 %v1255_v7  ;;  %1301 = vmatpush.msrb.mxu3 %v1256_v18 }
 0x2c6   :  { %v892_v26 = vld [vmem:[#allocation2 + $0x7] sm:$0xff]  ;;  %v885_v46 = vmul.f32 %v881_v27, %v713_v44  ;;  %v831_v33 = vsel %vm830_vm0, %v2164_v47, %v827_v24 }
 0x2c7   :  { %2132 = vmatmul.msk.f32.vlgmr.msra.gmra.mxu3 %vm2772_vm7, %v892_v26  ;;  %v836_v38 = vsel %vm833_vm1, %v835_v8, %v831_v33  ;;  %v865_v25 = vsub.f32 1.0, %v864_v34  ;;  %vm869_vm7 = vweird.f32 %v2166_v3  ;;  %v1254_v26 = vld [vmem:[%s4190_s13 + $0xb8] sm:$0xff]  ;;  %1273 = vmatpush.msrb.mxu2 %v1253_v31  ;;  %v1251_v27 = vld [vmem:[%s4190_s13 + $0xa0] sm:$0xff]  ;;  %v1252_v24 = vld [vmem:[%s4190_s13 + $0xa8] sm:$0xff] }
 0x2c8   :  { %889 = vst [vmem:[#allocation2 + $0x10] sm:$0xff] %v885_v46  ;;  %984 = vmatmul.f32.gmra.mxu0 %v885_v46  ;;  %v837_v23 = vmul.f32 %v836_v38, %v812_v4  ;;  %vm870_vm6 = vmor %vm868_vm5, %vm869_vm7  ;;  %1302 = vmatpush.msrb.mxu3 %v1254_v26  ;;  %v1250_v4 = vld [vmem:[%s4190_s13 + $0x98] sm:$0xff]  ;;  %v1247_v34 = vld [vmem:[%s4190_s13 + $0x80] sm:$0xff] }
 0x2c9   :  { %v866_v35 = vmul.f32 %v2166_v3, %v865_v25  ;;  %1274 = vmatpush.msrb.mxu2 %v1251_v27  ;;  %v1248_v38 = vld [vmem:[%s4190_s13 + $0x88] sm:$0xff]  ;;  %v1231_v26 = vld [vmem:[%s4190_s13] sm:$0xff] }
 0x2ca   :  { %v2130_v36 = vclamps-f32 %v837_v23, 1.0  ;;  %1303 = vmatpush.msrb.mxu3 %v1252_v24  ;;  %v1232_v27 = vld [vmem:[%s4190_s13 + $0x8] sm:$0xff] }
 0x2cb   :  { %v867_v39 = vadd.f32 %v2166_v3, %v866_v35  ;;  %1275 = vmatpush.msrb.mxu2 %v1249_v32  ;;  %v1246_v35 = vld [vmem:[%s4190_s13 + $0x78] sm:$0xff] }
 0x2cc   :  { %v882_v28 = vadd.f32 1.0, %v2130_v36  ;;  %1304 = vmatpush.msrb.mxu3 %v1250_v4  ;;  %v1245_v36 = vld [vmem:[%s4190_s13 + $0x70] sm:$0xff] }
 0x2cd   :  { %v871_v0 = vsel %vm870_vm6, %v2166_v3, %v867_v39  ;;  %1276 = vmatpush.msrb.mxu2 %v1247_v34 }
 0x2ce   :  { %v886_v43 = vmul.f32 %v882_v28, %v714_v41  ;;  %v876_v58 = vsel %vm873_vm8, %v875_v29, %v871_v0  ;;  %1305 = vmatpush.msrb.mxu3 %v1248_v38  ;;  %v1243_v29 = vld [vmem:[%s4190_s13 + $0x60] sm:$0xff] }
 0x2cf   :  { %v893_v42 = vld [vmem:[#allocation2 + $0xf] sm:$0xff]  ;;  %v877_v48 = vmul.f32 %v876_v58, %v852_v45  ;;  %1277 = vmatpush.msrb.mxu2 %v1245_v36 }
 0x2d0   :  { %v896_v9 = vld [vmem:[#allocation2 + $0x9] sm:$0xff]  ;;  %955 = vmatmul.f32.gmra.mxu3 %v893_v42  ;;  %890 = vst [vmem:[#allocation2 + $0x18] sm:$0xff] %v886_v43  ;;  %987 = vmatmul.f32.gmra.mxu0 %v886_v43 }
 0x2d1   :  { %1030 = vmatmul.f32.vlgmr.msra.gmra.mxu1 %v896_v9  ;;  %v2131_v49 = vclamps-f32 %v877_v48, 1.0  ;;  %1306 = vmatpush.msrb.mxu3 %v1246_v35  ;;  %v1244_v42 = vld [vmem:[%s4190_s13 + $0x68] sm:$0xff]  ;;  %v1241_v58 = vld [vmem:[%s4190_s13 + $0x50] sm:$0xff]  ;;  %v1242_v48 = vld [vmem:[%s4190_s13 + $0x58] sm:$0xff] }
 0x2d2   :  { %1278 = vmatpush.msrb.mxu2 %v1243_v29 }
 0x2d3   :  { %v883_v54 = vadd.f32 1.0, %v2131_v49  ;;  %1307 = vmatpush.msrb.mxu3 %v1244_v42 }
 0x2d4   :  { %1279 = vmatpush.msrb.mxu2 %v1241_v58 }
 0x2d5   :  { %v887_v50 = vmul.f32 %v883_v54, %v715_v52  ;;  %1308 = vmatpush.msrb.mxu3 %v1242_v48 }
 0x2d7   :  { %v894_v19 = vld [vmem:[#allocation2 + $0x17] sm:$0xff]  ;;  %891 = vst [vmem:[#allocation2 + $0x20] sm:$0xff] %v887_v50 }
 0x2d8   :  { %v897_v59 = vld [vmem:[#allocation2 + $0x11] sm:$0xff]  ;;  %2133 = vmatmul.msk.f32.gmra.mxu3 %vm2787_vm2, %v894_v19  ;;  %990 = vmatmul.f32.gmra.mxu0 %v887_v50  ;;  %v1239_v19 = vld [vmem:[%s4190_s13 + $0x40] sm:$0xff] }
 0x2d9   :  { %2134 = vmatmul.msk.f32.gmra.mxu1 %vm2791_vm3, %v897_v59  ;;  %v1240_v59 = vld [vmem:[%s4190_s13 + $0x48] sm:$0xff]  ;;  %1280 = vmatpush.msrb.mxu2 %v1239_v19 }
 0x2da   :  { %1309 = vmatpush.msrb.mxu3 %v1240_v59 }
 0x2dc   :  { %1310 = vmatpush.msrb.mxu3 %v1238_v20 }
 0x2de   :  { %v895_v2 = vld [vmem:[#allocation2 + $0x1f] sm:$0xff]  ;;  %1311 = vmatpush.msrb.mxu3 %v1236_v5 }
 0x2df   :  { %v898_v47 = vld [vmem:[#allocation2 + $0x19] sm:$0xff]  ;;  %v899_v62 = vld [vmem:[#allocation2 + $0x21] sm:$0xff] }
 0x2e0   :  { %961 = vmatmul.f32.gmra.mxu3 %v895_v2 }
 0x2e1   :  { %1036 = vmatmul.f32.gmra.mxu1 %v898_v47 }
 0x2e9   :  { %2135 = vmatmul.msk.f32.gmra.mxu1 %vm2800_vm4, %v899_v62 }
 0x33c   :  { %v982_v56 = vpop.f32.mrf.mxu0 }
 0x345   :  { %v985_v21 = vpop.f32.mrf.mxu0 }
 0x34a   :  { %v953_v63 = vpop.f32.mrf.mxu3 }
 0x34b   :  { %v983_v51 = vadd.f32 %v982_v56, %v953_v63  ;;  %v1237_v63 = vld [vmem:[%s4190_s13 + $0x30] sm:$0xff] }
 0x34c   :  { %1281 = vmatpush.msrb.mxu2 %v1237_v63 }
 0x34d   :  { %v988_v40 = vpop.f32.mrf.mxu0 }
 0x34e   :  { %v1031_v6 = vpop.f32.mrf.mxu1  ;;  %1282 = vmatpush.msrb.mxu2 %v1235_v60 }
 0x34f   :  { %v1043_v55 = vadd.f32 %v1031_v6, %v983_v51  ;;  %v1234_v6 = vld [vmem:[%s4190_s13 + $0x18] sm:$0xff] }
 0x350   :  { %1283 = vmatpush.msrb.mxu2 %v1233_v57  ;;  %1312 = vmatpush.msrb.mxu3 %v1234_v6 }
 0x351   :  { %v3088_v22 = vadd.f32 %v3073_v1, %v1043_v55 }
 0x352   :  { %1284 = vmatpush.msrb.mxu2 %v1231_v26  ;;  %1313 = vmatpush.msrb.mxu3 %v1232_v27 }
 0x353   :  { %v3097_v44 = vmul.f32 0.70710677, %v3088_v22  ;;  %v956_v3 = vpop.f32.mrf.mxu3 }
 0x354   :  { %v986_v8 = vadd.f32 %v985_v21, %v956_v3 }
 0x355   :  { %v1063_v46 = vmul.f32 %v3097_v44, %v3097_v44  ;;  %v991_v18 = vpop.f32.mrf.mxu0 }
 0x356   :  { %v1034_v23 = vpop.f32.mrf.mxu1 }
 0x357   :  { %v3113_v33 = vmin.f32 %v1063_v46, 16.0  ;;  %v1044_v37 = vadd.f32 %v1034_v23, %v986_v8 }
 0x359   :  { %v1065_v25 = vmul.f32 2.1237322e-06, %v3113_v33  ;;  %v1076_v53 = vmul.f32 3.8918573e-05, %v3113_v33  ;;  %v3130_v39 = vadd.f32 %v3073_v1, %v1044_v37 }
 0x35b   :  { %v1066_v41 = vadd.f32 0.00028619796, %v1065_v25  ;;  %v1077_v28 = vadd.f32 0.001143296, %v1076_v53  ;;  %v3141_v45 = vmul.f32 0.70710677, %v3130_v39  ;;  %v959_v0 = vpop.f32.mrf.mxu3 }
 0x35c   :  { %v989_v49 = vadd.f32 %v988_v40, %v959_v0 }
 0x35d   :  { %v1067_v43 = vmul.f32 %v1066_v41, %v3113_v33  ;;  %v1078_v9 = vmul.f32 %v1077_v28, %v3113_v33  ;;  %v1103_v50 = vmul.f32 %v3141_v45, %v3141_v45 }
 0x35e   :  { %v1037_v2 = vpop.f32.mrf.mxu1 }
 0x35f   :  { %v1068_v52 = vadd.f32 0.0036580483, %v1067_v43  ;;  %v1079_v54 = vadd.f32 0.014752088, %v1078_v9  ;;  %v3158_v62 = vmin.f32 %v1103_v50, 16.0  ;;  %v1045_v56 = vadd.f32 %v1037_v2, %v989_v49 }
 0x361   :  { %v1080_v47 = vmul.f32 %v1079_v54, %v3113_v33  ;;  %v1069_v30 = vmul.f32 %v1068_v52, %v3113_v33  ;;  %v3168_v61 = vadd.f32 %v3073_v1, %v1045_v56  ;;  %v1105_v55 = vmul.f32 2.1237322e-06, %v3158_v62 }
 0x362   :  { %v1116_v24 = vmul.f32 3.8918573e-05, %v3158_v62 }
 0x363   :  { %v1081_v51 = vadd.f32 0.112945676, %v1080_v47  ;;  %v3185_v21 = vmul.f32 0.70710677, %v3168_v61  ;;  %v962_v31 = vpop.f32.mrf.mxu3  ;;  %v1070_v3 = vadd.f32 0.05243302, %v1069_v30 }
 0x364   :  { %v992_v46 = vadd.f32 %v991_v18, %v962_v31  ;;  %v1106_v8 = vadd.f32 0.00028619796, %v1105_v55  ;;  %v1117_v34 = vadd.f32 0.001143296, %v1116_v24 }
 0x365   :  { %v1082_v7 = vmul.f32 %v1081_v51, %v3113_v33  ;;  %v1143_v4 = vmul.f32 %v3185_v21, %v3185_v21  ;;  %v1071_v36 = vmul.f32 %v1070_v3, %v3113_v33 }
 0x366   :  { %v1040_v38 = vpop.f32.mrf.mxu1  ;;  %v1107_v37 = vmul.f32 %v1106_v8, %v3158_v62  ;;  %v1118_v35 = vmul.f32 %v1117_v34, %v3158_v62 }
 0x367   :  { %v1083_v32 = vadd.f32 0.4994258, %v1082_v7  ;;  %v3197_v25 = vmin.f32 %v1143_v4, 16.0  ;;  %v1046_v53 = vadd.f32 %v1040_v38, %v992_v46  ;;  %v1072_v9 = vadd.f32 0.18741608, %v1071_v36 }
 0x368   :  { %v1119_v29 = vadd.f32 0.014752088, %v1118_v35  ;;  %v1108_v43 = vadd.f32 0.0036580483, %v1107_v37 }
 0x369   :  { %v1084_v23 = vmul.f32 %v1083_v32, %v3113_v33  ;;  %v3203_v41 = vadd.f32 %v3073_v1, %v1046_v53  ;;  %v1145_v28 = vmul.f32 2.1237322e-06, %v3197_v25  ;;  %v1156_v42 = vmul.f32 3.8918573e-05, %v3197_v25 }
 0x36a   :  { %v1120_v58 = vmul.f32 %v1119_v29, %v3158_v62  ;;  %v1109_v54 = vmul.f32 %v1108_v43, %v3158_v62  ;;  %v1073_v59 = vmul.f32 %v1072_v9, %v3113_v33 }
 0x36b   :  { %v1085_v40 = vadd.f32 1.0, %v1084_v23  ;;  %v3208_v0 = vmul.f32 0.70710677, %v3203_v41  ;;  %v1146_v48 = vadd.f32 0.00028619796, %v1145_v28 }
 0x36c   :  { %v1157_v49 = vadd.f32 0.001143296, %v1156_v42  ;;  %v1121_v1 = vadd.f32 0.112945676, %v1120_v58  ;;  %v1110_v60 = vadd.f32 0.05243302, %v1109_v54 }
 0x36d   :  { %2167 = vrcp.f32 %v1085_v40  ;;  %v1183_v52 = vmul.f32 %v3208_v0, %v3208_v0  ;;  %v1147_v50 = vmul.f32 %v1146_v48, %v3197_v25  ;;  %v1074_v55 = vadd.f32 1.1283791, %v1073_v59 }
 0x36e   :  { %v1158_v19 = vmul.f32 %v1157_v49, %v3197_v25  ;;  %v1122_v47 = vmul.f32 %v1121_v1, %v3158_v62  ;;  %v1095_v18 = vand.u32 2147483647, %v1085_v40  ;;  %v1097_v31 = vand.u32 2147483648, %v1085_v40 }
 0x36f   :  { %v3217_v2 = vmin.f32 %v1183_v52, 16.0  ;;  %v1148_v51 = vadd.f32 0.0036580483, %v1147_v50  ;;  %v1111_v32 = vmul.f32 %v1110_v60, %v3158_v62  ;;  %vm1091_vm3 = vweird.f32 %v1085_v40 }
 0x370   :  { %v1159_v63 = vadd.f32 0.014752088, %v1158_v19  ;;  %v1123_v30 = vadd.f32 0.4994258, %v1122_v47  ;;  %v1098_v23 = vor.u32 1.1754944e-38, %v1097_v31  ;;  %v1075_v36 = vmul.f32 %v1074_v55, %v3097_v44  ;;  %v3254_v55 = vld [vmem:[%s4191_s17 + $0xf8] sm:$0xff] }
 0x371   :  { %v1185_v57 = vmul.f32 2.1237322e-06, %v3217_v2  ;;  %v1196_v6 = vmul.f32 3.8918573e-05, %v3217_v2  ;;  %v1149_v46 = vmul.f32 %v1148_v51, %v3197_v25  ;;  %vm1096_vm9 = vcmp.eq.f32.partialorder %v1095_v18, 8.507059e+37  ;;  %v3264_v18 = vld [vmem:[%s4191_s17 + $0xf0] sm:$0xff]  ;;  %1457 = vmatpush.msra.mxu2 %v3254_v55 }
 0x372   :  { %v1160_v5 = vmul.f32 %v1159_v63, %v3197_v25  ;;  %v1124_v33 = vmul.f32 %v1123_v30, %v3158_v62  ;;  %v1112_v42 = vadd.f32 0.18741608, %v1111_v32  ;;  %v1055_v19 = vmul.f32 0.5, %v3088_v22  ;;  %1399 = vmatpush.msrb.mxu0 %v3264_v18 }
 0x373   :  { %v2168_v56 = vpop.eup %2167  ;;  %v1186_v27 = vadd.f32 0.00028619796, %v1185_v57  ;;  %v1197_v8 = vadd.f32 0.001143296, %v1196_v6  ;;  %v1150_v28 = vadd.f32 0.05243302, %v1149_v46 }
 0x374   :  { %v1087_v20 = vmul.f32 %v2168_v56, %v1085_v40  ;;  %vm1092_vm2 = vweird.f32 %v2168_v56  ;;  %v1161_v26 = vadd.f32 0.112945676, %v1160_v5  ;;  %v3224_v3 = vadd.f32 1.0, %v1124_v33  ;;  %v3409_v5 = vld [vmem:[%s4191_s17 + $0x1a0] sm:$0xff] }
 0x375   :  { %v1187_v38 = vmul.f32 %v1186_v27, %v3217_v2  ;;  %vm1093_vm4 = vmor %vm1091_vm3, %vm1092_vm2  ;;  %v1198_v37 = vmul.f32 %v1197_v8, %v3217_v2  ;;  %v1151_v1 = vmul.f32 %v1150_v28, %v3197_v25  ;;  %v1113_v44 = vmul.f32 %v1112_v42, %v3158_v62  ;;  %v3273_v27 = vld [vmem:[%s4191_s17 + $0x1f0] sm:$0xff]  ;;  %v3336_v42 = vld [vmem:[%s4191_s17 + $0x1c8] sm:$0xff] }
 0x376   :  { %v1088_v7 = vsub.f32 1.0, %v1087_v20  ;;  %v1162_v4 = vmul.f32 %v1161_v26, %v3197_v25  ;;  %2169 = vrcp.f32 %v3224_v3  ;;  %vm1131_vm11 = vweird.f32 %v3224_v3  ;;  %1428 = vmatpush.msrb.mxu1 %v3273_v27  ;;  %v3326_v28 = vld [vmem:[%s4191_s17 + $0x1d0] sm:$0xff] }
 0x377   :  { %v1188_v40 = vadd.f32 0.0036580483, %v1187_v38  ;;  %v1199_v58 = vadd.f32 0.014752088, %v1198_v37  ;;  %v1137_v30 = vand.u32 2147483648, %v3224_v3  ;;  %v3314_v37 = vld [vmem:[%s4191_s17 + $0x1d8] sm:$0xff] }
 0x378   :  { %v1089_v24 = vmul.f32 %v2168_v56, %v1088_v7  ;;  %v1163_v53 = vadd.f32 0.4994258, %v1162_v4  ;;  %v1152_v51 = vadd.f32 0.18741608, %v1151_v1  ;;  %v1114_v60 = vadd.f32 1.1283791, %v1113_v44 }
 0x379   :  { %v1200_v54 = vmul.f32 %v1199_v58, %v3217_v2  ;;  %v1189_v47 = vmul.f32 %v1188_v40, %v3217_v2  ;;  %v1135_v22 = vand.u32 2147483647, %v3224_v3  ;;  %v3259_v7 = vld [vmem:[%s4191_s17 + $0x1f8] sm:$0xff]  ;;  %v1138_v46 = vor.u32 1.1754944e-38, %v1137_v30  ;;  %v3293_v4 = vld [vmem:[%s4191_s17 + $0xe0] sm:$0xff]  ;;  %v3390_v30 = vld [vmem:[%s4191_s17 + $0xa8] sm:$0xff] }
 0x37a   :  { %v1090_v34 = vadd.f32 %v2168_v56, %v1089_v24  ;;  %v1164_v43 = vmul.f32 %v1163_v53, %v3197_v25  ;;  %1486 = vmatpush.msra.mxu3 %v3259_v7  ;;  %v3278_v24 = vld [vmem:[%s4191_s17 + $0xe8] sm:$0xff]  ;;  %v1153_v8 = vmul.f32 %v1152_v51, %v3197_v25  ;;  %v3303_v25 = vld [vmem:[%s4191_s17 + $0xd8] sm:$0xff]  ;;  %v1115_v38 = vmul.f32 %v1114_v60, %v3141_v45 }
 0x37b   :  { %v1201_v63 = vadd.f32 0.112945676, %v1200_v54  ;;  %v1190_v6 = vadd.f32 0.05243302, %v1189_v47  ;;  %vm1136_vm13 = vcmp.eq.f32.partialorder %v1135_v22, 8.507059e+37  ;;  %1458 = vmatpush.msra.mxu2 %v3278_v24  ;;  %1400 = vmatpush.msrb.mxu0 %v3293_v4  ;;  %v3375_v47 = vld [vmem:[%s4191_s17 + $0xb0] sm:$0xff] }
 0x37c   :  { %v1094_v35 = vsel %vm1093_vm4, %v2168_v56, %v1090_v34  ;;  %v3234_v48 = vadd.f32 1.0, %v1164_v43  ;;  %v2170_v49 = vpop.eup %2169  ;;  %v3298_v34 = vld [vmem:[%s4191_s17 + $0x1e0] sm:$0xff]  ;;  %v1154_v1 = vadd.f32 1.1283791, %v1153_v8  ;;  %v3395_v51 = vld [vmem:[%s4191_s17 + $0x1a8] sm:$0xff]  ;;  %v3437_v8 = vld [vmem:[%s4191_s17 + $0x190] sm:$0xff] }
 0x37d   :  { %v1099_v29 = vsel %vm1096_vm9, %v1098_v23, %v1094_v35  ;;  %v1127_v50 = vmul.f32 %v2170_v49, %v3224_v3  ;;  %vm1132_vm10 = vweird.f32 %v2170_v49  ;;  %v1202_v57 = vmul.f32 %v1201_v63, %v3217_v2  ;;  %v3283_v3 = vld [vmem:[%s4191_s17 + $0x1e8] sm:$0xff]  ;;  %1429 = vmatpush.msrb.mxu1 %v3298_v34  ;;  %1459 = vmatpush.msra.mxu2 %v3303_v25 }
 0x37e   :  { %v1100_v9 = vmul.f32 %v1099_v29, %v1075_v36  ;;  %2171 = vrcp.f32 %v3234_v48  ;;  %vm3245_vm12 = vmor %vm1131_vm11, %vm1132_vm10  ;;  %1487 = vmatpush.msra.mxu3 %v3283_v3  ;;  %v3319_v36 = vld [vmem:[%s4191_s17 + $0xd0] sm:$0xff]  ;;  %v3331_v29 = vld [vmem:[%s4191_s17 + $0xc8] sm:$0xff]  ;;  %v1191_v40 = vmul.f32 %v1190_v6, %v3217_v2  ;;  %v1175_v44 = vand.u32 2147483647, %v3234_v48 }
 0x37f   :  { %v1128_v56 = vsub.f32 1.0, %v1127_v50  ;;  %v1203_v26 = vadd.f32 0.4994258, %v1202_v57  ;;  %1401 = vmatpush.msrb.mxu0 %v3319_v36  ;;  %1430 = vmatpush.msrb.mxu1 %v3326_v28  ;;  %v3362_v50 = vld [vmem:[%s4191_s17 + $0xb8] sm:$0xff]  ;;  %v1056_v63 = vmul.f32 0.5, %v3130_v39  ;;  %vm1171_vm15 = vweird.f32 %v3234_v48 }
 0x380   :  { %v2136_v52 = vclamps-f32 %v1100_v9, 1.0  ;;  %v1177_v9 = vand.u32 2147483648, %v3234_v48  ;;  %1488 = vmatpush.msra.mxu3 %v3314_v37  ;;  %1460 = vmatpush.msra.mxu2 %v3331_v29  ;;  %v1155_v22 = vmul.f32 %v1154_v1, %v3185_v21  ;;  %vm1176_vm1 = vcmp.eq.f32.partialorder %v1175_v44, 8.507059e+37  ;;  %v3425_v21 = vld [vmem:[%s4191_s17 + $0x198] sm:$0xff] }
 0x381   :  { %v1129_v62 = vmul.f32 %v2170_v49, %v1128_v56  ;;  %v1204_v53 = vmul.f32 %v1203_v26, %v3217_v2  ;;  %v3380_v56 = vld [vmem:[%s4191_s17 + $0x1b0] sm:$0xff]  ;;  %v3420_v26 = vld [vmem:[%s4191_s17 + $0x98] sm:$0xff]  ;;  %v1057_v1 = vmul.f32 0.5, %v3168_v61  ;;  %v3494_v61 = vld [vmem:[%s4191_s17 + $0x68] sm:$0xff]  ;;  %vm1709_vm11 = vcmask 1040384  }
 0x382   :  { %v1223_v59 = vadd.f32 1.0, %v2136_v52  ;;  %v3352_v52 = vld [vmem:[%s4191_s17 + $0x1c0] sm:$0xff]  ;;  %1489 = vmatpush.msra.mxu3 %v3336_v42  ;;  %v1178_v39 = vor.u32 1.1754944e-38, %v1177_v9  ;;  %1461 = vmatpush.msra.mxu2 %v3362_v50  ;;  %v3468_v9 = vld [vmem:[%s4191_s17 + $0x78] sm:$0xff] }
 0x383   :  { %v1130_v31 = vadd.f32 %v2170_v49, %v1129_v62  ;;  %v3340_v58 = vadd.f32 1.0, %v1204_v53  ;;  %1431 = vmatpush.msrb.mxu1 %v3352_v52  ;;  %v3404_v62 = vld [vmem:[%s4191_s17 + $0xa0] sm:$0xff]  ;;  %v3448_v53 = vld [vmem:[%s4191_s17 + $0x188] sm:$0xff] }
 0x384   :  { %v1227_v20 = vmul.f32 %v1223_v59, %v1055_v19  ;;  %v3266_v33 = vpop.eup %2171  ;;  %v3367_v19 = vld [vmem:[%s4191_s17 + $0x1b8] sm:$0xff]  ;;  %1462 = vmatpush.msra.mxu2 %v3390_v30 }
 0x385   :  { %v1167_v32 = vmul.f32 %v3266_v33, %v3234_v48  ;;  %v1134_v23 = vsel %vm3245_vm12, %v2170_v49, %v1130_v31  ;;  %v3347_v49 = vld [vmem:[%s4191_s17 + $0xc0] sm:$0xff]  ;;  %vm1172_vm14 = vweird.f32 %v3266_v33  ;;  %2173 = vrcp.f32 %v3340_v58  ;;  %1490 = vmatpush.msra.mxu3 %v3367_v19  ;;  %1432 = vmatpush.msrb.mxu1 %v3380_v56 }
 0x386   :  { %1285 = vmatmul.f32.vlgmr.msrb.gmra.mxu2 %v1227_v20  ;;  %1314 = vmatmul.f32.vlgmr.msrb.gmra.mxu3 %v1227_v20  ;;  %v1139_v45 = vsel %vm1136_vm13, %v1138_v46, %v1134_v23  ;;  %vm1173_vm0 = vmor %vm1171_vm15, %vm1172_vm14  ;;  %v1192_v48 = vadd.f32 0.18741608, %v1191_v40  ;;  %v3432_v46 = vld [vmem:[%s4191_s17 + $0x90] sm:$0xff]  ;;  %v3443_v23 = vld [vmem:[%s4191_s17 + $0x88] sm:$0xff]  ;;  %vm1211_vm5 = vweird.f32 %v3340_v58 }
 0x387   :  { %v1168_v35 = vsub.f32 1.0, %v1167_v32  ;;  %v1140_v43 = vmul.f32 %v1139_v45, %v1115_v38  ;;  %1402 = vmatpush.msrb.mxu0 %v3347_v49  ;;  %1491 = vmatpush.msra.mxu3 %v3395_v51  ;;  %v3473_v40 = vld [vmem:[%s4191_s17 + $0x178] sm:$0xff] }
 0x388   :  { %1433 = vmatpush.msrb.mxu1 %v3409_v5  ;;  %v1193_v38 = vmul.f32 %v1192_v48, %v3217_v2  ;;  %1463 = vmatpush.msra.mxu2 %v3420_v26  ;;  %v3456_v2 = vld [vmem:[%s4191_s17 + $0x80] sm:$0xff] }
 0x389   :  { %v1169_v54 = vmul.f32 %v3266_v33, %v1168_v35  ;;  %v2137_v59 = vclamps-f32 %v1140_v43, 1.0  ;;  %1403 = vmatpush.msrb.mxu0 %v3375_v47  ;;  %1492 = vmatpush.msra.mxu3 %v3425_v21  ;;  %v3461_v43 = vld [vmem:[%s4191_s17 + $0x180] sm:$0xff] }
 0x38a   :  { %1434 = vmatpush.msrb.mxu1 %v3437_v8  ;;  %1464 = vmatpush.msra.mxu2 %v3443_v23 }
 0x38b   :  { %v1170_v20 = vadd.f32 %v3266_v33, %v1169_v54  ;;  %v1224_v60 = vadd.f32 1.0, %v2137_v59  ;;  %1404 = vmatpush.msrb.mxu0 %v3404_v62  ;;  %v2174_v32 = vpop.eup %2173  ;;  %1493 = vmatpush.msra.mxu3 %v3448_v53  ;;  %v3481_v59 = vld [vmem:[%s4191_s17 + $0x70] sm:$0xff] }
 0x38c   :  { %v1207_v35 = vmul.f32 %v2174_v32, %v3340_v58  ;;  %1435 = vmatpush.msrb.mxu1 %v3461_v43  ;;  %vm1212_vm7 = vweird.f32 %v2174_v32  ;;  %1465 = vmatpush.msra.mxu2 %v3468_v9 }
 0x38d   :  { %v1174_v57 = vsel %vm1173_vm0, %v3266_v33, %v1170_v20  ;;  %v1228_v6 = vmul.f32 %v1224_v60, %v1056_v63  ;;  %1405 = vmatpush.msrb.mxu0 %v3432_v46  ;;  %v3486_v63 = vld [vmem:[%s4191_s17 + $0x170] sm:$0xff]  ;;  %v1194_v20 = vadd.f32 1.1283791, %v1193_v38  ;;  %v1217_v60 = vand.u32 2147483648, %v3340_v58  ;;  %1494 = vmatpush.msra.mxu3 %v3473_v40  ;;  %v3522_v38 = vld [vmem:[%s4191_s17 + $0x58] sm:$0xff]  ;;  %vm1213_vm6 = vmor %vm1211_vm5, %vm1212_vm7 }
 0x38e   :  { %v1179_v31 = vsel %vm1176_vm1, %v1178_v39, %v1174_v57  ;;  %v1208_v44 = vsub.f32 1.0, %v1207_v35  ;;  %v3499_v39 = vld [vmem:[%s4191_s17 + $0x168] sm:$0xff]  ;;  %v1215_v57 = vand.u32 2147483647, %v3340_v58  ;;  %1436 = vmatpush.msrb.mxu1 %v3486_v63  ;;  %1466 = vmatpush.msra.mxu2 %v3494_v61  ;;  %v3533_v58 = vld [vmem:[%s4191_s17 + $0x50] sm:$0xff] }
 0x38f   :  { %v1180_v33 = vmul.f32 %v1179_v31, %v1155_v22  ;;  %1288 = vmatmul.f32.gmra.mxu2 %v1228_v6  ;;  %1317 = vmatmul.f32.gmra.mxu3 %v1228_v6  ;;  %v3509_v6 = vld [vmem:[%s4191_s17 + $0x60] sm:$0xff]  ;;  %v1218_v35 = vor.u32 1.1754944e-38, %v1217_v60  ;;  %v3546_v60 = vld [vmem:[%s4191_s17 + $0x48] sm:$0xff] }
 0x390   :  { %1406 = vmatpush.msrb.mxu0 %v3456_v2  ;;  %v1209_v22 = vmul.f32 %v2174_v32, %v1208_v44  ;;  %v3514_v31 = vld [vmem:[%s4191_s17 + $0x160] sm:$0xff]  ;;  %1495 = vmatpush.msra.mxu3 %v3499_v39  ;;  %vm1216_vm8 = vcmp.eq.f32.partialorder %v1215_v57, 8.507059e+37  ;;  %v3570_v57 = vld [vmem:[%s4191_s17 + $0x38] sm:$0xff] }
 0x391   :  { %v2138_v45 = vclamps-f32 %v1180_v33, 1.0  ;;  %1437 = vmatpush.msrb.mxu1 %v3514_v31  ;;  %1467 = vmatpush.msra.mxu2 %v3522_v38 }
 0x392   :  { %1407 = vmatpush.msrb.mxu0 %v3481_v59  ;;  %v1210_v33 = vadd.f32 %v2174_v32, %v1209_v22 }
 0x393   :  { %v1225_v54 = vadd.f32 1.0, %v2138_v45  ;;  %v3527_v45 = vld [vmem:[%s4191_s17 + $0x158] sm:$0xff]  ;;  %1468 = vmatpush.msra.mxu2 %v3546_v60 }
 0x394   :  { %v1214_v44 = vsel %vm1213_vm6, %v2174_v32, %v1210_v33  ;;  %1408 = vmatpush.msrb.mxu0 %v3509_v6  ;;  %1496 = vmatpush.msra.mxu3 %v3527_v45  ;;  %v3563_v32 = vld [vmem:[%s4191_s17 + $0x140] sm:$0xff]  ;;  %v3575_v33 = vld [vmem:[%s4191_s17 + $0x138] sm:$0xff] }
 0x395   :  { %v1229_v48 = vmul.f32 %v1225_v54, %v1057_v1  ;;  %v3538_v1 = vld [vmem:[%s4191_s17 + $0x150] sm:$0xff]  ;;  %v1195_v54 = vmul.f32 %v1194_v20, %v3208_v0  ;;  %v1219_v22 = vsel %vm1216_vm8, %v1218_v35, %v1214_v44  ;;  %v3558_v0 = vld [vmem:[%s4191_s17 + $0x40] sm:$0xff]  ;;  %1469 = vmatpush.msra.mxu2 %v3570_v57 }
 0x396   :  { %1409 = vmatpush.msrb.mxu0 %v3533_v58  ;;  %1438 = vmatpush.msrb.mxu1 %v3538_v1  ;;  %v3582_v35 = vld [vmem:[%s4191_s17 + $0x30] sm:$0xff] }
 0x397   :  { %1291 = vmatmul.f32.gmra.mxu2 %v1229_v48  ;;  %1320 = vmatmul.f32.gmra.mxu3 %v1229_v48  ;;  %v3551_v48 = vld [vmem:[%s4191_s17 + $0x148] sm:$0xff]  ;;  %v1220_v20 = vmul.f32 %v1219_v22, %v1195_v54  ;;  %v3587_v54 = vld [vmem:[%s4191_s17 + $0x130] sm:$0xff] }
 0x398   :  { %1497 = vmatpush.msra.mxu3 %v3551_v48  ;;  %1410 = vmatpush.msrb.mxu0 %v3558_v0  ;;  %v3594_v22 = vld [vmem:[%s4191_s17 + $0x28] sm:$0xff] }
 0x399   :  { %v2139_v44 = vclamps-f32 %v1220_v20, 1.0  ;;  %1439 = vmatpush.msrb.mxu1 %v3563_v32  ;;  %v1058_v20 = vmul.f32 0.5, %v3203_v41  ;;  %1470 = vmatpush.msra.mxu2 %v3594_v22  ;;  %v3616_v41 = vld [vmem:[%s4191_s17 + $0x120] sm:$0xff] }
 0x39a   :  { %1498 = vmatpush.msra.mxu3 %v3575_v33  ;;  %1411 = vmatpush.msrb.mxu0 %v3582_v35  ;;  %4229 = vst [vmem:[#allocation9_spill] sm:$0xff] %v3616_v41 }
 0x39b   :  { %v1226_v16 = vadd.f32 1.0, %v2139_v44  ;;  %1440 = vmatpush.msrb.mxu1 %v3587_v54  ;;  %v3621_v44 = vld [vmem:[%s4191_s17 + $0x18] sm:$0xff] }
 0x39c   :  { %1499 = vmatpush.msra.mxu3 %v3599_v17  ;;  %1412 = vmatpush.msrb.mxu0 %v3611_v14 }
 0x39d   :  { %v1230_v15 = vmul.f32 %v1226_v16, %v1058_v20  ;;  %1441 = vmatpush.msrb.mxu1 %v3616_v41  ;;  %v3633_v16 = vld [vmem:[%s4191_s17 + $0x10] sm:$0xff]  ;;  %1471 = vmatpush.msra.mxu2 %v3621_v44  ;;  %v3655_v41 = vld [vmem:[%s4191_s17] sm:$0xff] }
 0x39e   :  { %v3638_v20 = vld [vmem:[%s4191_s17 + $0x110] sm:$0xff]  ;;  %1413 = vmatpush.msrb.mxu0 %v3633_v16 }
 0x39f   :  { %1294 = vmatmul.f32.gmra.mxu2 %v1230_v15  ;;  %1323 = vmatmul.f32.gmra.mxu3 %v1230_v15  ;;  %v3628_v15 = vld [vmem:[%s4191_s17 + $0x118] sm:$0xff] }
 0x3a0   :  { %4230 = vst [vmem:[#allocation10_spill] sm:$0xff] %v3628_v15  ;;  %1500 = vmatpush.msra.mxu3 %v3628_v15  ;;  %1442 = vmatpush.msrb.mxu1 %v3638_v20  ;;  %v3662_v15 = vld [vmem:[%s4191_s17 + $0x100] sm:$0xff] }
 0x3a1   :  { %1472 = vmatpush.msra.mxu2 %v3645_v13  ;;  %1414 = vmatpush.msrb.mxu0 %v3655_v41 }
 0x3a2   :  { %1501 = vmatpush.msra.mxu3 %v3650_v12  ;;  %1443 = vmatpush.msrb.mxu1 %v3662_v15 }
 0x3a3   :  { %1599 = vmatpush.msrb.mxu2 %v3254_v55  ;;  %1541 = vmatpush.msra.mxu0 %v3264_v18  ;;  %v1263_v55 = vld [vmem:[%s4192_s14] sm:$0x3] }
 0x3a4   :  { %1628 = vmatpush.msrb.mxu3 %v3259_v7  ;;  %1570 = vmatpush.msra.mxu1 %v3273_v27  ;;  %v1265_v7 = vperm.slane %v1263_v55, 0  ;;  %v1266_v18 = vperm.slane %v1263_v55, 1 }
 0x3a5   :  { %1600 = vmatpush.msrb.mxu2 %v3278_v24  ;;  %1542 = vmatpush.msra.mxu0 %v3293_v4 }
 0x3a6   :  { %1629 = vmatpush.msrb.mxu3 %v3283_v3  ;;  %1571 = vmatpush.msra.mxu1 %v3298_v34 }
 0x3a7   :  { %1601 = vmatpush.msrb.mxu2 %v3303_v25  ;;  %1543 = vmatpush.msra.mxu0 %v3319_v36 }
 0x3a8   :  { %1630 = vmatpush.msrb.mxu3 %v3314_v37  ;;  %1572 = vmatpush.msra.mxu1 %v3326_v28  ;;  %v4231_v37 = vld [vmem:[#allocation9_spill] sm:$0xff]  ;;  %v4233_v28 = vld [vmem:[#allocation3_spill] sm:$0xff] }
 0x3a9   :  { %1602 = vmatpush.msrb.mxu2 %v3331_v29  ;;  %1544 = vmatpush.msra.mxu0 %v3347_v49 }
 0x3aa   :  { %1631 = vmatpush.msrb.mxu3 %v3336_v42  ;;  %1573 = vmatpush.msra.mxu1 %v3352_v52  ;;  %v4234_v42 = vld [vmem:[#allocation4_spill] sm:$0xff] }
 0x3ab   :  { %1603 = vmatpush.msrb.mxu2 %v3362_v50  ;;  %1545 = vmatpush.msra.mxu0 %v3375_v47 }
 0x3ac   :  { %1632 = vmatpush.msrb.mxu3 %v3367_v19  ;;  %1574 = vmatpush.msra.mxu1 %v3380_v56  ;;  %v4235_v19 = vld [vmem:[#allocation5_spill] sm:$0xff]  ;;  %v4236_v56 = vld [vmem:[#allocation6_spill] sm:$0xff] }
 0x3ad   :  { %1604 = vmatpush.msrb.mxu2 %v3390_v30  ;;  %1546 = vmatpush.msra.mxu0 %v3404_v62 }
 0x3ae   :  { %1633 = vmatpush.msrb.mxu3 %v3395_v51  ;;  %1575 = vmatpush.msra.mxu1 %v3409_v5 }
 0x3af   :  { %1605 = vmatpush.msrb.mxu2 %v3420_v26  ;;  %1547 = vmatpush.msra.mxu0 %v3432_v46 }
 0x3b0   :  { %1634 = vmatpush.msrb.mxu3 %v3425_v21  ;;  %1576 = vmatpush.msra.mxu1 %v3437_v8  ;;  %v4237_v21 = vld [vmem:[#allocation7_spill] sm:$0xff]  ;;  %v4238_v8 = vld [vmem:[#allocation8_spill] sm:$0xff] }
 0x3b1   :  { %1606 = vmatpush.msrb.mxu2 %v3443_v23  ;;  %1548 = vmatpush.msra.mxu0 %v3456_v2 }
 0x3b2   :  { %1635 = vmatpush.msrb.mxu3 %v3448_v53  ;;  %1577 = vmatpush.msra.mxu1 %v3461_v43 }
 0x3b3   :  { %1607 = vmatpush.msrb.mxu2 %v3468_v9  ;;  %1549 = vmatpush.msra.mxu0 %v3481_v59 }
 0x3b4   :  { %1636 = vmatpush.msrb.mxu3 %v3473_v40  ;;  %1578 = vmatpush.msra.mxu1 %v3486_v63 }
 0x3b5   :  { %1608 = vmatpush.msrb.mxu2 %v3494_v61  ;;  %1550 = vmatpush.msra.mxu0 %v3509_v6 }
 0x3b6   :  { %1637 = vmatpush.msrb.mxu3 %v3499_v39  ;;  %1579 = vmatpush.msra.mxu1 %v3514_v31 }
 0x3b7   :  { %1609 = vmatpush.msrb.mxu2 %v3522_v38  ;;  %1551 = vmatpush.msra.mxu0 %v3533_v58 }
 0x3b8   :  { %1638 = vmatpush.msrb.mxu3 %v3527_v45  ;;  %1580 = vmatpush.msra.mxu1 %v3538_v1 }
 0x3b9   :  { %1610 = vmatpush.msrb.mxu2 %v3546_v60  ;;  %1552 = vmatpush.msra.mxu0 %v3558_v0 }
 0x3ba   :  { %1639 = vmatpush.msrb.mxu3 %v3551_v48  ;;  %1581 = vmatpush.msra.mxu1 %v3563_v32 }
 0x3bb   :  { %1611 = vmatpush.msrb.mxu2 %v3570_v57  ;;  %1553 = vmatpush.msra.mxu0 %v3582_v35 }
 0x3bc   :  { %1640 = vmatpush.msrb.mxu3 %v3575_v33  ;;  %1582 = vmatpush.msra.mxu1 %v3587_v54 }
 0x3bd   :  { %1612 = vmatpush.msrb.mxu2 %v3594_v22  ;;  %1554 = vmatpush.msra.mxu0 %v3611_v14 }
 0x3be   :  { %1641 = vmatpush.msrb.mxu3 %v3599_v17  ;;  %1583 = vmatpush.msra.mxu1 %v4231_v37 }
 0x3bf   :  { %1613 = vmatpush.msrb.mxu2 %v3621_v44  ;;  %1555 = vmatpush.msra.mxu0 %v3633_v16 }
 0x3c0   :  { %1584 = vmatpush.msra.mxu1 %v3638_v20 }
 0x3c1   :  { %1614 = vmatpush.msrb.mxu2 %v3645_v13  ;;  %1556 = vmatpush.msra.mxu0 %v3655_v41 }
 0x3c2   :  { %1585 = vmatpush.msra.mxu1 %v3662_v15 }
 0x409   :  { %v1286_v27 = vpop.f32.mrf.mxu2  ;;  %v1315_v24 = vpop.f32.mrf.mxu3 }
 0x40a   :  { %v1287_v3 = vadd.f32 %v1286_v27, %v1265_v7  ;;  %v1316_v4 = vadd.f32 %v1315_v24, %v1266_v18 }
 0x40c   :  { %v3724_v34 = vadd.f32 %v1287_v3, %v2508_v10  ;;  %v3727_v25 = vadd.f32 %v1316_v4, %v2510_v11  ;;  %v4232_v10 = vld [vmem:[#allocation10_spill] sm:$0xff] }
 0x40d   :  { %1642 = vmatpush.msrb.mxu3 %v4232_v10 }
 0x40e   :  { %1415 = vmatmul.f32.vlgmr.msrb.gmra.mxu0 %v3724_v34  ;;  %1444 = vmatmul.f32.vlgmr.msrb.gmra.mxu1 %v3727_v25  ;;  %v1533_v53 = vmul.f32 %v3724_v34, %v3724_v34  ;;  %v1534_v2 = vmul.f32 %v3727_v25, %v3727_v25 }
 0x40f   :  { %1473 = vmatmul.f32.vlgmr.msra.gmra.mxu2 %v3724_v34  ;;  %1502 = vmatmul.f32.vlgmr.msra.gmra.mxu3 %v3727_v25 }
 0x410   :  { %1643 = vmatpush.msrb.mxu3 %v3650_v12 }
 0x412   :  { %v1289_v11 = vpop.f32.mrf.mxu2  ;;  %v1318_v14 = vpop.f32.mrf.mxu3 }
 0x413   :  { %v1290_v17 = vadd.f32 %v1289_v11, %v1265_v7  ;;  %v1319_v36 = vadd.f32 %v1318_v14, %v1266_v18 }
 0x415   :  { %v3746_v29 = vadd.f32 %v1290_v17, %v4233_v28  ;;  %v3749_v49 = vadd.f32 %v1319_v36, %v4234_v42 }
 0x417   :  { %1418 = vmatmul.f32.gmra.mxu0 %v3746_v29  ;;  %1447 = vmatmul.f32.gmra.mxu1 %v3749_v49  ;;  %v1535_v43 = vmul.f32 %v3746_v29, %v3746_v29  ;;  %v1536_v9 = vmul.f32 %v3749_v49, %v3749_v49 }
 0x418   :  { %1476 = vmatmul.f32.gmra.mxu2 %v3746_v29  ;;  %1505 = vmatmul.f32.gmra.mxu3 %v3749_v49 }
 0x41a   :  { %v1292_v12 = vpop.f32.mrf.mxu2  ;;  %v1321_v13 = vpop.f32.mrf.mxu3 }
 0x41b   :  { %v1293_v52 = vadd.f32 %v1292_v12, %v1265_v7  ;;  %v1322_v50 = vadd.f32 %v1321_v13, %v1266_v18 }
 0x41d   :  { %v3756_v47 = vadd.f32 %v1293_v52, %v4235_v19  ;;  %v3759_v30 = vadd.f32 %v1322_v50, %v4236_v56 }
 0x41f   :  { %1421 = vmatmul.f32.gmra.mxu0 %v3756_v47  ;;  %1450 = vmatmul.f32.gmra.mxu1 %v3759_v30  ;;  %v1537_v40 = vmul.f32 %v3756_v47, %v3756_v47  ;;  %v1538_v59 = vmul.f32 %v3759_v30, %v3759_v30 }
 0x420   :  { %1479 = vmatmul.f32.gmra.mxu2 %v3756_v47  ;;  %1508 = vmatmul.f32.gmra.mxu3 %v3759_v30 }
 0x422   :  { %v1295_v51 = vpop.f32.mrf.mxu2  ;;  %v1324_v62 = vpop.f32.mrf.mxu3 }
 0x423   :  { %v1296_v5 = vadd.f32 %v1295_v51, %v1265_v7  ;;  %v1325_v26 = vadd.f32 %v1324_v62, %v1266_v18 }
 0x425   :  { %v3766_v46 = vadd.f32 %v1296_v5, %v4237_v21  ;;  %v3769_v23 = vadd.f32 %v1325_v26, %v4238_v8 }
 0x427   :  { %1424 = vmatmul.f32.gmra.mxu0 %v3766_v46  ;;  %1453 = vmatmul.f32.gmra.mxu1 %v3769_v23  ;;  %v1539_v63 = vmul.f32 %v3766_v46, %v3766_v46  ;;  %v1540_v61 = vmul.f32 %v3769_v23, %v3769_v23 }
 0x428   :  { %1482 = vmatmul.f32.gmra.mxu2 %v3766_v46  ;;  %1511 = vmatmul.f32.gmra.mxu3 %v3769_v23 }
 0x42f   :  { %1557 = vmatmul.f32.vlgmr.msra.gmra.mxu0 %v1533_v53  ;;  %1586 = vmatmul.f32.vlgmr.msra.gmra.mxu1 %v1534_v2 }
 0x430   :  { %1615 = vmatmul.f32.vlgmr.msrb.gmra.mxu2 %v1533_v53  ;;  %1644 = vmatmul.f32.vlgmr.msrb.gmra.mxu3 %v1534_v2 }
 0x437   :  { %1560 = vmatmul.f32.gmra.mxu0 %v1535_v43  ;;  %1589 = vmatmul.f32.gmra.mxu1 %v1536_v9 }
 0x438   :  { %1618 = vmatmul.f32.gmra.mxu2 %v1535_v43  ;;  %1647 = vmatmul.f32.gmra.mxu3 %v1536_v9 }
 0x43f   :  { %1563 = vmatmul.f32.gmra.mxu0 %v1537_v40  ;;  %1592 = vmatmul.f32.gmra.mxu1 %v1538_v59 }
 0x440   :  { %1621 = vmatmul.f32.gmra.mxu2 %v1537_v40  ;;  %1650 = vmatmul.f32.gmra.mxu3 %v1538_v59 }
 0x447   :  { %1566 = vmatmul.f32.gmra.mxu0 %v1539_v63  ;;  %1595 = vmatmul.f32.gmra.mxu1 %v1540_v61 }
 0x448   :  { %1624 = vmatmul.f32.gmra.mxu2 %v1539_v63  ;;  %1653 = vmatmul.f32.gmra.mxu3 %v1540_v61 }
 0x48b   :  { %v1416_v39 = vpop.f32.mrf.mxu0  ;;  %v1445_v6 = vpop.f32.mrf.mxu1 }
 0x48c   :  { %v1446_v16 = vadd.f32 %v1445_v6, %v1416_v39 }
 0x492   :  { %v1474_v31 = vpop.f32.mrf.mxu2  ;;  %v1503_v38 = vpop.f32.mrf.mxu3 }
 0x493   :  { %v1504_v11 = vadd.f32 %v1503_v38, %v1474_v31 }
 0x494   :  { %v1419_v45 = vpop.f32.mrf.mxu0  ;;  %v1448_v58 = vpop.f32.mrf.mxu1 }
 0x495   :  { %v1449_v15 = vadd.f32 %v1448_v58, %v1419_v45 }
 0x497   :  { %v1515_v55 = vadd.f32 %v1449_v15, %v1446_v16 }
 0x49b   :  { %v1477_v1 = vpop.f32.mrf.mxu2  ;;  %v1506_v60 = vpop.f32.mrf.mxu3 }
 0x49c   :  { %v1422_v48 = vpop.f32.mrf.mxu0  ;;  %v1451_v0 = vpop.f32.mrf.mxu1  ;;  %v1507_v3 = vadd.f32 %v1506_v60, %v1477_v1 }
 0x49d   :  { %v1452_v20 = vadd.f32 %v1451_v0, %v1422_v48 }
 0x49e   :  { %v1524_v17 = vadd.f32 %v1507_v3, %v1504_v11 }
 0x49f   :  { %v1516_v18 = vadd.f32 %v1515_v55, %v1452_v20 }
 0x4a3   :  { %v1480_v32 = vpop.f32.mrf.mxu2  ;;  %v1509_v57 = vpop.f32.mrf.mxu3 }
 0x4a4   :  { %v1425_v33 = vpop.f32.mrf.mxu0  ;;  %v1454_v35 = vpop.f32.mrf.mxu1  ;;  %v1510_v14 = vadd.f32 %v1509_v57, %v1480_v32 }
 0x4a5   :  { %v1455_v7 = vadd.f32 %v1454_v35, %v1425_v33 }
 0x4a6   :  { %v1525_v42 = vadd.f32 %v1524_v17, %v1510_v14 }
 0x4a7   :  { %v1517_v10 = vadd.f32 %v1516_v18, %v1455_v7 }
 0x4a9   :  { %v1518_v28 = vrot.slane %v1517_v10, 4 }
 0x4ab   :  { %v1483_v54 = vpop.f32.mrf.mxu2  ;;  %v1512_v22 = vpop.f32.mrf.mxu3  ;;  %v1519_v56 = vadd.f32 %v1518_v28, %v1517_v10 }
 0x4ac   :  { %v1558_v41 = vpop.f32.mrf.mxu0  ;;  %v1587_v44 = vpop.f32.mrf.mxu1  ;;  %v1513_v36 = vadd.f32 %v1512_v22, %v1483_v54 }
 0x4ad   :  { %v1520_v5 = vrot.slane %v1519_v56, 2  ;;  %v1588_v26 = vadd.f32 %v1587_v44, %v1558_v41 }
 0x4ae   :  { %v1526_v52 = vadd.f32 %v1525_v42, %v1513_v36 }
 0x4af   :  { %v1521_v59 = vadd.f32 %v1520_v5, %v1519_v56 }
 0x4b0   :  { %v1527_v62 = vrot.slane %v1526_v52, 4 }
 0x4b1   :  { %v1522_v58 = vrot.slane %v1521_v59, 1 }
 0x4b2   :  { %v1528_v43 = vadd.f32 %v1527_v62, %v1526_v52 }
 0x4b3   :  { %v1616_v27 = vpop.f32.mrf.mxu2  ;;  %v1645_v24 = vpop.f32.mrf.mxu3  ;;  %v1523_v54 = vadd.f32 %v1522_v58, %v1521_v59 }
 0x4b4   :  { %v1561_v4 = vpop.f32.mrf.mxu0  ;;  %v1590_v37 = vpop.f32.mrf.mxu1  ;;  %v1529_v31 = vrot.slane %v1528_v43, 2  ;;  %v1646_v38 = vadd.f32 %v1645_v24, %v1616_v27 }
 0x4b5   :  { %v1591_v51 = vadd.f32 %v1590_v37, %v1561_v4  ;;  %v1675_v20 = vmul.f32 0.001953125, %v1523_v54 }
 0x4b6   :  { %v1530_v57 = vadd.f32 %v1529_v31, %v1528_v43 }
 0x4b7   :  { %v1657_v8 = vadd.f32 %v1591_v51, %v1588_v26  ;;  %v1679_v3 = vmul.f32 %v1675_v20, %v1675_v20 }
 0x4b8   :  { %v1531_v15 = vrot.slane %v1530_v57, 1 }
 0x4ba   :  { %v1532_v27 = vadd.f32 %v1531_v15, %v1530_v57 }
 0x4bb   :  { %v1619_v12 = vpop.f32.mrf.mxu2  ;;  %v1648_v13 = vpop.f32.mrf.mxu3 }
 0x4bc   :  { %v1564_v50 = vpop.f32.mrf.mxu0  ;;  %v1593_v19 = vpop.f32.mrf.mxu1  ;;  %v1649_v39 = vadd.f32 %v1648_v13, %v1619_v12  ;;  %v1676_v11 = vmul.f32 0.001953125, %v1532_v27 }
 0x4bd   :  { %v1594_v21 = vadd.f32 %v1593_v19, %v1564_v50 }
 0x4be   :  { %v1666_v60 = vadd.f32 %v1649_v39, %v1646_v38  ;;  %v1680_v28 = vmul.f32 %v1676_v11, %v1676_v11  ;;  %v1713_v38 = vld [vmem:[%s4194_s16] sm:$0x3] }
 0x4bf   :  { %v1658_v63 = vadd.f32 %v1657_v8, %v1594_v21 }
 0x4c3   :  { %v1622_v53 = vpop.f32.mrf.mxu2  ;;  %v1651_v2 = vpop.f32.mrf.mxu3 }
 0x4c4   :  { %v1567_v9 = vpop.f32.mrf.mxu0  ;;  %v1596_v40 = vpop.f32.mrf.mxu1  ;;  %v1652_v45 = vadd.f32 %v1651_v2, %v1622_v53 }
 0x4c5   :  { %v1597_v61 = vadd.f32 %v1596_v40, %v1567_v9  ;;  %v1683_v9 = vld [vmem:[%s4193_s15] sm:$0x3] }
 0x4c6   :  { %v1667_v33 = vadd.f32 %v1666_v60, %v1652_v45 }
 0x4c7   :  { %v1659_v6 = vadd.f32 %v1658_v63, %v1597_v61 }
 0x4c9   :  { %v1660_v1 = vrot.slane %v1659_v6, 4 }
 0x4cb   :  { %v1661_v48 = vadd.f32 %v1660_v1, %v1659_v6  ;;  %v1625_v0 = vpop.f32.mrf.mxu2  ;;  %v1654_v32 = vpop.f32.mrf.mxu3 }
 0x4cc   :  { %v1655_v35 = vadd.f32 %v1654_v32, %v1625_v0 }
 0x4cd   :  { %v1662_v22 = vrot.slane %v1661_v48, 2 }
 0x4ce   :  { %v1668_v41 = vadd.f32 %v1667_v33, %v1655_v35 }
 0x4cf   :  { %v1663_v44 = vadd.f32 %v1662_v22, %v1661_v48 }
 0x4d0   :  { %v1669_v16 = vrot.slane %v1668_v41, 4 }
 0x4d1   :  { %v1664_v55 = vrot.slane %v1663_v44, 1 }
 0x4d2   :  { %v1670_v7 = vadd.f32 %v1669_v16, %v1668_v41 }
 0x4d3   :  { %v1665_v18 = vadd.f32 %v1664_v55, %v1663_v44 }
 0x4d4   :  { %v1671_v24 = vrot.slane %v1670_v7, 2 }
 0x4d5   :  { %v1677_v4 = vmul.f32 0.001953125, %v1665_v18 }
 0x4d6   :  { %v1672_v37 = vadd.f32 %v1671_v24, %v1670_v7 }
 0x4d7   :  { %v1681_v10 = vsub.f32 %v1677_v4, %v1679_v3 }
 0x4d8   :  { %v1673_v14 = vrot.slane %v1672_v37, 1 }
 0x4d9   :  { %v1684_v17 = vadd.f32 1e-05, %v1681_v10 }
 0x4da   :  { %v1674_v36 = vadd.f32 %v1673_v14, %v1672_v37 }
 0x4db   :  { %2175 = vrsqrt.f32 %v1684_v17  ;;  %vm1692_vm10 = vweird.f32 %v1684_v17 }
 0x4dc   :  { %v1678_v42 = vmul.f32 0.001953125, %v1674_v36 }
 0x4de   :  { %v1682_v12 = vsub.f32 %v1678_v42, %v1680_v28 }
 0x4e0   :  { %v1685_v13 = vadd.f32 1e-05, %v1682_v12 }
 0x4e1   :  { %v2176_v52 = vpop.eup %2175 }
 0x4e2   :  { %v1687_v50 = vmul.f32 %v2176_v52, %v1684_v17  ;;  %2177 = vrsqrt.f32 %v1685_v13  ;;  %vm1693_vm3 = vweird.f32 %v2176_v52  ;;  %vm1702_vm4 = vweird.f32 %v1685_v13 }
 0x4e3   :  { %vm1694_vm12 = vmor %vm1692_vm10, %vm1693_vm3 }
 0x4e4   :  { %v1688_v19 = vmul.f32 %v2176_v52, %v1687_v50 }
 0x4e6   :  { %v1689_v51 = vmul.f32 0.5, %v1688_v19 }
 0x4e8   :  { %v2178_v56 = vpop.eup %2177  ;;  %v1690_v26 = vsub.f32 1.5, %v1689_v51 }
 0x4e9   :  { %v1697_v62 = vmul.f32 %v2178_v56, %v1685_v13  ;;  %vm1703_vm2 = vweird.f32 %v2178_v56 }
 0x4ea   :  { %v1691_v53 = vmul.f32 %v2176_v52, %v1690_v26  ;;  %vm1704_vm9 = vmor %vm1702_vm4, %vm1703_vm2 }
 0x4eb   :  { %v1698_v5 = vmul.f32 %v2178_v56, %v1697_v62 }
 0x4ec   :  { %v1695_v59 = vsel %vm1694_vm12, %v2176_v52, %v1691_v53 }
 0x4ed   :  { %v1699_v21 = vmul.f32 0.5, %v1698_v5 }
 0x4ef   :  { %v1700_v8 = vsub.f32 1.5, %v1699_v21 }
 0x4f1   :  { %v1701_v2 = vmul.f32 %v2178_v56, %v1700_v8 }
 0x4f3   :  { %v1705_v43 = vsel %vm1704_vm9, %v2178_v56, %v1701_v2 }
 0x4f4   :  { %v1708_v40 = vrot.slane %v1705_v43, 7 }
 0x4f6   :  { %v1710_v63 = vsel %vm1709_vm11, %v1695_v59, %v1708_v40 }
 0x4f7   :  { %v1712_v61 = vmul.f32 %v1710_v63, %v1683_v9 }
 0x4f9   :  { %v3794_v39 = vperm.slane %v1712_v61, 0  ;;  %v3796_v6 = vperm.slane %v1712_v61, 1 }
 0x4fb   :  { %v1720_v31 = vmul.f32 %v3796_v6, %v1676_v11  ;;  %v1719_v45 = vmul.f32 %v3794_v39, %v1675_v20  ;;  %v1727_v48 = vmul.f32 %v3794_v39, %v3724_v34  ;;  %v1728_v0 = vmul.f32 %v3796_v6, %v3727_v25 }
 0x4fc   :  { %v1729_v32 = vmul.f32 %v3794_v39, %v3746_v29  ;;  %v1730_v35 = vmul.f32 %v3796_v6, %v3749_v49  ;;  %v1731_v21 = vmul.f32 %v3794_v39, %v3756_v47 }
 0x4fd   :  { %v1723_v58 = vrot.slane %v1720_v31, 7 }
 0x4ff   :  { %v1724_v1 = vsel %vm1709_vm11, %v1719_v45, %v1723_v58 }
 0x500   :  { %v1726_v60 = vsub.f32 %v1713_v38, %v1724_v1 }
 0x502   :  { %v3809_v57 = vperm.slane %v1726_v60, 0  ;;  %v3811_v33 = vperm.slane %v1726_v60, 1 }
 0x504   :  { %v3816_v54 = vadd.f32 %v3809_v57, %v1727_v48  ;;  %v3819_v22 = vadd.f32 %v3811_v33, %v1728_v0  ;;  %v3822_v34 = vadd.f32 %v3809_v57, %v1729_v32  ;;  %v3825_v25 = vadd.f32 %v3811_v33, %v1730_v35 }
 0x505   :  { %v3872_v59 = vadd.f32 %v3809_v57, %v1731_v21 }
 0x506   :  { %v3828_v29 = vmul.f32 0.70710677, %v3816_v54  ;;  %v3831_v41 = vmul.f32 0.70710677, %v3819_v22  ;;  %v3834_v49 = vmul.f32 0.70710677, %v3822_v34 }
 0x507   :  { %v3837_v44 = vmul.f32 0.70710677, %v3825_v25 }
 0x508   :  { %v1764_v15 = vmul.f32 %v3828_v29, %v3828_v29  ;;  %v1804_v16 = vmul.f32 %v3831_v41, %v3831_v41  ;;  %v1844_v20 = vmul.f32 %v3834_v49, %v3834_v49 }
 0x509   :  { %v1884_v55 = vmul.f32 %v3837_v44, %v3837_v44 }
 0x50a   :  { %v3847_v7 = vmin.f32 %v1764_v15, 16.0  ;;  %v3849_v18 = vmin.f32 %v1804_v16, 16.0  ;;  %v3851_v27 = vmin.f32 %v1844_v20, 16.0  ;;  %v1732_v16 = vmul.f32 %v3796_v6, %v3759_v30 }
 0x50b   :  { %v3853_v24 = vmin.f32 %v1884_v55, 16.0  ;;  %v3885_v20 = vmul.f32 0.70710677, %v3872_v59 }
 0x50c   :  { %v1766_v3 = vmul.f32 2.1237322e-06, %v3847_v7  ;;  %v1777_v4 = vmul.f32 3.8918573e-05, %v3847_v7  ;;  %v1806_v37 = vmul.f32 2.1237322e-06, %v3849_v18 }
 0x50d   :  { %v1817_v10 = vmul.f32 3.8918573e-05, %v3849_v18  ;;  %v1846_v11 = vmul.f32 2.1237322e-06, %v3851_v27  ;;  %v1857_v14 = vmul.f32 3.8918573e-05, %v3851_v27 }
 0x50e   :  { %v1767_v17 = vadd.f32 0.00028619796, %v1766_v3  ;;  %v1778_v36 = vadd.f32 0.001143296, %v1777_v4  ;;  %v1807_v28 = vadd.f32 0.00028619796, %v1806_v37 }
 0x50f   :  { %v1818_v42 = vadd.f32 0.001143296, %v1817_v10  ;;  %v1847_v12 = vadd.f32 0.00028619796, %v1846_v11  ;;  %v1858_v13 = vadd.f32 0.001143296, %v1857_v14  ;;  %v3891_v11 = vadd.f32 %v3811_v33, %v1732_v16 }
 0x510   :  { %v1768_v52 = vmul.f32 %v1767_v17, %v3847_v7  ;;  %v1779_v50 = vmul.f32 %v1778_v36, %v3847_v7  ;;  %v1808_v19 = vmul.f32 %v1807_v28, %v3849_v18  ;;  %v1886_v56 = vmul.f32 2.1237322e-06, %v3853_v24 }
 0x511   :  { %v1819_v51 = vmul.f32 %v1818_v42, %v3849_v18  ;;  %v1848_v62 = vmul.f32 %v1847_v12, %v3851_v27  ;;  %v1859_v5 = vmul.f32 %v1858_v13, %v3851_v27  ;;  %v1897_v26 = vmul.f32 3.8918573e-05, %v3853_v24 }
 0x512   :  { %v1769_v8 = vadd.f32 0.0036580483, %v1768_v52  ;;  %v1780_v53 = vadd.f32 0.014752088, %v1779_v50  ;;  %v1809_v2 = vadd.f32 0.0036580483, %v1808_v19  ;;  %v1733_v13 = vmul.f32 %v3794_v39, %v3766_v46 }
 0x513   :  { %v1820_v43 = vadd.f32 0.014752088, %v1819_v51  ;;  %v1849_v9 = vadd.f32 0.0036580483, %v1848_v62  ;;  %v1860_v40 = vadd.f32 0.014752088, %v1859_v5  ;;  %v1924_v50 = vmul.f32 %v3885_v20, %v3885_v20 }
 0x514   :  { %v1770_v63 = vmul.f32 %v1769_v8, %v3847_v7  ;;  %v1781_v61 = vmul.f32 %v1780_v53, %v3847_v7  ;;  %v1887_v31 = vadd.f32 0.00028619796, %v1886_v56  ;;  %v1810_v38 = vmul.f32 %v1809_v2, %v3849_v18 }
 0x515   :  { %v1821_v45 = vmul.f32 %v1820_v43, %v3849_v18  ;;  %v1861_v47 = vmul.f32 %v1860_v40, %v3851_v27  ;;  %v1898_v58 = vadd.f32 0.001143296, %v1897_v26  ;;  %v1850_v60 = vmul.f32 %v1849_v9, %v3851_v27 }
 0x516   :  { %v1782_v1 = vadd.f32 0.112945676, %v1781_v61  ;;  %v1888_v48 = vmul.f32 %v1887_v31, %v3853_v24  ;;  %v1771_v0 = vadd.f32 0.05243302, %v1770_v63  ;;  %v1811_v3 = vadd.f32 0.05243302, %v1810_v38 }
 0x517   :  { %v1822_v32 = vadd.f32 0.112945676, %v1821_v45  ;;  %v1862_v35 = vadd.f32 0.112945676, %v1861_v47  ;;  %v1899_v15 = vmul.f32 %v1898_v58, %v3853_v24  ;;  %v1851_v17 = vadd.f32 0.05243302, %v1850_v60 }
 0x518   :  { %v1783_v55 = vmul.f32 %v1782_v1, %v3847_v7  ;;  %v1889_v36 = vadd.f32 0.0036580483, %v1888_v48  ;;  %v1772_v28 = vmul.f32 %v1771_v0, %v3847_v7  ;;  %v1812_v19 = vmul.f32 %v1811_v3, %v3849_v18 }
 0x519   :  { %v1823_v4 = vmul.f32 %v1822_v32, %v3849_v18  ;;  %v1863_v37 = vmul.f32 %v1862_v35, %v3851_v27  ;;  %v1900_v10 = vadd.f32 0.014752088, %v1899_v15  ;;  %v3904_v5 = vmul.f32 0.70710677, %v3891_v11 }
 0x51a   :  { %v1784_v14 = vadd.f32 0.4994258, %v1783_v55  ;;  %v1852_v21 = vmul.f32 %v1851_v17, %v3851_v27  ;;  %v1890_v46 = vmul.f32 %v1889_v36, %v3853_v24  ;;  %v1773_v39 = vadd.f32 0.18741608, %v1772_v28 }
 0x51b   :  { %v1824_v30 = vadd.f32 0.4994258, %v1823_v4  ;;  %v1864_v42 = vadd.f32 0.4994258, %v1863_v37  ;;  %v1901_v12 = vmul.f32 %v1900_v10, %v3853_v24  ;;  %v3915_v2 = vadd.f32 %v3809_v57, %v1733_v13 }
 0x51c   :  { %v1785_v52 = vmul.f32 %v1784_v14, %v3847_v7  ;;  %v1813_v43 = vadd.f32 0.18741608, %v1812_v19  ;;  %v3920_v40 = vmin.f32 %v1924_v50, 16.0  ;;  %v1734_v63 = vmul.f32 %v3796_v6, %v3769_v23 }
 0x51d   :  { %v1825_v56 = vmul.f32 %v1824_v30, %v3849_v18  ;;  %v1865_v51 = vmul.f32 %v1864_v42, %v3851_v27  ;;  %v1902_v62 = vadd.f32 0.112945676, %v1901_v12  ;;  %v1853_v61 = vadd.f32 0.18741608, %v1852_v21 }
 0x51e   :  { %v3906_v26 = vadd.f32 1.0, %v1785_v52  ;;  %v1891_v31 = vadd.f32 0.05243302, %v1890_v46  ;;  %v1964_v38 = vmul.f32 %v3904_v5, %v3904_v5  ;;  %v1774_v57 = vmul.f32 %v1773_v39, %v3847_v7 }
 0x51f   :  { %v3910_v8 = vadd.f32 1.0, %v1825_v56  ;;  %v3912_v53 = vadd.f32 1.0, %v1865_v51  ;;  %v1903_v9 = vmul.f32 %v1902_v62, %v3853_v24  ;;  %v3929_v45 = vadd.f32 %v3811_v33, %v1734_v63 }
 0x520   :  { %2179 = vrcp.f32 %v3906_v26  ;;  %v3932_v47 = vmul.f32 0.70710677, %v3915_v2  ;;  %v1814_v58 = vmul.f32 %v1813_v43, %v3849_v18  ;;  %v1926_v23 = vmul.f32 2.1237322e-06, %v3920_v40 }
 0x521   :  { %2181 = vrcp.f32 %v3910_v8  ;;  %v1904_v1 = vadd.f32 0.4994258, %v1903_v9  ;;  %v1854_v60 = vmul.f32 %v1853_v61, %v3851_v27  ;;  %v1892_v48 = vmul.f32 %v1891_v31, %v3853_v24 }
 0x522   :  { %2183 = vrcp.f32 %v3912_v53  ;;  %v1937_v7 = vmul.f32 3.8918573e-05, %v3920_v40  ;;  %v3941_v0 = vmin.f32 %v1964_v38, 16.0  ;;  %v1775_v32 = vadd.f32 1.1283791, %v1774_v57 }
 0x523   :  { %v1905_v18 = vmul.f32 %v1904_v1, %v3853_v24  ;;  %v1927_v15 = vadd.f32 0.00028619796, %v1926_v23  ;;  %v3949_v16 = vmul.f32 0.5, %v3816_v54  ;;  %v3952_v27 = vmul.f32 0.5, %v3819_v22 }
 0x524   :  { %v3955_v55 = vmul.f32 0.5, %v3822_v34  ;;  %v3958_v3 = vmul.f32 0.70710677, %v3929_v45  ;;  %v1815_v37 = vadd.f32 1.1283791, %v1814_v58  ;;  %v2004_v34 = vmul.f32 %v3932_v47, %v3932_v47 }
 0x525   :  { %v3962_v10 = vadd.f32 1.0, %v1905_v18  ;;  %v1928_v14 = vmul.f32 %v1927_v15, %v3920_v40  ;;  %v1938_v17 = vadd.f32 0.001143296, %v1937_v7  ;;  %v1893_v22 = vadd.f32 0.18741608, %v1892_v48 }
 0x526   :  { %v3936_v6 = vpop.eup %2179  ;;  %v3970_v28 = vmul.f32 %v1775_v32, %v3828_v29  ;;  %v1855_v30 = vadd.f32 1.1283791, %v1854_v60  ;;  %v1966_v42 = vmul.f32 2.1237322e-06, %v3941_v0  ;;  %vm1792_vm13 = vweird.f32 %v3906_v26 }
 0x527   :  { %v3943_v33 = vpop.eup %2181  ;;  %v1788_v35 = vmul.f32 %v3936_v6, %v3906_v26  ;;  %2185 = vrcp.f32 %v3962_v10  ;;  %v1796_v12 = vand.u32 2147483647, %v3906_v26  ;;  %v1798_v13 = vand.u32 2147483648, %v3906_v26 }
 0x528   :  { %v3960_v4 = vpop.eup %2183  ;;  %v1828_v54 = vmul.f32 %v3943_v33, %v3910_v8  ;;  %v3980_v50 = vmul.f32 %v1815_v37, %v3831_v41  ;;  %v1836_v29 = vand.u32 2147483647, %v3910_v8  ;;  %v1929_v19 = vadd.f32 0.0036580483, %v1928_v14 }
 0x529   :  { %v1789_v36 = vsub.f32 1.0, %v1788_v35  ;;  %v1868_v52 = vmul.f32 %v3960_v4, %v3912_v53  ;;  %v1939_v56 = vmul.f32 %v1938_v17, %v3920_v40  ;;  %v1838_v21 = vand.u32 2147483648, %v3910_v8 }
 0x52a   :  { %v1829_v62 = vsub.f32 1.0, %v1828_v54  ;;  %v1894_v46 = vmul.f32 %v1893_v22, %v3853_v24  ;;  %v3988_v39 = vmul.f32 %v1855_v30, %v3834_v49  ;;  %v1878_v43 = vand.u32 2147483648, %v3912_v53 }
 0x52b   :  { %v1790_v51 = vmul.f32 %v3936_v6, %v1789_v36  ;;  %v1940_v9 = vadd.f32 0.014752088, %v1939_v56  ;;  %v1967_v41 = vadd.f32 0.00028619796, %v1966_v42  ;;  %v1799_v63 = vor.u32 1.1754944e-38, %v1798_v13 }
 0x52c   :  { %v1869_v61 = vsub.f32 1.0, %v1868_v52  ;;  %v1876_v31 = vand.u32 2147483647, %v3912_v53  ;;  %v3992_v38 = vmin.f32 %v2004_v34, 16.0  ;;  %vm1793_vm14 = vweird.f32 %v3936_v6 }
 0x52d   :  { %v3994_v57 = vpop.eup %2185  ;;  %vm3997_vm15 = vcmp.eq.f32.partialorder %v1796_v12, 8.507059e+37  ;;  %vm1832_vm0 = vweird.f32 %v3910_v8  ;;  %v1930_v49 = vmul.f32 %v1929_v19, %v3920_v40  ;;  %v1941_v24 = vmul.f32 %v1940_v9, %v3920_v40  ;;  %vm4018_vm6 = vmor %vm1792_vm13, %vm1793_vm14 }
 0x52e   :  { %v1977_v1 = vmul.f32 3.8918573e-05, %v3941_v0  ;;  %v1791_v23 = vadd.f32 %v3936_v6, %v1790_v51  ;;  %v1830_v60 = vmul.f32 %v3943_v33, %v1829_v62  ;;  %v1895_v48 = vadd.f32 1.1283791, %v1894_v46 }
 0x52f   :  { %v1908_v7 = vmul.f32 %v3994_v57, %v3962_v10  ;;  %v1839_v32 = vor.u32 1.1754944e-38, %v1838_v21  ;;  %vm1872_vm1 = vweird.f32 %v3912_v53  ;;  %v1879_v35 = vor.u32 1.1754944e-38, %v1878_v43 }
 0x530   :  { %v1942_v18 = vadd.f32 0.112945676, %v1941_v24  ;;  %v1968_v15 = vmul.f32 %v1967_v41, %v3941_v0  ;;  %vm1833_vm7 = vweird.f32 %v3943_v33  ;;  %v1870_v37 = vmul.f32 %v3960_v4, %v1869_v61 }
 0x531   :  { %vm1873_vm5 = vweird.f32 %v3960_v4  ;;  %v1909_v14 = vsub.f32 1.0, %v1908_v7  ;;  %v1931_v36 = vadd.f32 0.05243302, %v1930_v49  ;;  %v1978_v22 = vadd.f32 0.001143296, %v1977_v1  ;;  %vm4054_vm3 = vmor %vm1832_vm0, %vm1833_vm7 }
 0x532   :  { %v1943_v54 = vmul.f32 %v1942_v18, %v3920_v40  ;;  %v2006_v34 = vmul.f32 2.1237322e-06, %v3992_v38  ;;  %v1795_v30 = vsel %vm4018_vm6, %v3936_v6, %v1791_v23  ;;  %v1831_v42 = vadd.f32 %v3943_v33, %v1830_v60  ;;  %vm4073_vm9 = vmor %vm1872_vm1, %vm1873_vm5 }
 0x533   :  { %vm4028_vm8 = vcmp.eq.f32.partialorder %v1836_v29, 8.507059e+37  ;;  %v4033_v26 = vmul.f32 %v1895_v48, %v3837_v44  ;;  %v2017_v13 = vmul.f32 3.8918573e-05, %v3992_v38  ;;  %vm4036_vm2 = vcmp.eq.f32.partialorder %v1876_v31, 8.507059e+37 }
 0x534   :  { %v1944_v19 = vadd.f32 0.4994258, %v1943_v54  ;;  %v1969_v56 = vadd.f32 0.0036580483, %v1968_v15  ;;  %v1979_v51 = vmul.f32 %v1978_v22, %v3941_v0  ;;  %v2007_v6 = vadd.f32 0.00028619796, %v2006_v34 }
 0x535   :  { %v1871_v62 = vadd.f32 %v3960_v4, %v1870_v37  ;;  %v1910_v29 = vmul.f32 %v3994_v57, %v1909_v14  ;;  %v2018_v21 = vadd.f32 0.001143296, %v2017_v13  ;;  %v2044_v44 = vmul.f32 %v3958_v3, %v3958_v3 }
 0x536   :  { %v1932_v46 = vmul.f32 %v1931_v36, %v3920_v40  ;;  %v1945_v43 = vmul.f32 %v1944_v19, %v3920_v40  ;;  %v1980_v9 = vadd.f32 0.014752088, %v1979_v51  ;;  %v2008_v41 = vmul.f32 %v2007_v6, %v3992_v38 }
 0x537   :  { %v1800_v61 = vsel %vm3997_vm15, %v1799_v63, %v1795_v30  ;;  %vm1912_vm4 = vweird.f32 %v3962_v10  ;;  %v1918_v49 = vand.u32 2147483648, %v3962_v10  ;;  %v2019_v24 = vmul.f32 %v2018_v21, %v3992_v38 }
 0x538   :  { %v1835_v1 = vsel %vm4054_vm3, %v3943_v33, %v1831_v42  ;;  %v4064_v58 = vadd.f32 1.0, %v1945_v43  ;;  %v1981_v63 = vmul.f32 %v1980_v9, %v3941_v0  ;;  %v4067_v23 = vmin.f32 %v2044_v44, 16.0 }
 0x539   :  { %v1911_v60 = vadd.f32 %v3994_v57, %v1910_v29  ;;  %vm1913_vm10 = vweird.f32 %v3994_v57  ;;  %v2009_v48 = vadd.f32 0.0036580483, %v2008_v41  ;;  %v2020_v33 = vadd.f32 0.014752088, %v2019_v24 }
 0x53a   :  { %v1875_v7 = vsel %vm4073_vm9, %v3960_v4, %v1871_v62  ;;  %v1933_v18 = vadd.f32 0.18741608, %v1932_v46  ;;  %2187 = vrcp.f32 %v4064_v58  ;;  %v1970_v15 = vmul.f32 %v1969_v56, %v3941_v0  ;;  %vm4090_vm11 = vmor %vm1912_vm4, %vm1913_vm10 }
 0x53b   :  { %v1801_v53 = vmul.f32 %v1800_v61, %v3970_v28  ;;  %v1916_v37 = vand.u32 2147483647, %v3962_v10  ;;  %v1919_v14 = vor.u32 1.1754944e-38, %v1918_v49  ;;  %v1982_v17 = vadd.f32 0.112945676, %v1981_v63 }
 0x53c   :  { %v1840_v36 = vsel %vm4028_vm8, %v1839_v32, %v1835_v1  ;;  %v2010_v4 = vmul.f32 %v2009_v48, %v3992_v38  ;;  %v2021_v22 = vmul.f32 %v2020_v33, %v3992_v38  ;;  %v2046_v34 = vmul.f32 2.1237322e-06, %v4067_v23 }
 0x53d   :  { %v1880_v28 = vsel %vm4036_vm2, %v1879_v35, %v1875_v7  ;;  %v1915_v30 = vsel %vm4090_vm11, %v3994_v57, %v1911_v60  ;;  %v1983_v32 = vmul.f32 %v1982_v17, %v3941_v0  ;;  %v2057_v10 = vmul.f32 3.8918573e-05, %v4067_v23 }
 0x53e   :  { %v1934_v42 = vmul.f32 %v1933_v18, %v3920_v40  ;;  %v1971_v12 = vadd.f32 0.05243302, %v1970_v15  ;;  %v2022_v13 = vadd.f32 0.112945676, %v2021_v22  ;;  %v2047_v19 = vadd.f32 0.00028619796, %v2046_v34 }
 0x53f   :  { %v1841_v56 = vmul.f32 %v1840_v36, %v3980_v50  ;;  %vm1917_vm12 = vcmp.eq.f32.partialorder %v1916_v37, 8.507059e+37  ;;  %v1984_v51 = vadd.f32 0.4994258, %v1983_v32  ;;  %v2058_v6 = vadd.f32 0.001143296, %v2057_v10 }
 0x540   :  { %v2188_v52 = vpop.eup %2187  ;;  %v2140_v35 = vclamps-f32 %v1801_v53, 1.0  ;;  %v1920_v62 = vsel %vm1917_vm12, %v1919_v14, %v1915_v30  ;;  %v2011_v29 = vadd.f32 0.05243302, %v2010_v4  ;;  %v2023_v57 = vmul.f32 %v2022_v13, %v3992_v38 }
 0x541   :  { %v1881_v21 = vmul.f32 %v1880_v28, %v3988_v39  ;;  %v1948_v44 = vmul.f32 %v2188_v52, %v4064_v58  ;;  %v1985_v40 = vmul.f32 %v1984_v51, %v3941_v0  ;;  %v2048_v46 = vmul.f32 %v2047_v19, %v4067_v23 }
 0x542   :  { %v1935_v43 = vadd.f32 1.1283791, %v1934_v42  ;;  %v1972_v50 = vmul.f32 %v1971_v12, %v3941_v0  ;;  %v2024_v9 = vadd.f32 0.4994258, %v2023_v57  ;;  %v2059_v41 = vmul.f32 %v2058_v6, %v4067_v23 }
 0x543   :  { %v1921_v61 = vmul.f32 %v1920_v62, %v4033_v26  ;;  %v1949_v31 = vsub.f32 1.0, %v1948_v44  ;;  %v1956_v49 = vand.u32 2147483647, %v4064_v58  ;;  %v4115_v24 = vadd.f32 1.0, %v1985_v40 }
 0x544   :  { %v1958_v39 = vand.u32 2147483648, %v4064_v58  ;;  %v2012_v1 = vmul.f32 %v2011_v29, %v3992_v38  ;;  %v2025_v63 = vmul.f32 %v2024_v9, %v3992_v38  ;;  %v2060_v8 = vadd.f32 0.014752088, %v2059_v41 }
 0x545   :  { %v1950_v60 = vmul.f32 %v2188_v52, %v1949_v31  ;;  %vm1953_vm13 = vweird.f32 %v2188_v52  ;;  %2189 = vrcp.f32 %v4115_v24  ;;  %v2049_v48 = vadd.f32 0.0036580483, %v2048_v46 }
 0x546   :  { %v2141_v33 = vclamps-f32 %v1841_v56, 1.0  ;;  %v2142_v7 = vclamps-f32 %v1881_v21, 1.0  ;;  %v1973_v26 = vadd.f32 0.18741608, %v1972_v50  ;;  %v4121_v18 = vadd.f32 1.0, %v2025_v63 }
 0x547   :  { %v1936_v15 = vmul.f32 %v1935_v43, %v3885_v20  ;;  %v1951_v53 = vadd.f32 %v2188_v52, %v1950_v60  ;;  %vm1952_vm14 = vweird.f32 %v4064_v58  ;;  %v2061_v37 = vmul.f32 %v2060_v8, %v4067_v23 }
 0x548   :  { %v2143_v14 = vclamps-f32 %v1921_v61, 1.0  ;;  %vm1954_vm15 = vmor %vm1952_vm14, %vm1953_vm13  ;;  %v1959_v17 = vor.u32 1.1754944e-38, %v1958_v39  ;;  %v2013_v36 = vadd.f32 0.18741608, %v2012_v1  ;;  %2191 = vrcp.f32 %v4121_v18 }
 0x549   :  { %v1955_v54 = vsel %vm1954_vm15, %v2188_v52, %v1951_v53  ;;  %vm1957_vm0 = vcmp.eq.f32.partialorder %v1956_v49, 8.507059e+37  ;;  %v2050_v4 = vmul.f32 %v2049_v48, %v4067_v23  ;;  %v2084_v22 = vadd.f32 1.0, %v2140_v35 }
 0x54a   :  { %v1960_v34 = vsel %vm1957_vm0, %v1959_v17, %v1955_v54  ;;  %v2062_v28 = vadd.f32 0.112945676, %v2061_v37  ;;  %v2085_v30 = vadd.f32 1.0, %v2141_v33  ;;  %v2086_v20 = vadd.f32 1.0, %v2142_v7 }
 0x54b   :  { %v2190_v32 = vpop.eup %2189  ;;  %v1751_v58 = vmul.f32 0.5, %v3825_v25  ;;  %v1752_v10 = vmul.f32 0.5, %v3872_v59  ;;  %v1961_v42 = vmul.f32 %v1960_v34, %v1936_v15  ;;  %v1974_v12 = vmul.f32 %v1973_v26, %v3941_v0 }
 0x54c   :  { %v1988_v13 = vmul.f32 %v2190_v32, %v4115_v24  ;;  %v2014_v19 = vmul.f32 %v2013_v36, %v3992_v38  ;;  %v2063_v56 = vmul.f32 %v2062_v28, %v4067_v23  ;;  %v2087_v51 = vadd.f32 1.0, %v2143_v14 }
 0x54d   :  { %v2144_v6 = vclamps-f32 %v1961_v42, 1.0  ;;  %v2051_v52 = vadd.f32 0.05243302, %v2050_v4  ;;  %v2092_v35 = vmul.f32 %v2084_v22, %v3949_v16  ;;  %v2093_v62 = vmul.f32 %v2085_v30, %v3952_v27 }
 0x54e   :  { %v2192_v29 = vpop.eup %2191  ;;  %v1989_v25 = vsub.f32 1.0, %v1988_v13  ;;  %v2064_v57 = vadd.f32 0.4994258, %v2063_v56  ;;  %v2094_v59 = vmul.f32 %v2086_v20, %v3955_v55  ;;  %v2095_v21 = vmul.f32 %v2087_v51, %v1751_v58 }
 0x54f   :  { %v1975_v0 = vadd.f32 1.1283791, %v1974_v12  ;;  %v1998_v44 = vand.u32 2147483648, %v4115_v24  ;;  %v2028_v38 = vmul.f32 %v2192_v29, %v4121_v18  ;;  %v2088_v40 = vadd.f32 1.0, %v2144_v6  ;;  %2100 = vst [vmem:[%s4195_s18] sm:$0xff] %v2092_v35 }
 0x550   :  { %v1990_v46 = vmul.f32 %v2190_v32, %v1989_v25  ;;  %vm1993_vm1 = vweird.f32 %v2190_v32  ;;  %v1996_v16 = vand.u32 2147483647, %v4115_v24  ;;  %v2065_v27 = vmul.f32 %v2064_v57, %v4067_v23  ;;  %2101 = vst [vmem:[%s4195_s18 + $0x8] sm:$0xff] %v2093_v62 }
 0x551   :  { %vm1992_vm7 = vweird.f32 %v4115_v24  ;;  %v2015_v55 = vadd.f32 1.1283791, %v2014_v19  ;;  %v2029_v43 = vsub.f32 1.0, %v2028_v38  ;;  %v2096_v50 = vmul.f32 %v2088_v40, %v1752_v10  ;;  %2102 = vst [vmem:[%s4195_s18 + $0x10] sm:$0xff] %v2094_v59 }
 0x552   :  { %v1991_v9 = vadd.f32 %v2190_v32, %v1990_v46  ;;  %v2038_v41 = vand.u32 2147483648, %v4121_v18  ;;  %v2052_v61 = vmul.f32 %v2051_v52, %v4067_v23  ;;  %v2066_v31 = vadd.f32 1.0, %v2065_v27  ;;  %2103 = vst [vmem:[%s4195_s18 + $0x18] sm:$0xff] %v2095_v21  ;;  %vm1994_vm5 = vmor %vm1992_vm7, %vm1993_vm1 }
 0x553   :  { %v1999_v49 = vor.u32 1.1754944e-38, %v1998_v44  ;;  %v2030_v24 = vmul.f32 %v2192_v29, %v2029_v43  ;;  %vm2033_vm6 = vweird.f32 %v2192_v29  ;;  %v2036_v39 = vand.u32 2147483647, %v4121_v18  ;;  %2104 = vst [vmem:[%s4195_s18 + $0x20] sm:$0xff] %v2096_v50 }
 0x554   :  { %v1976_v1 = vmul.f32 %v1975_v0, %v3904_v5  ;;  %v1995_v63 = vsel %vm1994_vm5, %v2190_v32, %v1991_v9  ;;  %vm1997_vm8 = vcmp.eq.f32.partialorder %v1996_v16, 8.507059e+37  ;;  %2193 = vrcp.f32 %v2066_v31 }
 0x555   :  { %v2000_v8 = vsel %vm1997_vm8, %v1999_v49, %v1995_v63  ;;  %v2031_v60 = vadd.f32 %v2192_v29, %v2030_v24  ;;  %vm2032_vm2 = vweird.f32 %v4121_v18  ;;  %v2039_v33 = vor.u32 1.1754944e-38, %v2038_v41 }
 0x556   :  { %v2001_v48 = vmul.f32 %v2000_v8, %v1976_v1  ;;  %vm2034_vm3 = vmor %vm2032_vm2, %vm2033_vm6  ;;  %v2053_v7 = vadd.f32 0.18741608, %v2052_v61  ;;  %v2016_v26 = vmul.f32 %v2015_v55, %v3932_v47  ;;  %vm2037_vm4 = vcmp.eq.f32.partialorder %v2036_v39, 8.507059e+37 }
 0x557   :  { %v2035_v15 = vsel %vm2034_vm3, %v2192_v29, %v2031_v60  ;;  %v1753_v5 = vmul.f32 0.5, %v3891_v11  ;;  %v1754_v34 = vmul.f32 0.5, %v3915_v2  ;;  %v2078_v47 = vand.u32 2147483648, %v2066_v31 }
 0x558   :  { %v2145_v53 = vclamps-f32 %v2001_v48, 1.0  ;;  %v2040_v37 = vsel %vm2037_vm4, %v2039_v33, %v2035_v15  ;;  %v2054_v36 = vmul.f32 %v2053_v7, %v4067_v23  ;;  %v2076_v58 = vand.u32 2147483647, %v2066_v31 }
 0x559   :  { %v2041_v14 = vmul.f32 %v2040_v37, %v2016_v26  ;;  %vm2072_vm10 = vweird.f32 %v2066_v31  ;;  %v2079_v2 = vor.u32 1.1754944e-38, %v2078_v47  ;;  %v1755_v56 = vmul.f32 0.5, %v3929_v45 }
 0x55a   :  { %v2194_v17 = vpop.eup %2193  ;;  %v2089_v54 = vadd.f32 1.0, %v2145_v53  ;;  %v2055_v20 = vadd.f32 1.1283791, %v2054_v36  ;;  %vm2077_vm12 = vcmp.eq.f32.partialorder %v2076_v58, 8.507059e+37 }
 0x55b   :  { %v2146_v4 = vclamps-f32 %v2041_v14, 1.0  ;;  %v2068_v22 = vmul.f32 %v2194_v17, %v2066_v31  ;;  %vm2073_vm9 = vweird.f32 %v2194_v17 }
 0x55c   :  { %v2097_v18 = vmul.f32 %v2089_v54, %v1753_v5  ;;  %vm2074_vm11 = vmor %vm2072_vm10, %vm2073_vm9  ;;  %v2056_v23 = vmul.f32 %v2055_v20, %v3958_v3 }
 0x55d   :  { %v2069_v28 = vsub.f32 1.0, %v2068_v22  ;;  %v2090_v30 = vadd.f32 1.0, %v2146_v4 }
 0x55e   :  { %2105 = vst [vmem:[%s4195_s18 + $0x28] sm:$0xff] %v2097_v18 }
 0x55f   :  { %v2070_v32 = vmul.f32 %v2194_v17, %v2069_v28  ;;  %v2098_v11 = vmul.f32 %v2090_v30, %v1754_v34 }
 0x561   :  { %v2071_v10 = vadd.f32 %v2194_v17, %v2070_v32  ;;  %2106 = vst [vmem:[%s4195_s18 + $0x30] sm:$0xff] %v2098_v11 }
 0x563   :  { %v2075_v42 = vsel %vm2074_vm11, %v2194_v17, %v2071_v10 }
 0x564   :  { %v2080_v12 = vsel %vm2077_vm12, %v2079_v2, %v2075_v42 }
 0x565   :  { %v2081_v13 = vmul.f32 %v2080_v12, %v2056_v23 }
 0x567   :  { %v2147_v19 = vclamps-f32 %v2081_v13, 1.0 }
 0x569   :  { %v2091_v51 = vadd.f32 1.0, %v2147_v19 }
 0x56b   :  { %v2099_v6 = vmul.f32 %v2091_v51, %v1755_v56 }
 0x56d   :  { %2107 = vst [vmem:[%s4195_s18 + $0x38] sm:$0xff] %v2099_v6 }

// kernel: decoder_forward.5
= control target key start
LH: loop header
LB: loop body
LE: loop exit
PB: predicated region body
PF: predicated region fallthrough
CT: control target
= control target key end

     0   :  { %v25_v42 = vlaneseq  ;;  %v94_v47 = vld [vmem:[#allocation2 + $0x38] sm:$0x80]  ;;  %v95_v48 = vld [vmem:[#allocation2 + $0x8] sm:$0x80]  ;;  %vm156_vm0 = vcmask 1040384   ;;  %vm349_vm3 = vcmask 1046528   ;;  %s1038_s1 = inlined_call_operand.vmem [shape: f32[256,48], index: 1, kind: input, shape index: {}]   ;;  %s1039_s2 = inlined_call_operand.vmem [shape: f32[256,48], index: 2, kind: input, shape index: {}]   ;;  %s1040_s0 = inlined_call_operand.vmem [shape: f32[32,256], index: 0, kind: input, shape index: {}]   ;;  %s1041_s3 = inlined_call_operand.vmem [shape: f32[256,48], index: 3, kind: input, shape index: {}]   ;;  %s1042_s4 = inlined_call_operand.vmem [shape: f32[32,48], index: 4, kind: output, shape index: {}]  }
   0x1   :  { %v206_v0 = vld [vmem:[%s1038_s1 + $0x78] sm:$0xff]  ;;  %v205_v4 = vld [vmem:[%s1038_s1 + $0x70] sm:$0xff]  ;;  %v204_v8 = vld [vmem:[%s1038_s1 + $0x68] sm:$0xff]  ;;  %v157_v63 = vrot.slane %v94_v47, 7  ;;  %vm554_vm9 = vcmask 392192  }
   0x2   :  { %v222_v1 = vld [vmem:[%s1038_s1 + $0xf8] sm:$0xff]  ;;  %223 = vmatpush.msra.mxu0 %v206_v0  ;;  %v221_v5 = vld [vmem:[%s1038_s1 + $0xf0] sm:$0xff]  ;;  %v220_v9 = vld [vmem:[%s1038_s1 + $0xe8] sm:$0xff]  ;;  %v803_v54 = vshrl.u32 %v25_v42, 7  ;;  %v160_v0 = vrot.slane %v95_v48, 7 }
   0x3   :  { %v129_v2 = vld [vmem:[%s1039_s2 + $0x78] sm:$0xff]  ;;  %252 = vmatpush.msra.mxu1 %v222_v1  ;;  %v128_v6 = vld [vmem:[%s1039_s2 + $0x70] sm:$0xff]  ;;  %v127_v10 = vld [vmem:[%s1039_s2 + $0x68] sm:$0xff] }
   0x4   :  { %v145_v3 = vld [vmem:[%s1039_s2 + $0xf8] sm:$0xff]  ;;  %281 = vmatpush.msra.mxu2 %v129_v2  ;;  %v144_v7 = vld [vmem:[%s1039_s2 + $0xf0] sm:$0xff]  ;;  %224 = vmatpush.msra.mxu0 %v205_v4  ;;  %v143_v11 = vld [vmem:[%s1039_s2 + $0xe8] sm:$0xff]  ;;  %v34_v4 = vand.u32 15, %v803_v54 }
   0x5   :  { %310 = vmatpush.msra.mxu3 %v145_v3  ;;  %253 = vmatpush.msra.mxu1 %v221_v5  ;;  %v203_v12 = vld [vmem:[%s1038_s1 + $0x60] sm:$0xff]  ;;  %v202_v16 = vld [vmem:[%s1038_s1 + $0x58] sm:$0xff]  ;;  %v201_v20 = vld [vmem:[%s1038_s1 + $0x50] sm:$0xff] }
   0x6   :  { %282 = vmatpush.msra.mxu2 %v128_v6  ;;  %v219_v13 = vld [vmem:[%s1038_s1 + $0xe0] sm:$0xff]  ;;  %225 = vmatpush.msra.mxu0 %v204_v8  ;;  %v218_v17 = vld [vmem:[%s1038_s1 + $0xd8] sm:$0xff]  ;;  %v217_v21 = vld [vmem:[%s1038_s1 + $0xd0] sm:$0xff]  ;;  %vm78_vm1 = vcmp.gt.s32.totalorder %v34_v4, 0 }
   0x7   :  { %311 = vmatpush.msra.mxu3 %v144_v7  ;;  %254 = vmatpush.msra.mxu1 %v220_v9  ;;  %v126_v14 = vld [vmem:[%s1039_s2 + $0x60] sm:$0xff]  ;;  %v125_v18 = vld [vmem:[%s1039_s2 + $0x58] sm:$0xff]  ;;  %v124_v22 = vld [vmem:[%s1039_s2 + $0x50] sm:$0xff] }
   0x8   :  { %v142_v15 = vld [vmem:[%s1039_s2 + $0xe0] sm:$0xff]  ;;  %283 = vmatpush.msra.mxu2 %v127_v10  ;;  %226 = vmatpush.msra.mxu0 %v203_v12  ;;  %v141_v19 = vld [vmem:[%s1039_s2 + $0xd8] sm:$0xff]  ;;  %v140_v23 = vld [vmem:[%s1039_s2 + $0xd0] sm:$0xff] }
   0x9   :  { %312 = vmatpush.msra.mxu3 %v143_v11  ;;  %255 = vmatpush.msra.mxu1 %v219_v13  ;;  %v200_v24 = vld [vmem:[%s1038_s1 + $0x48] sm:$0xff]  ;;  %v199_v28 = vld [vmem:[%s1038_s1 + $0x40] sm:$0xff]  ;;  %v198_v32 = vld [vmem:[%s1038_s1 + $0x38] sm:$0xff] }
   0xa   :  { %284 = vmatpush.msra.mxu2 %v126_v14  ;;  %227 = vmatpush.msra.mxu0 %v202_v16  ;;  %v216_v25 = vld [vmem:[%s1038_s1 + $0xc8] sm:$0xff]  ;;  %v215_v29 = vld [vmem:[%s1038_s1 + $0xc0] sm:$0xff]  ;;  %v214_v33 = vld [vmem:[%s1038_s1 + $0xb8] sm:$0xff] }
   0xb   :  { %313 = vmatpush.msra.mxu3 %v142_v15  ;;  %256 = vmatpush.msra.mxu1 %v218_v17  ;;  %v123_v26 = vld [vmem:[%s1039_s2 + $0x48] sm:$0xff]  ;;  %v122_v30 = vld [vmem:[%s1039_s2 + $0x40] sm:$0xff]  ;;  %v121_v34 = vld [vmem:[%s1039_s2 + $0x38] sm:$0xff] }
   0xc   :  { %285 = vmatpush.msra.mxu2 %v125_v18  ;;  %228 = vmatpush.msra.mxu0 %v201_v20  ;;  %v139_v27 = vld [vmem:[%s1039_s2 + $0xc8] sm:$0xff]  ;;  %v138_v31 = vld [vmem:[%s1039_s2 + $0xc0] sm:$0xff]  ;;  %v137_v35 = vld [vmem:[%s1039_s2 + $0xb8] sm:$0xff] }
   0xd   :  { %314 = vmatpush.msra.mxu3 %v141_v19  ;;  %257 = vmatpush.msra.mxu1 %v217_v21  ;;  %v197_v36 = vld [vmem:[%s1038_s1 + $0x30] sm:$0xff]  ;;  %v196_v40 = vld [vmem:[%s1038_s1 + $0x28] sm:$0xff]  ;;  %v195_v45 = vld [vmem:[%s1038_s1 + $0x20] sm:$0xff] }
   0xe   :  { %286 = vmatpush.msra.mxu2 %v124_v22  ;;  %229 = vmatpush.msra.mxu0 %v200_v24  ;;  %v213_v37 = vld [vmem:[%s1038_s1 + $0xb0] sm:$0xff]  ;;  %v212_v41 = vld [vmem:[%s1038_s1 + $0xa8] sm:$0xff]  ;;  %v211_v46 = vld [vmem:[%s1038_s1 + $0xa0] sm:$0xff] }
   0xf   :  { %315 = vmatpush.msra.mxu3 %v140_v23  ;;  %258 = vmatpush.msra.mxu1 %v216_v25  ;;  %v120_v38 = vld [vmem:[%s1039_s2 + $0x30] sm:$0xff]  ;;  %v119_v43 = vld [vmem:[%s1039_s2 + $0x28] sm:$0xff]  ;;  %v118_v49 = vld [vmem:[%s1039_s2 + $0x20] sm:$0xff] }
  0x10   :  { %287 = vmatpush.msra.mxu2 %v123_v26  ;;  %230 = vmatpush.msra.mxu0 %v199_v28  ;;  %v136_v39 = vld [vmem:[%s1039_s2 + $0xb0] sm:$0xff]  ;;  %v135_v44 = vld [vmem:[%s1039_s2 + $0xa8] sm:$0xff]  ;;  %v134_v50 = vld [vmem:[%s1039_s2 + $0xa0] sm:$0xff] }
  0x11   :  { %316 = vmatpush.msra.mxu3 %v139_v27  ;;  %259 = vmatpush.msra.mxu1 %v215_v29  ;;  %v795_v51 = vld [vmem:[%s1040_s0] sm:$0xff]  ;;  %v194_v52 = vld [vmem:[%s1038_s1 + $0x18] sm:$0xff]  ;;  %v809_v55 = vld [vmem:[%s1040_s0 + $0x8] sm:$0xff] }
  0x12   :  { %288 = vmatpush.msra.mxu2 %v122_v30  ;;  %231 = vmatpush.msra.mxu0 %v198_v32  ;;  %v210_v53 = vld [vmem:[%s1038_s1 + $0x98] sm:$0xff]  ;;  %86 = vst [vmem:[#allocation2 + $0x40] sm:$0xff] %v795_v51  ;;  %v193_v58 = vld [vmem:[%s1038_s1 + $0x10] sm:$0xff]  ;;  %v192_v2 = vld [vmem:[%s1038_s1 + $0x8] sm:$0xff]  ;;  %v158_v5 = vrot.slane %v795_v51, 7  ;;  %v161_v6 = vrot.slane %v809_v55, 7 }
  0x13   :  { %317 = vmatpush.msra.mxu3 %v138_v31  ;;  %260 = vmatpush.msra.mxu1 %v214_v33  ;;  %v117_v56 = vld [vmem:[%s1039_s2 + $0x18] sm:$0xff]  ;;  %87 = vst [vmem:[#allocation2 + $0x10] sm:$0xff] %v809_v55  ;;  %v209_v59 = vld [vmem:[%s1038_s1 + $0x90] sm:$0xff]  ;;  %v208_v3 = vld [vmem:[%s1038_s1 + $0x88] sm:$0xff]  ;;  %v28_v33 = vadd.s32 16, %v803_v54 }
  0x14   :  { %289 = vmatpush.msra.mxu2 %v121_v34  ;;  %232 = vmatpush.msra.mxu0 %v197_v36  ;;  %v133_v57 = vld [vmem:[%s1039_s2 + $0x98] sm:$0xff]  ;;  %v827_v60 = vld [vmem:[%s1040_s0 + $0x10] sm:$0xff]  ;;  %v115_v7 = vld [vmem:[%s1039_s2 + $0x8] sm:$0xff]  ;;  %v159_v15 = vsel %vm156_vm0, %v157_v63, %v158_v5  ;;  %v162_v16 = vsel %vm156_vm0, %v160_v0, %v161_v6 }
  0x15   :  { %318 = vmatpush.msra.mxu3 %v137_v35  ;;  %261 = vmatpush.msra.mxu1 %v213_v37  ;;  %v116_v61 = vld [vmem:[%s1039_s2 + $0x10] sm:$0xff]  ;;  %v838_v1 = vld [vmem:[%s1040_s0 + $0x18] sm:$0xff]  ;;  %v131_v8 = vld [vmem:[%s1039_s2 + $0x88] sm:$0xff]  ;;  %v163_v25 = vrot.slane %v827_v60, 7 }
  0x16   :  { %290 = vmatpush.msra.mxu2 %v120_v38  ;;  %233 = vmatpush.msra.mxu0 %v196_v40  ;;  %v132_v62 = vld [vmem:[%s1039_s2 + $0x90] sm:$0xff]  ;;  %v191_v9 = vld [vmem:[%s1038_s1] sm:$0xff]  ;;  %v875_v14 = vld [vmem:[%s1040_s0 + $0x28] sm:$0xff]  ;;  %v165_v26 = vrot.slane %v838_v1, 7  ;;  %v48_v38 = vand.u32 15, %v28_v33 }
  0x17   :  { %319 = vmatpush.msra.mxu3 %v136_v39  ;;  %262 = vmatpush.msra.mxu1 %v212_v41  ;;  %v207_v10 = vld [vmem:[%s1038_s1 + $0x80] sm:$0xff]  ;;  %v882_v17 = vld [vmem:[%s1040_s0 + $0x30] sm:$0xff]  ;;  %v887_v18 = vld [vmem:[%s1040_s0 + $0x38] sm:$0xff]  ;;  %v164_v29 = vsel %vm156_vm0, %v158_v5, %v163_v25  ;;  %v169_v40 = vrot.slane %v875_v14, 7 }
  0x18   :  { %291 = vmatpush.msra.mxu2 %v119_v43  ;;  %234 = vmatpush.msra.mxu0 %v195_v45  ;;  %v864_v11 = vld [vmem:[%s1040_s0 + $0x20] sm:$0xff]  ;;  %v399_v19 = vld [vmem:[%s1041_s3 + $0x78] sm:$0xff]  ;;  %92 = vst [vmem:[#allocation2 + $0x18] sm:$0xff] %v882_v17  ;;  %v398_v21 = vld [vmem:[%s1041_s3 + $0x70] sm:$0xff]  ;;  %v166_v30 = vsel %vm156_vm0, %v161_v6, %v165_v26  ;;  %vm80_vm2 = vcmp.gt.s32.totalorder %v48_v38, 0 }
  0x19   :  { %320 = vmatpush.msra.mxu3 %v135_v44  ;;  %263 = vmatpush.msra.mxu1 %v211_v46  ;;  %v114_v12 = vld [vmem:[%s1039_s2] sm:$0xff]  ;;  %v415_v20 = vld [vmem:[%s1041_s3 + $0xf8] sm:$0xff]  ;;  %93 = vst [vmem:[#allocation2 + $0x48] sm:$0xff] %v887_v18  ;;  %v414_v22 = vld [vmem:[%s1041_s3 + $0xf0] sm:$0xff]  ;;  %v167_v39 = vrot.slane %v864_v11, 7  ;;  %v170_v44 = vsel %vm156_vm0, %v165_v26, %v169_v40 }
  0x1a   :  { %292 = vmatpush.msra.mxu2 %v118_v49  ;;  %235 = vmatpush.msra.mxu0 %v194_v52  ;;  %v130_v13 = vld [vmem:[%s1039_s2 + $0x80] sm:$0xff]  ;;  %v397_v23 = vld [vmem:[%s1041_s3 + $0x68] sm:$0xff]  ;;  %v395_v31 = vld [vmem:[%s1041_s3 + $0x58] sm:$0xff] }
  0x1b   :  { %321 = vmatpush.msra.mxu3 %v134_v50  ;;  %264 = vmatpush.msra.mxu1 %v210_v53  ;;  %v413_v24 = vld [vmem:[%s1041_s3 + $0xe8] sm:$0xff]  ;;  %v396_v27 = vld [vmem:[%s1041_s3 + $0x60] sm:$0xff]  ;;  %v411_v32 = vld [vmem:[%s1041_s3 + $0xd8] sm:$0xff]  ;;  %v168_v43 = vsel %vm156_vm0, %v163_v25, %v167_v39 }
  0x1c   :  { %293 = vmatpush.msra.mxu2 %v117_v56  ;;  %236 = vmatpush.msra.mxu0 %v193_v58  ;;  %v412_v28 = vld [vmem:[%s1041_s3 + $0xe0] sm:$0xff]  ;;  %v394_v34 = vld [vmem:[%s1041_s3 + $0x50] sm:$0xff]  ;;  %v393_v36 = vld [vmem:[%s1041_s3 + $0x48] sm:$0xff] }
  0x1d   :  { %322 = vmatpush.msra.mxu3 %v133_v57  ;;  %265 = vmatpush.msra.mxu1 %v209_v59  ;;  %v410_v35 = vld [vmem:[%s1041_s3 + $0xd0] sm:$0xff]  ;;  %v409_v37 = vld [vmem:[%s1041_s3 + $0xc8] sm:$0xff]  ;;  %v392_v41 = vld [vmem:[%s1041_s3 + $0x40] sm:$0xff] }
  0x1e   :  { %294 = vmatpush.msra.mxu2 %v116_v61  ;;  %237 = vmatpush.msra.mxu0 %v192_v2  ;;  %v408_v42 = vld [vmem:[%s1041_s3 + $0xc0] sm:$0xff]  ;;  %v391_v45 = vld [vmem:[%s1041_s3 + $0x38] sm:$0xff]  ;;  %v390_v49 = vld [vmem:[%s1041_s3 + $0x30] sm:$0xff] }
  0x1f   :  { %323 = vmatpush.msra.mxu3 %v132_v62  ;;  %266 = vmatpush.msra.mxu1 %v208_v3  ;;  %v407_v46 = vld [vmem:[%s1041_s3 + $0xb8] sm:$0xff]  ;;  %v406_v50 = vld [vmem:[%s1041_s3 + $0xb0] sm:$0xff]  ;;  %v405_v52 = vld [vmem:[%s1041_s3 + $0xa8] sm:$0xff] }
  0x20   :  { %295 = vmatpush.msra.mxu2 %v115_v7  ;;  %238 = vmatpush.msra.mxu0 %v191_v9  ;;  %v102_v47 = vld [vmem:[#allocation2 + $0x18] sm:$0x7f]  ;;  %v103_v48 = vld [vmem:[#allocation2 + $0x48] sm:$0x7f]  ;;  %v388_v56 = vld [vmem:[%s1041_s3 + $0x20] sm:$0xff]  ;;  %v351_v7 = vrot.slane %v827_v60, 1 }
  0x21   :  { %324 = vmatpush.msra.mxu3 %v131_v8  ;;  %267 = vmatpush.msra.mxu1 %v207_v10  ;;  %v171_v53 = vrot.slane %v102_v47, 7  ;;  %v404_v57 = vld [vmem:[%s1041_s3 + $0xa0] sm:$0xff]  ;;  %v387_v61 = vld [vmem:[%s1041_s3 + $0x18] sm:$0xff]  ;;  %v386_v0 = vld [vmem:[%s1041_s3 + $0x10] sm:$0xff]  ;;  %v356_v8 = vrot.slane %v864_v11, 1  ;;  %v360_v9 = vrot.slane %v882_v17, 1 }
  0x22   :  { %296 = vmatpush.msra.mxu2 %v114_v12  ;;  %563 = vmatmul.msk.f32.vlgmr.msra.gmra.mxu0 %vm78_vm1, %v159_v15  ;;  %v403_v62 = vld [vmem:[%s1041_s3 + $0x98] sm:$0xff]  ;;  %v104_v63 = vld [vmem:[#allocation2 + $0x40] sm:$0xfe]  ;;  %v402_v2 = vld [vmem:[%s1041_s3 + $0x90] sm:$0xff]  ;;  %v354_v12 = vrot.slane %v838_v1, 1  ;;  %v362_v15 = vrot.slane %v887_v18, 1 }
  0x23   :  { %325 = vmatpush.msra.mxu3 %v130_v13  ;;  %565 = vmatmul.msk.f32.vlgmr.msra.gmra.mxu1 %vm78_vm1, %v162_v16  ;;  %v172_v58 = vsel %vm156_vm0, %v167_v39, %v171_v53  ;;  %v105_v3 = vld [vmem:[#allocation2 + $0x10] sm:$0xfe]  ;;  %v350_v4 = vrot.slane %v104_v63, 1  ;;  %v385_v5 = vld [vmem:[%s1041_s3 + $0x8] sm:$0xff]  ;;  %v358_v13 = vrot.slane %v875_v14, 1  ;;  %v384_v16 = vld [vmem:[%s1041_s3] sm:$0xff] }
  0x24   :  { %297 = vmatmul.f32.vlgmr.msra.gmra.mxu2 %v795_v51  ;;  %326 = vmatmul.f32.vlgmr.msra.gmra.mxu3 %v809_v55  ;;  %v389_v51 = vld [vmem:[%s1041_s3 + $0x28] sm:$0xff]  ;;  %v173_v55 = vrot.slane %v103_v48, 7  ;;  %v353_v10 = vrot.slane %v105_v3, 1 }
  0x25   :  { %575 = vmatpush.msrb.mxu2 %v399_v19  ;;  %591 = vmatpush.msrb.mxu3 %v415_v20  ;;  %v401_v6 = vld [vmem:[%s1041_s3 + $0x88] sm:$0xff] }
  0x26   :  { %416 = vmatpush.msrb.mxu0 %v399_v19  ;;  %445 = vmatpush.msrb.mxu1 %v415_v20  ;;  %v174_v59 = vsel %vm156_vm0, %v169_v40, %v173_v55  ;;  %v363_v19 = vsel %vm349_vm3, %v358_v13, %v362_v15  ;;  %v112_v20 = vld [vmem:[#allocation2 + $0x20] sm:$0x1] }
  0x27   :  { %576 = vmatpush.msrb.mxu2 %v398_v21  ;;  %592 = vmatpush.msrb.mxu3 %v414_v22 }
  0x28   :  { %417 = vmatpush.msrb.mxu0 %v398_v21  ;;  %446 = vmatpush.msrb.mxu1 %v414_v22  ;;  %v113_v21 = vld [vmem:[#allocation2] sm:$0x1] }
  0x29   :  { %577 = vmatpush.msrb.mxu2 %v397_v23  ;;  %593 = vmatpush.msrb.mxu3 %v413_v24  ;;  %v366_v25 = vrot.slane %v113_v21, 1 }
  0x2a   :  { %418 = vmatpush.msrb.mxu0 %v397_v23  ;;  %447 = vmatpush.msrb.mxu1 %v413_v24  ;;  %v364_v24 = vrot.slane %v112_v20, 1 }
  0x2b   :  { %578 = vmatpush.msrb.mxu2 %v396_v27  ;;  %594 = vmatpush.msrb.mxu3 %v412_v28 }
  0x2c   :  { %419 = vmatpush.msrb.mxu0 %v396_v27  ;;  %448 = vmatpush.msrb.mxu1 %v412_v28  ;;  %v365_v26 = vsel %vm349_vm3, %v360_v9, %v364_v24  ;;  %v359_v27 = vsel %vm349_vm3, %v354_v12, %v358_v13  ;;  %v367_v28 = vsel %vm349_vm3, %v362_v15, %v366_v25 }
  0x2d   :  { %242 = vmatmul.f32.gmra.mxu0 %v164_v29  ;;  %271 = vmatmul.f32.gmra.mxu1 %v166_v30 }
  0x2e   :  { %300 = vmatmul.f32.gmra.mxu2 %v827_v60  ;;  %329 = vmatmul.f32.gmra.mxu3 %v838_v1  ;;  %v400_v60 = vld [vmem:[%s1041_s3 + $0x80] sm:$0xff]  ;;  %v352_v1 = vsel %vm349_vm3, %v350_v4, %v351_v7 }
  0x2f   :  { %579 = vmatpush.msrb.mxu2 %v395_v31  ;;  %595 = vmatpush.msrb.mxu3 %v411_v32 }
  0x30   :  { %420 = vmatpush.msrb.mxu0 %v395_v31  ;;  %449 = vmatpush.msrb.mxu1 %v411_v32 }
  0x31   :  { %580 = vmatpush.msrb.mxu2 %v394_v34  ;;  %596 = vmatpush.msrb.mxu3 %v410_v35 }
  0x32   :  { %421 = vmatpush.msrb.mxu0 %v394_v34  ;;  %450 = vmatpush.msrb.mxu1 %v410_v35 }
  0x33   :  { %581 = vmatpush.msrb.mxu2 %v393_v36  ;;  %597 = vmatpush.msrb.mxu3 %v409_v37 }
  0x34   :  { %422 = vmatpush.msrb.mxu0 %v393_v36  ;;  %451 = vmatpush.msrb.mxu1 %v409_v37 }
  0x35   :  { %582 = vmatpush.msrb.mxu2 %v392_v41  ;;  %598 = vmatpush.msrb.mxu3 %v408_v42 }
  0x36   :  { %423 = vmatpush.msrb.mxu0 %v392_v41  ;;  %452 = vmatpush.msrb.mxu1 %v408_v42 }
  0x37   :  { %564 = vmatmul.msk.f32.gmra.mxu0 %vm80_vm2, %v168_v43  ;;  %566 = vmatmul.msk.f32.gmra.mxu1 %vm80_vm2, %v170_v44 }
  0x38   :  { %303 = vmatmul.f32.gmra.mxu2 %v864_v11  ;;  %332 = vmatmul.f32.gmra.mxu3 %v875_v14  ;;  %v361_v11 = vsel %vm349_vm3, %v356_v8, %v360_v9  ;;  %v27_v14 = vadd.s32 8, %v803_v54 }
  0x39   :  { %583 = vmatpush.msrb.mxu2 %v391_v45  ;;  %599 = vmatpush.msrb.mxu3 %v407_v46 }
  0x3a   :  { %424 = vmatpush.msrb.mxu0 %v391_v45  ;;  %453 = vmatpush.msrb.mxu1 %v407_v46  ;;  %v41_v22 = vand.u32 15, %v27_v14 }
  0x3b   :  { %584 = vmatpush.msrb.mxu2 %v390_v49  ;;  %600 = vmatpush.msrb.mxu3 %v406_v50 }
  0x3c   :  { %425 = vmatpush.msrb.mxu0 %v390_v49  ;;  %454 = vmatpush.msrb.mxu1 %v406_v50  ;;  %vm83_vm4 = vcmp.lt.s32.totalorder %v41_v22, 15 }
  0x3d   :  { %585 = vmatpush.msrb.mxu2 %v389_v51  ;;  %601 = vmatpush.msrb.mxu3 %v405_v52 }
  0x3e   :  { %426 = vmatpush.msrb.mxu0 %v389_v51  ;;  %455 = vmatpush.msrb.mxu1 %v405_v52 }
  0x3f   :  { %586 = vmatpush.msrb.mxu2 %v388_v56  ;;  %602 = vmatpush.msrb.mxu3 %v404_v57 }
  0x40   :  { %427 = vmatpush.msrb.mxu0 %v388_v56  ;;  %456 = vmatpush.msrb.mxu1 %v404_v57 }
  0x41   :  { %248 = vmatmul.f32.gmra.mxu0 %v172_v58  ;;  %277 = vmatmul.f32.gmra.mxu1 %v174_v59 }
  0x42   :  { %306 = vmatmul.f32.gmra.mxu2 %v882_v17  ;;  %335 = vmatmul.f32.gmra.mxu3 %v887_v18  ;;  %v29_v17 = vadd.s32 24, %v803_v54  ;;  %v355_v18 = vsel %vm349_vm3, %v353_v10, %v354_v12  ;;  %v357_v54 = vsel %vm349_vm3, %v351_v7, %v356_v8 }
  0x43   :  { %587 = vmatpush.msrb.mxu2 %v387_v61  ;;  %603 = vmatpush.msrb.mxu3 %v403_v62 }
  0x44   :  { %428 = vmatpush.msrb.mxu0 %v387_v61  ;;  %457 = vmatpush.msrb.mxu1 %v403_v62  ;;  %v55_v23 = vand.u32 15, %v29_v17 }
  0x45   :  { %588 = vmatpush.msrb.mxu2 %v386_v0  ;;  %604 = vmatpush.msrb.mxu3 %v402_v2 }
  0x46   :  { %429 = vmatpush.msrb.mxu0 %v386_v0  ;;  %458 = vmatpush.msrb.mxu1 %v402_v2  ;;  %vm85_vm5 = vcmp.lt.s32.totalorder %v55_v23, 15 }
  0x47   :  { %589 = vmatpush.msrb.mxu2 %v385_v5  ;;  %605 = vmatpush.msrb.mxu3 %v401_v6 }
  0x48   :  { %430 = vmatpush.msrb.mxu0 %v385_v5  ;;  %459 = vmatpush.msrb.mxu1 %v401_v6 }
  0x49   :  { %590 = vmatpush.msrb.mxu2 %v384_v16  ;;  %606 = vmatpush.msrb.mxu3 %v400_v60 }
  0x4a   :  { %431 = vmatpush.msrb.mxu0 %v384_v16  ;;  %460 = vmatpush.msrb.mxu1 %v400_v60 }
  0x4b   :  { %432 = vmatmul.f32.vlgmr.msrb.gmra.mxu0 %v352_v1  ;;  %438 = vmatmul.f32.vlgmr.msrb.gmra.mxu2 %v361_v11 }
  0x4c   :  { %461 = vmatmul.f32.vlgmr.msrb.gmra.mxu1 %v355_v18  ;;  %467 = vmatmul.f32.vlgmr.msrb.gmra.mxu3 %v363_v19 }
  0x53   :  { %567 = vmatmul.msk.f32.gmra.mxu0 %vm83_vm4, %v357_v54  ;;  %568 = vmatmul.msk.f32.gmra.mxu2 %vm85_vm5, %v365_v26 }
  0x54   :  { %569 = vmatmul.msk.f32.gmra.mxu1 %vm83_vm4, %v359_v27  ;;  %570 = vmatmul.msk.f32.gmra.mxu3 %vm85_vm5, %v367_v28 }
  0x9f   :  { %v240_v29 = vpop.f32.mrf.mxu0 }
  0xa0   :  { %v269_v30 = vpop.f32.mrf.mxu1 }
  0xa1   :  { %v270_v43 = vadd.f32 %v269_v30, %v240_v29 }
  0xa7   :  { %v298_v31 = vpop.f32.mrf.mxu2  ;;  %v327_v32 = vpop.f32.mrf.mxu3 }
  0xa8   :  { %v299_v46 = vadd.f32 %v298_v31, %v270_v43 }
  0xaa   :  { %v243_v33 = vpop.f32.mrf.mxu0  ;;  %v272_v34 = vpop.f32.mrf.mxu1  ;;  %v328_v50 = vadd.f32 %v327_v32, %v299_v46 }
  0xab   :  { %v273_v51 = vadd.f32 %v272_v34, %v243_v33 }
  0xb1   :  { %v301_v35 = vpop.f32.mrf.mxu2  ;;  %v330_v36 = vpop.f32.mrf.mxu3 }
  0xb2   :  { %v302_v56 = vadd.f32 %v301_v35, %v273_v51 }
  0xb4   :  { %v246_v37 = vpop.f32.mrf.mxu0  ;;  %v275_v38 = vpop.f32.mrf.mxu1  ;;  %v331_v3 = vadd.f32 %v330_v36, %v302_v56 }
  0xb5   :  { %v276_v47 = vadd.f32 %v275_v38, %v246_v37 }
  0xbb   :  { %v304_v39 = vpop.f32.mrf.mxu2  ;;  %v333_v40 = vpop.f32.mrf.mxu3 }
  0xbc   :  { %v305_v53 = vadd.f32 %v304_v39, %v276_v47 }
  0xbe   :  { %v249_v41 = vpop.f32.mrf.mxu0  ;;  %v278_v42 = vpop.f32.mrf.mxu1  ;;  %v334_v61 = vadd.f32 %v333_v40, %v305_v53 }
  0xbf   :  { %v279_v62 = vadd.f32 %v278_v42, %v249_v41 }
  0xc5   :  { %v307_v44 = vpop.f32.mrf.mxu2  ;;  %v336_v45 = vpop.f32.mrf.mxu3 }
  0xc6   :  { %v308_v6 = vadd.f32 %v307_v44, %v279_v62 }
  0xc8   :  { %v433_v48 = vpop.f32.mrf.mxu0  ;;  %v337_v16 = vadd.f32 %v336_v45, %v308_v6 }
  0xc9   :  { %v462_v49 = vpop.f32.mrf.mxu1 }
  0xca   :  { %v463_v52 = vadd.f32 %v462_v49, %v433_v48 }
  0xcc   :  { %v474_v55 = vadd.f32 %v463_v52, %v328_v50 }
  0xce   :  { %v571_v57 = vmul.f32 -1.442695, %v474_v55  ;;  %v439_v58 = vpop.f32.mrf.mxu2 }
  0xcf   :  { %v468_v59 = vpop.f32.mrf.mxu3 }
  0xd0   :  { %607 = vpow2.f32 %v571_v57  ;;  %v469_v63 = vadd.f32 %v468_v59, %v439_v58  ;;  %v436_v0 = vpop.f32.mrf.mxu0 }
  0xd1   :  { %v465_v2 = vpop.f32.mrf.mxu1 }
  0xd2   :  { %v476_v4 = vadd.f32 %v469_v63, %v334_v61  ;;  %v466_v5 = vadd.f32 %v465_v2, %v436_v0 }
  0xd4   :  { %v573_v7 = vmul.f32 -1.442695, %v476_v4  ;;  %v475_v8 = vadd.f32 %v466_v5, %v331_v3 }
  0xd6   :  { %v608_v9 = vpop.eup %607  ;;  %609 = vpow2.f32 %v573_v7  ;;  %v572_v10 = vmul.f32 -1.442695, %v475_v8  ;;  %v442_v12 = vpop.f32.mrf.mxu2 }
  0xd7   :  { %v490_v13 = vadd.f32 1.0, %v608_v9  ;;  %v471_v15 = vpop.f32.mrf.mxu3 }
  0xd8   :  { %611 = vpow2.f32 %v572_v10  ;;  %v472_v60 = vadd.f32 %v471_v15, %v442_v12 }
  0xd9   :  { %613 = vrcp.f32 %v490_v13  ;;  %v505_v23 = vand.u32 2147483648, %v490_v13  ;;  %v503_v54 = vand.u32 2147483647, %v490_v13  ;;  %vm499_vm7 = vweird.f32 %v490_v13 }
  0xda   :  { %v477_v1 = vadd.f32 %v472_v60, %v337_v16 }
  0xdb   :  { %v506_v30 = vor.u32 1.1754944e-38, %v505_v23  ;;  %vm504_vm10 = vcmp.eq.f32.partialorder %v503_v54, 8.507059e+37 }
  0xdc   :  { %v610_v11 = vpop.eup %609  ;;  %v574_v14 = vmul.f32 -1.442695, %v477_v1 }
  0xdd   :  { %v492_v17 = vadd.f32 1.0, %v610_v11 }
  0xde   :  { %v612_v18 = vpop.eup %611  ;;  %615 = vpow2.f32 %v574_v14 }
  0xdf   :  { %v614_v19 = vpop.eup %613  ;;  %617 = vrcp.f32 %v492_v17  ;;  %v491_v21 = vadd.f32 1.0, %v612_v18  ;;  %v535_v35 = vand.u32 2147483648, %v492_v17  ;;  %v533_v38 = vand.u32 2147483647, %v492_v17 }
  0xe0   :  { %v495_v20 = vmul.f32 %v614_v19, %v490_v13  ;;  %vm500_vm6 = vweird.f32 %v614_v19  ;;  %vm529_vm12 = vweird.f32 %v492_v17 }
  0xe1   :  { %619 = vrcp.f32 %v491_v21  ;;  %vm501_vm8 = vmor %vm499_vm7, %vm500_vm6  ;;  %v520_v41 = vand.u32 2147483648, %v491_v21  ;;  %v536_v43 = vor.u32 1.1754944e-38, %v535_v35  ;;  %v518_v45 = vand.u32 2147483647, %v491_v21 }
  0xe2   :  { %v496_v22 = vsub.f32 1.0, %v495_v20  ;;  %vm534_vm15 = vcmp.eq.f32.partialorder %v533_v38, 8.507059e+37  ;;  %vm514_vm0 = vweird.f32 %v491_v21 }
  0xe3   :  { %v521_v50 = vor.u32 1.1754944e-38, %v520_v41  ;;  %vm519_vm2 = vcmp.eq.f32.partialorder %v518_v45, 8.507059e+37 }
  0xe4   :  { %v616_v24 = vpop.eup %615  ;;  %v497_v25 = vmul.f32 %v614_v19, %v496_v22 }
  0xe5   :  { %v618_v26 = vpop.eup %617  ;;  %v493_v27 = vadd.f32 1.0, %v616_v24 }
  0xe6   :  { %v498_v28 = vadd.f32 %v614_v19, %v497_v25  ;;  %v525_v29 = vmul.f32 %v618_v26, %v492_v17  ;;  %vm530_vm11 = vweird.f32 %v618_v26 }
  0xe7   :  { %621 = vrcp.f32 %v493_v27  ;;  %v620_v31 = vpop.eup %619  ;;  %vm531_vm13 = vmor %vm529_vm12, %vm530_vm11  ;;  %v550_v53 = vand.u32 2147483648, %v493_v27  ;;  %v548_v57 = vand.u32 2147483647, %v493_v27  ;;  %vm544_vm4 = vweird.f32 %v493_v27 }
  0xe8   :  { %v502_v32 = vsel %vm501_vm8, %v614_v19, %v498_v28  ;;  %v526_v33 = vsub.f32 1.0, %v525_v29  ;;  %v510_v36 = vmul.f32 %v620_v31, %v491_v21  ;;  %vm515_vm14 = vweird.f32 %v620_v31 }
  0xe9   :  { %v507_v34 = vsel %vm504_vm10, %v506_v30, %v502_v32  ;;  %vm516_vm1 = vmor %vm514_vm0, %vm515_vm14  ;;  %v551_v59 = vor.u32 1.1754944e-38, %v550_v53  ;;  %vm549_vm6 = vcmp.eq.f32.partialorder %v548_v57, 8.507059e+37 }
  0xea   :  { %555 = vst.msk [vmem:[%s1042_s4] sm:$0xff] %vm554_vm9, %v507_v34  ;;  %v527_v37 = vmul.f32 %v618_v26, %v526_v33  ;;  %v511_v39 = vsub.f32 1.0, %v510_v36 }
  0xec   :  { %v528_v40 = vadd.f32 %v618_v26, %v527_v37  ;;  %v512_v44 = vmul.f32 %v620_v31, %v511_v39 }
  0xed   :  { %v622_v42 = vpop.eup %621 }
  0xee   :  { %v532_v46 = vsel %vm531_vm13, %v618_v26, %v528_v40  ;;  %v540_v47 = vmul.f32 %v622_v42, %v493_v27  ;;  %v513_v49 = vadd.f32 %v620_v31, %v512_v44  ;;  %vm545_vm3 = vweird.f32 %v622_v42 }
  0xef   :  { %v537_v48 = vsel %vm534_vm15, %v536_v43, %v532_v46  ;;  %vm546_vm5 = vmor %vm544_vm4, %vm545_vm3 }
  0xf0   :  { %557 = vst.msk [vmem:[%s1042_s4 + $0x10] sm:$0xff] %vm554_vm9, %v537_v48  ;;  %v541_v51 = vsub.f32 1.0, %v540_v47  ;;  %v517_v52 = vsel %vm516_vm1, %v620_v31, %v513_v49 }
  0xf1   :  { %v522_v55 = vsel %vm519_vm2, %v521_v50, %v517_v52 }
  0xf2   :  { %v542_v56 = vmul.f32 %v622_v42, %v541_v51  ;;  %556 = vst.msk [vmem:[%s1042_s4 + $0x8] sm:$0xff] %vm554_vm9, %v522_v55 }
  0xf4   :  { %v543_v58 = vadd.f32 %v622_v42, %v542_v56 }
  0xf6   :  { %v547_v61 = vsel %vm546_vm5, %v622_v42, %v543_v58 }
  0xf7   :  { %v552_v62 = vsel %vm549_vm6, %v551_v59, %v547_v61 }
  0xf8   :  { %558 = vst.msk [vmem:[%s1042_s4 + $0x18] sm:$0xff] %vm554_vm9, %v552_v62 }

</bundles_post_ra>
